<compile_context>
chip_gen: v5e
topology: v5e:2x2
jax: 0.10.0
libtpu: 0.0.40
codegen_flags: <defaults>
</compile_context>

<pallas_src>
import jax
import jax.numpy as jnp
from jax import lax
from jax.experimental import pallas as pl
from jax.experimental.pallas import tpu as pltpu

INPUT_DIM = 3
HIDDEN_DIM = 64
NUM_LAYERS = 2
PRED_LEN = 3


def _lstm_fc_kernel(x_ref,      # (T, B, D)   time-major inputs
                    wih0_ref,   # (D, 4H)     layer-0 input weights,   gate order [f,i,o,g]
                    whh0_ref,   # (H, 4H)     layer-0 recurrent weights
                    wih1_ref,   # (H, 4H)     layer-1 input weights
                    whh1_ref,   # (H, 4H)     layer-1 recurrent weights
                    b0_ref,     # (1, 4H)     layer-0 bias (ih+hh)
                    b1_ref,     # (1, 4H)     layer-1 bias (ih+hh)
                    wfc_ref,    # (H, OUT)
                    bfc_ref,    # (1, OUT)
                    out_ref):   # (B, OUT)
    T, B, D = x_ref.shape
    G = wih0_ref.shape[1]
    H = G // 4

    # Hoist all weight / bias loads out of the (unrolled) recurrence.
    wih0 = wih0_ref[...]
    whh0 = whh0_ref[...]
    wih1 = wih1_ref[...]
    whh1 = whh1_ref[...]
    b0 = b0_ref[...]
    b1 = b1_ref[...]

    def cell_act(gates, c):
        # Gate layout [f | i | o | g]: f sits in the low half-lanes, aligned with c.
        # One sigmoid over 3H lanes, one tanh over H lanes.
        sig = jax.nn.sigmoid(gates[:, :3 * H])
        g_g = jnp.tanh(gates[:, 3 * H:])
        f_g = sig[:, :H]
        i_g = sig[:, H:2 * H]
        o_g = sig[:, 2 * H:]
        c_new = f_g * c + i_g * g_g
        h_new = o_g * jnp.tanh(c_new)
        return h_new, c_new

    def in_proj(t):
        # Layer-0 input projection for step t: D=3 broadcast-FMAs on the VPU (no MXU
        # padding for K=3, no recurrent dependence -> hidden off the critical chain).
        x_t = x_ref[t]                                  # (B, D)
        acc = b0                                        # (1, 4H) -> broadcasts to (B, 4H)
        for d in range(D):
            acc = acc + x_t[:, d:d + 1] * wih0[d:d + 1, :]
        return acc

    def body(t, carry):
        h1, c1, h2, c2 = carry
        # p2 depends only on the previous step's h2 -> off the h1 serial chain.
        p2 = jnp.dot(h2, whh1, preferred_element_type=jnp.float32) + b1
        # Layer 0: only the recurrent matmul sits on the serial chain.
        g0 = in_proj(t) + jnp.dot(h1, whh0, preferred_element_type=jnp.float32)
        h1, c1 = cell_act(g0, c1)
        # Layer 1 (K=H matmul on the fresh h1 only).
        g1 = jnp.dot(h1, wih1, preferred_element_type=jnp.float32) + p2
        h2, c2 = cell_act(g1, c2)
        return (h1, c1, h2, c2)

    z = jnp.zeros((B, H), jnp.float32)
    # Fully unrolled: single basic block -> LLO scheduler overlaps layer-0(t+1) with
    # layer-1(t) (they are data-independent), and hoists in_proj off the chain entirely.
    _, _, h2, _ = lax.fori_loop(0, T, body, (z, z, z, z), unroll=True)

    # out = sigmoid(fc(h2_last))
    logits = jnp.dot(h2, wfc_ref[...], preferred_element_type=jnp.float32) + bfc_ref[...]
    out_ref[...] = jax.nn.sigmoid(logits)


def _reorder_gates(w):
    """Permute gate blocks along the last axis from PyTorch [i, f, g, o] to [f, i, o, g]."""
    H = w.shape[-1] // 4
    i, f, g, o = w[..., :H], w[..., H:2 * H], w[..., 2 * H:3 * H], w[..., 3 * H:]
    return jnp.concatenate([f, i, o, g], axis=-1)


def prepare_params(params):
    """One-time parameter layout preparation (run once at init, NOT per forward call)."""
    prep = {
        "wih0": _reorder_gates(params["wih0"]),
        "whh0": _reorder_gates(params["whh0"]),
        "wih1": _reorder_gates(params["wih1"]),
        "whh1": _reorder_gates(params["whh1"]),
        "b0": _reorder_gates(params["b0"]),
        "b1": _reorder_gates(params["b1"]),
        "wfc": params["wfc"],
        "bfc": params["bfc"],
    }
    return jax.tree_util.tree_map(jnp.asarray, prep)


@jax.jit
def risk_sequence_model(x, prep):
    """x: (B, T, INPUT_DIM) float32 (batch-first, like the PyTorch module)."""
    B, T, D = x.shape

    # Only remaining wrapper op: batch-first -> time-major (T*B*12 bytes; negligible).
    x_tm = jnp.transpose(x, (1, 0, 2))                  # (T, B, D)

    vmem = pl.BlockSpec(memory_space=pltpu.MemorySpace.VMEM)
    # TODO(synk): at non-trivial B/T add a grid over batch chunks
    # (dimension_semantics=("parallel",)) with weights replicated via index_map.
    out = pl.pallas_call(
        _lstm_fc_kernel,
        out_shape=jax.ShapeDtypeStruct((B, PRED_LEN), jnp.float32),
        in_specs=[vmem] * 9,
        out_specs=vmem,
    )(x_tm, prep["wih0"], prep["whh0"], prep["wih1"], prep["whh1"],
      prep["b0"], prep["b1"], prep["wfc"], prep["bfc"])
    return out


def init_params(key):
    """Deterministic parameter init mimicking PyTorch LSTM/Linear uniform(-1/sqrt(H), 1/sqrt(H))."""
    H, D, O = HIDDEN_DIM, INPUT_DIM, PRED_LEN
    k = 1.0 / jnp.sqrt(jnp.float32(H))
    keys = jax.random.split(key, 12)
    u = lambda kk, shape, bound: jax.random.uniform(kk, shape, jnp.float32, -bound, bound)

    # PyTorch stores weight_ih_l* as (4H, in); we keep the transposed (in, 4H) layout,
    # gate order [i, f, g, o] (prepare_params permutes to [f, i, o, g] for the kernel).
    wih0 = u(keys[0], (D, 4 * H), k)
    whh0 = u(keys[1], (H, 4 * H), k)
    b0 = (u(keys[2], (4 * H,), k) + u(keys[3], (4 * H,), k)).reshape(1, 4 * H)  # bias_ih + bias_hh

    wih1 = u(keys[4], (H, 4 * H), k)
    whh1 = u(keys[5], (H, 4 * H), k)
    b1 = (u(keys[6], (4 * H,), k) + u(keys[7], (4 * H,), k)).reshape(1, 4 * H)

    wfc = u(keys[8], (H, O), k)
    bfc = u(keys[9], (O,), k).reshape(1, O)

    return {"wih0": wih0, "whh0": whh0, "b0": b0,
            "wih1": wih1, "whh1": whh1, "b1": b1,
            "wfc": wfc, "bfc": bfc}


def reference_forward(x, params):
    """Pure-JAX reference (lax.scan) of the same forward pass, for verification."""
    H = HIDDEN_DIM
    B = x.shape[0]

    def cell(x_t, h, c, wih, whh, b):
        gates = x_t @ wih + h @ whh + b
        i = jax.nn.sigmoid(gates[:, 0:H])
        f = jax.nn.sigmoid(gates[:, H:2 * H])
        g = jnp.tanh(gates[:, 2 * H:3 * H])
        o = jax.nn.sigmoid(gates[:, 3 * H:4 * H])
        c_new = f * c + i * g
        h_new = o * jnp.tanh(c_new)
        return h_new, c_new

    def step(carry, x_t):
        h1, c1, h2, c2 = carry
        h1, c1 = cell(x_t, h1, c1, params["wih0"], params["whh0"], params["b0"])
        h2, c2 = cell(h1, h2, c2, params["wih1"], params["whh1"], params["b1"])
        return (h1, c1, h2, c2), None

    z = jnp.zeros((B, H), jnp.float32)
    (h1, c1, h2, c2), _ = lax.scan(step, (z, z, z, z), jnp.transpose(x, (1, 0, 2)))
    return jax.nn.sigmoid(h2 @ params["wfc"] + params["bfc"])


if __name__ == "__main__":
    key = jax.random.PRNGKey(0)
    k_x, k_p = jax.random.split(key)

    B, T = 2, 8
    x = jax.random.normal(k_x, (B, T, INPUT_DIM), dtype=jnp.float32)
    params = init_params(k_p)
    prep = prepare_params(params)          # one-time layout prep, outside the traced forward

    out = jax.block_until_ready(risk_sequence_model(x, prep))
    ref = jax.block_until_ready(reference_forward(x, params))

    assert out.shape == (B, PRED_LEN), out.shape
    # Tolerance accounts for MXU default matmul precision in the reference's XLA dots vs.
    # the kernel's exact-f32 VPU input projection (see review correctness note).
    assert jnp.allclose(out, ref, atol=2e-3, rtol=2e-3), (out, ref)

    print("KERNEL_OK")
</pallas_src>

<mosaic_0001>
module attributes {stable_mosaic.version = 11 : i64} {
  func.func @_lstm_fc_kernel(%arg0: memref<8x2x3xf32, #tpu.memory_space<vmem>>, %arg1: memref<3x256xf32, #tpu.memory_space<vmem>>, %arg2: memref<64x256xf32, #tpu.memory_space<vmem>>, %arg3: memref<64x256xf32, #tpu.memory_space<vmem>>, %arg4: memref<64x256xf32, #tpu.memory_space<vmem>>, %arg5: memref<1x256xf32, #tpu.memory_space<vmem>>, %arg6: memref<1x256xf32, #tpu.memory_space<vmem>>, %arg7: memref<64x3xf32, #tpu.memory_space<vmem>>, %arg8: memref<1x3xf32, #tpu.memory_space<vmem>>, %arg9: memref<2x3xf32, #tpu.memory_space<vmem>>) attributes {dimension_semantics = [], scalar_prefetch = 0 : i64, scratch_operands = 0 : i64, tpu.core_type = #tpu.core_type<tc>} {
    %c0 = arith.constant 0 : index
    %c0_0 = arith.constant 0 : index
    %0 = vector.load %arg1[%c0, %c0_0] : memref<3x256xf32, #tpu.memory_space<vmem>>, vector<3x256xf32>
    %c0_1 = arith.constant 0 : index
    %c0_2 = arith.constant 0 : index
    %1 = vector.load %arg2[%c0_1, %c0_2] : memref<64x256xf32, #tpu.memory_space<vmem>>, vector<64x256xf32>
    %c0_3 = arith.constant 0 : index
    %c0_4 = arith.constant 0 : index
    %2 = vector.load %arg3[%c0_3, %c0_4] : memref<64x256xf32, #tpu.memory_space<vmem>>, vector<64x256xf32>
    %c0_5 = arith.constant 0 : index
    %c0_6 = arith.constant 0 : index
    %3 = vector.load %arg4[%c0_5, %c0_6] : memref<64x256xf32, #tpu.memory_space<vmem>>, vector<64x256xf32>
    %c0_7 = arith.constant 0 : index
    %c0_8 = arith.constant 0 : index
    %4 = vector.load %arg5[%c0_7, %c0_8] : memref<1x256xf32, #tpu.memory_space<vmem>>, vector<1x256xf32>
    %c0_9 = arith.constant 0 : index
    %c0_10 = arith.constant 0 : index
    %5 = vector.load %arg6[%c0_9, %c0_10] : memref<1x256xf32, #tpu.memory_space<vmem>>, vector<1x256xf32>
    %cst = arith.constant 0.000000e+00 : f32
    %6 = vector.broadcast %cst : f32 to vector<2x64xf32>
    %c0_i32 = arith.constant 0 : i32
    %cst_11 = arith.constant dense<0.000000e+00> : vector<2x256xf32>
    %7 = tpu.matmul %6, %3, %cst_11 {dimension_numbers = #tpu.dot_dimension_numbers<[1], [0], [0], [1], [0, 0, 1, 1], [], []>} : vector<2x64xf32>, vector<64x256xf32>, vector<2x256xf32> -> vector<2x256xf32>
    %8 = vector.broadcast %5 : vector<1x256xf32> to vector<2x256xf32>
    %9 = arith.addf %7, %8 : vector<2x256xf32>
    %10 = arith.index_cast %c0_i32 : i32 to index
    %c0_12 = arith.constant 0 : index
    %c0_13 = arith.constant 0 : index
    %11 = vector.load %arg0[%10, %c0_12, %c0_13] : memref<8x2x3xf32, #tpu.memory_space<vmem>>, vector<1x2x3xf32>
    %12 = vector.shape_cast %11 : vector<1x2x3xf32> to vector<2x3xf32>
    %13 = vector.extract_strided_slice %12 {offsets = [0, 0], sizes = [2, 1], strides = [1, 1]} : vector<2x3xf32> to vector<2x1xf32>
    %14 = vector.extract_strided_slice %0 {offsets = [0, 0], sizes = [1, 256], strides = [1, 1]} : vector<3x256xf32> to vector<1x256xf32>
    %15 = vector.broadcast %13 : vector<2x1xf32> to vector<2x256xf32>
    %16 = vector.broadcast %14 : vector<1x256xf32> to vector<2x256xf32>
    %17 = arith.mulf %15, %16 : vector<2x256xf32>
    %18 = vector.broadcast %4 : vector<1x256xf32> to vector<2x256xf32>
    %19 = arith.addf %18, %17 : vector<2x256xf32>
    %20 = vector.extract_strided_slice %12 {offsets = [0, 1], sizes = [2, 1], strides = [1, 1]} : vector<2x3xf32> to vector<2x1xf32>
    %21 = vector.extract_strided_slice %0 {offsets = [1, 0], sizes = [1, 256], strides = [1, 1]} : vector<3x256xf32> to vector<1x256xf32>
    %22 = vector.broadcast %20 : vector<2x1xf32> to vector<2x256xf32>
    %23 = vector.broadcast %21 : vector<1x256xf32> to vector<2x256xf32>
    %24 = arith.mulf %22, %23 : vector<2x256xf32>
    %25 = arith.addf %19, %24 : vector<2x256xf32>
    %26 = vector.extract_strided_slice %12 {offsets = [0, 2], sizes = [2, 1], strides = [1, 1]} : vector<2x3xf32> to vector<2x1xf32>
    %27 = vector.extract_strided_slice %0 {offsets = [2, 0], sizes = [1, 256], strides = [1, 1]} : vector<3x256xf32> to vector<1x256xf32>
    %28 = vector.broadcast %26 : vector<2x1xf32> to vector<2x256xf32>
    %29 = vector.broadcast %27 : vector<1x256xf32> to vector<2x256xf32>
    %30 = arith.mulf %28, %29 : vector<2x256xf32>
    %31 = arith.addf %25, %30 : vector<2x256xf32>
    %cst_14 = arith.constant dense<0.000000e+00> : vector<2x256xf32>
    %32 = tpu.matmul %6, %1, %cst_14 {dimension_numbers = #tpu.dot_dimension_numbers<[1], [0], [0], [1], [0, 0, 1, 1], [], []>} : vector<2x64xf32>, vector<64x256xf32>, vector<2x256xf32> -> vector<2x256xf32>
    %33 = arith.addf %31, %32 : vector<2x256xf32>
    %34 = vector.extract_strided_slice %33 {offsets = [0, 0], sizes = [2, 192], strides = [1, 1]} : vector<2x256xf32> to vector<2x192xf32>
    %35 = arith.negf %34 : vector<2x192xf32>
    %36 = math.exp %35 : vector<2x192xf32>
    %cst_15 = arith.constant 1.000000e+00 : f32
    %37 = vector.broadcast %cst_15 : f32 to vector<2x192xf32>
    %38 = arith.addf %37, %36 : vector<2x192xf32>
    %39 = arith.divf %37, %38 : vector<2x192xf32>
    %40 = vector.extract_strided_slice %33 {offsets = [0, 192], sizes = [2, 64], strides = [1, 1]} : vector<2x256xf32> to vector<2x64xf32>
    %41 = math.tanh %40 : vector<2x64xf32>
    %42 = vector.extract_strided_slice %39 {offsets = [0, 0], sizes = [2, 64], strides = [1, 1]} : vector<2x192xf32> to vector<2x64xf32>
    %43 = vector.extract_strided_slice %39 {offsets = [0, 64], sizes = [2, 64], strides = [1, 1]} : vector<2x192xf32> to vector<2x64xf32>
    %44 = vector.extract_strided_slice %39 {offsets = [0, 128], sizes = [2, 64], strides = [1, 1]} : vector<2x192xf32> to vector<2x64xf32>
    %45 = arith.mulf %42, %6 : vector<2x64xf32>
    %46 = arith.mulf %43, %41 : vector<2x64xf32>
    %47 = arith.addf %45, %46 : vector<2x64xf32>
    %48 = math.tanh %47 : vector<2x64xf32>
    %49 = arith.mulf %44, %48 : vector<2x64xf32>
    %cst_16 = arith.constant dense<0.000000e+00> : vector<2x256xf32>
    %50 = tpu.matmul %49, %2, %cst_16 {dimension_numbers = #tpu.dot_dimension_numbers<[1], [0], [0], [1], [0, 0, 1, 1], [], []>} : vector<2x64xf32>, vector<64x256xf32>, vector<2x256xf32> -> vector<2x256xf32>
    %51 = arith.addf %50, %9 : vector<2x256xf32>
    %52 = vector.extract_strided_slice %51 {offsets = [0, 0], sizes = [2, 192], strides = [1, 1]} : vector<2x256xf32> to vector<2x192xf32>
    %53 = arith.negf %52 : vector<2x192xf32>
    %54 = math.exp %53 : vector<2x192xf32>
    %cst_17 = arith.constant 1.000000e+00 : f32
    %55 = vector.broadcast %cst_17 : f32 to vector<2x192xf32>
    %56 = arith.addf %55, %54 : vector<2x192xf32>
    %57 = arith.divf %55, %56 : vector<2x192xf32>
    %58 = vector.extract_strided_slice %51 {offsets = [0, 192], sizes = [2, 64], strides = [1, 1]} : vector<2x256xf32> to vector<2x64xf32>
    %59 = math.tanh %58 : vector<2x64xf32>
    %60 = vector.extract_strided_slice %57 {offsets = [0, 0], sizes = [2, 64], strides = [1, 1]} : vector<2x192xf32> to vector<2x64xf32>
    %61 = vector.extract_strided_slice %57 {offsets = [0, 64], sizes = [2, 64], strides = [1, 1]} : vector<2x192xf32> to vector<2x64xf32>
    %62 = vector.extract_strided_slice %57 {offsets = [0, 128], sizes = [2, 64], strides = [1, 1]} : vector<2x192xf32> to vector<2x64xf32>
    %63 = arith.mulf %60, %6 : vector<2x64xf32>
    %64 = arith.mulf %61, %59 : vector<2x64xf32>
    %65 = arith.addf %63, %64 : vector<2x64xf32>
    %66 = math.tanh %65 : vector<2x64xf32>
    %67 = arith.mulf %62, %66 : vector<2x64xf32>
    %c1_i32 = arith.constant 1 : i32
    %cst_18 = arith.constant dense<0.000000e+00> : vector<2x256xf32>
    %68 = tpu.matmul %67, %3, %cst_18 {dimension_numbers = #tpu.dot_dimension_numbers<[1], [0], [0], [1], [0, 0, 1, 1], [], []>} : vector<2x64xf32>, vector<64x256xf32>, vector<2x256xf32> -> vector<2x256xf32>
    %69 = vector.broadcast %5 : vector<1x256xf32> to vector<2x256xf32>
    %70 = arith.addf %68, %69 : vector<2x256xf32>
    %71 = arith.index_cast %c1_i32 : i32 to index
    %c0_19 = arith.constant 0 : index
    %c0_20 = arith.constant 0 : index
    %72 = vector.load %arg0[%71, %c0_19, %c0_20] : memref<8x2x3xf32, #tpu.memory_space<vmem>>, vector<1x2x3xf32>
    %73 = vector.shape_cast %72 : vector<1x2x3xf32> to vector<2x3xf32>
    %74 = vector.extract_strided_slice %73 {offsets = [0, 0], sizes = [2, 1], strides = [1, 1]} : vector<2x3xf32> to vector<2x1xf32>
    %75 = vector.extract_strided_slice %0 {offsets = [0, 0], sizes = [1, 256], strides = [1, 1]} : vector<3x256xf32> to vector<1x256xf32>
    %76 = vector.broadcast %74 : vector<2x1xf32> to vector<2x256xf32>
    %77 = vector.broadcast %75 : vector<1x256xf32> to vector<2x256xf32>
    %78 = arith.mulf %76, %77 : vector<2x256xf32>
    %79 = vector.broadcast %4 : vector<1x256xf32> to vector<2x256xf32>
    %80 = arith.addf %79, %78 : vector<2x256xf32>
    %81 = vector.extract_strided_slice %73 {offsets = [0, 1], sizes = [2, 1], strides = [1, 1]} : vector<2x3xf32> to vector<2x1xf32>
    %82 = vector.extract_strided_slice %0 {offsets = [1, 0], sizes = [1, 256], strides = [1, 1]} : vector<3x256xf32> to vector<1x256xf32>
    %83 = vector.broadcast %81 : vector<2x1xf32> to vector<2x256xf32>
    %84 = vector.broadcast %82 : vector<1x256xf32> to vector<2x256xf32>
    %85 = arith.mulf %83, %84 : vector<2x256xf32>
    %86 = arith.addf %80, %85 : vector<2x256xf32>
    %87 = vector.extract_strided_slice %73 {offsets = [0, 2], sizes = [2, 1], strides = [1, 1]} : vector<2x3xf32> to vector<2x1xf32>
    %88 = vector.extract_strided_slice %0 {offsets = [2, 0], sizes = [1, 256], strides = [1, 1]} : vector<3x256xf32> to vector<1x256xf32>
    %89 = vector.broadcast %87 : vector<2x1xf32> to vector<2x256xf32>
    %90 = vector.broadcast %88 : vector<1x256xf32> to vector<2x256xf32>
    %91 = arith.mulf %89, %90 : vector<2x256xf32>
    %92 = arith.addf %86, %91 : vector<2x256xf32>
    %cst_21 = arith.constant dense<0.000000e+00> : vector<2x256xf32>
    %93 = tpu.matmul %49, %1, %cst_21 {dimension_numbers = #tpu.dot_dimension_numbers<[1], [0], [0], [1], [0, 0, 1, 1], [], []>} : vector<2x64xf32>, vector<64x256xf32>, vector<2x256xf32> -> vector<2x256xf32>
    %94 = arith.addf %92, %93 : vector<2x256xf32>
    %95 = vector.extract_strided_slice %94 {offsets = [0, 0], sizes = [2, 192], strides = [1, 1]} : vector<2x256xf32> to vector<2x192xf32>
    %96 = arith.negf %95 : vector<2x192xf32>
    %97 = math.exp %96 : vector<2x192xf32>
    %cst_22 = arith.constant 1.000000e+00 : f32
    %98 = vector.broadcast %cst_22 : f32 to vector<2x192xf32>
    %99 = arith.addf %98, %97 : vector<2x192xf32>
    %100 = arith.divf %98, %99 : vector<2x192xf32>
    %101 = vector.extract_strided_slice %94 {offsets = [0, 192], sizes = [2, 64], strides = [1, 1]} : vector<2x256xf32> to vector<2x64xf32>
    %102 = math.tanh %101 : vector<2x64xf32>
    %103 = vector.extract_strided_slice %100 {offsets = [0, 0], sizes = [2, 64], strides = [1, 1]} : vector<2x192xf32> to vector<2x64xf32>
    %104 = vector.extract_strided_slice %100 {offsets = [0, 64], sizes = [2, 64], strides = [1, 1]} : vector<2x192xf32> to vector<2x64xf32>
    %105 = vector.extract_strided_slice %100 {offsets = [0, 128], sizes = [2, 64], strides = [1, 1]} : vector<2x192xf32> to vector<2x64xf32>
    %106 = arith.mulf %103, %47 : vector<2x64xf32>
    %107 = arith.mulf %104, %102 : vector<2x64xf32>
    %108 = arith.addf %106, %107 : vector<2x64xf32>
    %109 = math.tanh %108 : vector<2x64xf32>
    %110 = arith.mulf %105, %109 : vector<2x64xf32>
    %cst_23 = arith.constant dense<0.000000e+00> : vector<2x256xf32>
    %111 = tpu.matmul %110, %2, %cst_23 {dimension_numbers = #tpu.dot_dimension_numbers<[1], [0], [0], [1], [0, 0, 1, 1], [], []>} : vector<2x64xf32>, vector<64x256xf32>, vector<2x256xf32> -> vector<2x256xf32>
    %112 = arith.addf %111, %70 : vector<2x256xf32>
    %113 = vector.extract_strided_slice %112 {offsets = [0, 0], sizes = [2, 192], strides = [1, 1]} : vector<2x256xf32> to vector<2x192xf32>
    %114 = arith.negf %113 : vector<2x192xf32>
    %115 = math.exp %114 : vector<2x192xf32>
    %cst_24 = arith.constant 1.000000e+00 : f32
    %116 = vector.broadcast %cst_24 : f32 to vector<2x192xf32>
    %117 = arith.addf %116, %115 : vector<2x192xf32>
    %118 = arith.divf %116, %117 : vector<2x192xf32>
    %119 = vector.extract_strided_slice %112 {offsets = [0, 192], sizes = [2, 64], strides = [1, 1]} : vector<2x256xf32> to vector<2x64xf32>
    %120 = math.tanh %119 : vector<2x64xf32>
    %121 = vector.extract_strided_slice %118 {offsets = [0, 0], sizes = [2, 64], strides = [1, 1]} : vector<2x192xf32> to vector<2x64xf32>
    %122 = vector.extract_strided_slice %118 {offsets = [0, 64], sizes = [2, 64], strides = [1, 1]} : vector<2x192xf32> to vector<2x64xf32>
    %123 = vector.extract_strided_slice %118 {offsets = [0, 128], sizes = [2, 64], strides = [1, 1]} : vector<2x192xf32> to vector<2x64xf32>
    %124 = arith.mulf %121, %65 : vector<2x64xf32>
    %125 = arith.mulf %122, %120 : vector<2x64xf32>
    %126 = arith.addf %124, %125 : vector<2x64xf32>
    %127 = math.tanh %126 : vector<2x64xf32>
    %128 = arith.mulf %123, %127 : vector<2x64xf32>
    %c2_i32 = arith.constant 2 : i32
    %cst_25 = arith.constant dense<0.000000e+00> : vector<2x256xf32>
    %129 = tpu.matmul %128, %3, %cst_25 {dimension_numbers = #tpu.dot_dimension_numbers<[1], [0], [0], [1], [0, 0, 1, 1], [], []>} : vector<2x64xf32>, vector<64x256xf32>, vector<2x256xf32> -> vector<2x256xf32>
    %130 = vector.broadcast %5 : vector<1x256xf32> to vector<2x256xf32>
    %131 = arith.addf %129, %130 : vector<2x256xf32>
    %132 = arith.index_cast %c2_i32 : i32 to index
    %c0_26 = arith.constant 0 : index
    %c0_27 = arith.constant 0 : index
    %133 = vector.load %arg0[%132, %c0_26, %c0_27] : memref<8x2x3xf32, #tpu.memory_space<vmem>>, vector<1x2x3xf32>
    %134 = vector.shape_cast %133 : vector<1x2x3xf32> to vector<2x3xf32>
    %135 = vector.extract_strided_slice %134 {offsets = [0, 0], sizes = [2, 1], strides = [1, 1]} : vector<2x3xf32> to vector<2x1xf32>
    %136 = vector.extract_strided_slice %0 {offsets = [0, 0], sizes = [1, 256], strides = [1, 1]} : vector<3x256xf32> to vector<1x256xf32>
    %137 = vector.broadcast %135 : vector<2x1xf32> to vector<2x256xf32>
    %138 = vector.broadcast %136 : vector<1x256xf32> to vector<2x256xf32>
    %139 = arith.mulf %137, %138 : vector<2x256xf32>
    %140 = vector.broadcast %4 : vector<1x256xf32> to vector<2x256xf32>
    %141 = arith.addf %140, %139 : vector<2x256xf32>
    %142 = vector.extract_strided_slice %134 {offsets = [0, 1], sizes = [2, 1], strides = [1, 1]} : vector<2x3xf32> to vector<2x1xf32>
    %143 = vector.extract_strided_slice %0 {offsets = [1, 0], sizes = [1, 256], strides = [1, 1]} : vector<3x256xf32> to vector<1x256xf32>
    %144 = vector.broadcast %142 : vector<2x1xf32> to vector<2x256xf32>
    %145 = vector.broadcast %143 : vector<1x256xf32> to vector<2x256xf32>
    %146 = arith.mulf %144, %145 : vector<2x256xf32>
    %147 = arith.addf %141, %146 : vector<2x256xf32>
    %148 = vector.extract_strided_slice %134 {offsets = [0, 2], sizes = [2, 1], strides = [1, 1]} : vector<2x3xf32> to vector<2x1xf32>
    %149 = vector.extract_strided_slice %0 {offsets = [2, 0], sizes = [1, 256], strides = [1, 1]} : vector<3x256xf32> to vector<1x256xf32>
    %150 = vector.broadcast %148 : vector<2x1xf32> to vector<2x256xf32>
    %151 = vector.broadcast %149 : vector<1x256xf32> to vector<2x256xf32>
    %152 = arith.mulf %150, %151 : vector<2x256xf32>
    %153 = arith.addf %147, %152 : vector<2x256xf32>
    %cst_28 = arith.constant dense<0.000000e+00> : vector<2x256xf32>
    %154 = tpu.matmul %110, %1, %cst_28 {dimension_numbers = #tpu.dot_dimension_numbers<[1], [0], [0], [1], [0, 0, 1, 1], [], []>} : vector<2x64xf32>, vector<64x256xf32>, vector<2x256xf32> -> vector<2x256xf32>
    %155 = arith.addf %153, %154 : vector<2x256xf32>
    %156 = vector.extract_strided_slice %155 {offsets = [0, 0], sizes = [2, 192], strides = [1, 1]} : vector<2x256xf32> to vector<2x192xf32>
    %157 = arith.negf %156 : vector<2x192xf32>
    %158 = math.exp %157 : vector<2x192xf32>
    %cst_29 = arith.constant 1.000000e+00 : f32
    %159 = vector.broadcast %cst_29 : f32 to vector<2x192xf32>
    %160 = arith.addf %159, %158 : vector<2x192xf32>
    %161 = arith.divf %159, %160 : vector<2x192xf32>
    %162 = vector.extract_strided_slice %155 {offsets = [0, 192], sizes = [2, 64], strides = [1, 1]} : vector<2x256xf32> to vector<2x64xf32>
    %163 = math.tanh %162 : vector<2x64xf32>
    %164 = vector.extract_strided_slice %161 {offsets = [0, 0], sizes = [2, 64], strides = [1, 1]} : vector<2x192xf32> to vector<2x64xf32>
    %165 = vector.extract_strided_slice %161 {offsets = [0, 64], sizes = [2, 64], strides = [1, 1]} : vector<2x192xf32> to vector<2x64xf32>
    %166 = vector.extract_strided_slice %161 {offsets = [0, 128], sizes = [2, 64], strides = [1, 1]} : vector<2x192xf32> to vector<2x64xf32>
    %167 = arith.mulf %164, %108 : vector<2x64xf32>
    %168 = arith.mulf %165, %163 : vector<2x64xf32>
    %169 = arith.addf %167, %168 : vector<2x64xf32>
    %170 = math.tanh %169 : vector<2x64xf32>
    %171 = arith.mulf %166, %170 : vector<2x64xf32>
    %cst_30 = arith.constant dense<0.000000e+00> : vector<2x256xf32>
    %172 = tpu.matmul %171, %2, %cst_30 {dimension_numbers = #tpu.dot_dimension_numbers<[1], [0], [0], [1], [0, 0, 1, 1], [], []>} : vector<2x64xf32>, vector<64x256xf32>, vector<2x256xf32> -> vector<2x256xf32>
    %173 = arith.addf %172, %131 : vector<2x256xf32>
    %174 = vector.extract_strided_slice %173 {offsets = [0, 0], sizes = [2, 192], strides = [1, 1]} : vector<2x256xf32> to vector<2x192xf32>
    %175 = arith.negf %174 : vector<2x192xf32>
    %176 = math.exp %175 : vector<2x192xf32>
    %cst_31 = arith.constant 1.000000e+00 : f32
    %177 = vector.broadcast %cst_31 : f32 to vector<2x192xf32>
    %178 = arith.addf %177, %176 : vector<2x192xf32>
    %179 = arith.divf %177, %178 : vector<2x192xf32>
    %180 = vector.extract_strided_slice %173 {offsets = [0, 192], sizes = [2, 64], strides = [1, 1]} : vector<2x256xf32> to vector<2x64xf32>
    %181 = math.tanh %180 : vector<2x64xf32>
    %182 = vector.extract_strided_slice %179 {offsets = [0, 0], sizes = [2, 64], strides = [1, 1]} : vector<2x192xf32> to vector<2x64xf32>
    %183 = vector.extract_strided_slice %179 {offsets = [0, 64], sizes = [2, 64], strides = [1, 1]} : vector<2x192xf32> to vector<2x64xf32>
    %184 = vector.extract_strided_slice %179 {offsets = [0, 128], sizes = [2, 64], strides = [1, 1]} : vector<2x192xf32> to vector<2x64xf32>
    %185 = arith.mulf %182, %126 : vector<2x64xf32>
    %186 = arith.mulf %183, %181 : vector<2x64xf32>
    %187 = arith.addf %185, %186 : vector<2x64xf32>
    %188 = math.tanh %187 : vector<2x64xf32>
    %189 = arith.mulf %184, %188 : vector<2x64xf32>
    %c3_i32 = arith.constant 3 : i32
    %cst_32 = arith.constant dense<0.000000e+00> : vector<2x256xf32>
    %190 = tpu.matmul %189, %3, %cst_32 {dimension_numbers = #tpu.dot_dimension_numbers<[1], [0], [0], [1], [0, 0, 1, 1], [], []>} : vector<2x64xf32>, vector<64x256xf32>, vector<2x256xf32> -> vector<2x256xf32>
    %191 = vector.broadcast %5 : vector<1x256xf32> to vector<2x256xf32>
    %192 = arith.addf %190, %191 : vector<2x256xf32>
    %193 = arith.index_cast %c3_i32 : i32 to index
    %c0_33 = arith.constant 0 : index
    %c0_34 = arith.constant 0 : index
    %194 = vector.load %arg0[%193, %c0_33, %c0_34] : memref<8x2x3xf32, #tpu.memory_space<vmem>>, vector<1x2x3xf32>
    %195 = vector.shape_cast %194 : vector<1x2x3xf32> to vector<2x3xf32>
    %196 = vector.extract_strided_slice %195 {offsets = [0, 0], sizes = [2, 1], strides = [1, 1]} : vector<2x3xf32> to vector<2x1xf32>
    %197 = vector.extract_strided_slice %0 {offsets = [0, 0], sizes = [1, 256], strides = [1, 1]} : vector<3x256xf32> to vector<1x256xf32>
    %198 = vector.broadcast %196 : vector<2x1xf32> to vector<2x256xf32>
    %199 = vector.broadcast %197 : vector<1x256xf32> to vector<2x256xf32>
    %200 = arith.mulf %198, %199 : vector<2x256xf32>
    %201 = vector.broadcast %4 : vector<1x256xf32> to vector<2x256xf32>
    %202 = arith.addf %201, %200 : vector<2x256xf32>
    %203 = vector.extract_strided_slice %195 {offsets = [0, 1], sizes = [2, 1], strides = [1, 1]} : vector<2x3xf32> to vector<2x1xf32>
    %204 = vector.extract_strided_slice %0 {offsets = [1, 0], sizes = [1, 256], strides = [1, 1]} : vector<3x256xf32> to vector<1x256xf32>
    %205 = vector.broadcast %203 : vector<2x1xf32> to vector<2x256xf32>
    %206 = vector.broadcast %204 : vector<1x256xf32> to vector<2x256xf32>
    %207 = arith.mulf %205, %206 : vector<2x256xf32>
    %208 = arith.addf %202, %207 : vector<2x256xf32>
    %209 = vector.extract_strided_slice %195 {offsets = [0, 2], sizes = [2, 1], strides = [1, 1]} : vector<2x3xf32> to vector<2x1xf32>
    %210 = vector.extract_strided_slice %0 {offsets = [2, 0], sizes = [1, 256], strides = [1, 1]} : vector<3x256xf32> to vector<1x256xf32>
    %211 = vector.broadcast %209 : vector<2x1xf32> to vector<2x256xf32>
    %212 = vector.broadcast %210 : vector<1x256xf32> to vector<2x256xf32>
    %213 = arith.mulf %211, %212 : vector<2x256xf32>
    %214 = arith.addf %208, %213 : vector<2x256xf32>
    %cst_35 = arith.constant dense<0.000000e+00> : vector<2x256xf32>
    %215 = tpu.matmul %171, %1, %cst_35 {dimension_numbers = #tpu.dot_dimension_numbers<[1], [0], [0], [1], [0, 0, 1, 1], [], []>} : vector<2x64xf32>, vector<64x256xf32>, vector<2x256xf32> -> vector<2x256xf32>
    %216 = arith.addf %214, %215 : vector<2x256xf32>
    %217 = vector.extract_strided_slice %216 {offsets = [0, 0], sizes = [2, 192], strides = [1, 1]} : vector<2x256xf32> to vector<2x192xf32>
    %218 = arith.negf %217 : vector<2x192xf32>
    %219 = math.exp %218 : vector<2x192xf32>
    %cst_36 = arith.constant 1.000000e+00 : f32
    %220 = vector.broadcast %cst_36 : f32 to vector<2x192xf32>
    %221 = arith.addf %220, %219 : vector<2x192xf32>
    %222 = arith.divf %220, %221 : vector<2x192xf32>
    %223 = vector.extract_strided_slice %216 {offsets = [0, 192], sizes = [2, 64], strides = [1, 1]} : vector<2x256xf32> to vector<2x64xf32>
    %224 = math.tanh %223 : vector<2x64xf32>
    %225 = vector.extract_strided_slice %222 {offsets = [0, 0], sizes = [2, 64], strides = [1, 1]} : vector<2x192xf32> to vector<2x64xf32>
    %226 = vector.extract_strided_slice %222 {offsets = [0, 64], sizes = [2, 64], strides = [1, 1]} : vector<2x192xf32> to vector<2x64xf32>
    %227 = vector.extract_strided_slice %222 {offsets = [0, 128], sizes = [2, 64], strides = [1, 1]} : vector<2x192xf32> to vector<2x64xf32>
    %228 = arith.mulf %225, %169 : vector<2x64xf32>
    %229 = arith.mulf %226, %224 : vector<2x64xf32>
    %230 = arith.addf %228, %229 : vector<2x64xf32>
    %231 = math.tanh %230 : vector<2x64xf32>
    %232 = arith.mulf %227, %231 : vector<2x64xf32>
    %cst_37 = arith.constant dense<0.000000e+00> : vector<2x256xf32>
    %233 = tpu.matmul %232, %2, %cst_37 {dimension_numbers = #tpu.dot_dimension_numbers<[1], [0], [0], [1], [0, 0, 1, 1], [], []>} : vector<2x64xf32>, vector<64x256xf32>, vector<2x256xf32> -> vector<2x256xf32>
    %234 = arith.addf %233, %192 : vector<2x256xf32>
    %235 = vector.extract_strided_slice %234 {offsets = [0, 0], sizes = [2, 192], strides = [1, 1]} : vector<2x256xf32> to vector<2x192xf32>
    %236 = arith.negf %235 : vector<2x192xf32>
    %237 = math.exp %236 : vector<2x192xf32>
    %cst_38 = arith.constant 1.000000e+00 : f32
    %238 = vector.broadcast %cst_38 : f32 to vector<2x192xf32>
    %239 = arith.addf %238, %237 : vector<2x192xf32>
    %240 = arith.divf %238, %239 : vector<2x192xf32>
    %241 = vector.extract_strided_slice %234 {offsets = [0, 192], sizes = [2, 64], strides = [1, 1]} : vector<2x256xf32> to vector<2x64xf32>
    %242 = math.tanh %241 : vector<2x64xf32>
    %243 = vector.extract_strided_slice %240 {offsets = [0, 0], sizes = [2, 64], strides = [1, 1]} : vector<2x192xf32> to vector<2x64xf32>
    %244 = vector.extract_strided_slice %240 {offsets = [0, 64], sizes = [2, 64], strides = [1, 1]} : vector<2x192xf32> to vector<2x64xf32>
    %245 = vector.extract_strided_slice %240 {offsets = [0, 128], sizes = [2, 64], strides = [1, 1]} : vector<2x192xf32> to vector<2x64xf32>
    %246 = arith.mulf %243, %187 : vector<2x64xf32>
    %247 = arith.mulf %244, %242 : vector<2x64xf32>
    %248 = arith.addf %246, %247 : vector<2x64xf32>
    %249 = math.tanh %248 : vector<2x64xf32>
    %250 = arith.mulf %245, %249 : vector<2x64xf32>
    %c4_i32 = arith.constant 4 : i32
    %cst_39 = arith.constant dense<0.000000e+00> : vector<2x256xf32>
    %251 = tpu.matmul %250, %3, %cst_39 {dimension_numbers = #tpu.dot_dimension_numbers<[1], [0], [0], [1], [0, 0, 1, 1], [], []>} : vector<2x64xf32>, vector<64x256xf32>, vector<2x256xf32> -> vector<2x256xf32>
    %252 = vector.broadcast %5 : vector<1x256xf32> to vector<2x256xf32>
    %253 = arith.addf %251, %252 : vector<2x256xf32>
    %254 = arith.index_cast %c4_i32 : i32 to index
    %c0_40 = arith.constant 0 : index
    %c0_41 = arith.constant 0 : index
    %255 = vector.load %arg0[%254, %c0_40, %c0_41] : memref<8x2x3xf32, #tpu.memory_space<vmem>>, vector<1x2x3xf32>
    %256 = vector.shape_cast %255 : vector<1x2x3xf32> to vector<2x3xf32>
    %257 = vector.extract_strided_slice %256 {offsets = [0, 0], sizes = [2, 1], strides = [1, 1]} : vector<2x3xf32> to vector<2x1xf32>
    %258 = vector.extract_strided_slice %0 {offsets = [0, 0], sizes = [1, 256], strides = [1, 1]} : vector<3x256xf32> to vector<1x256xf32>
    %259 = vector.broadcast %257 : vector<2x1xf32> to vector<2x256xf32>
    %260 = vector.broadcast %258 : vector<1x256xf32> to vector<2x256xf32>
    %261 = arith.mulf %259, %260 : vector<2x256xf32>
    %262 = vector.broadcast %4 : vector<1x256xf32> to vector<2x256xf32>
    %263 = arith.addf %262, %261 : vector<2x256xf32>
    %264 = vector.extract_strided_slice %256 {offsets = [0, 1], sizes = [2, 1], strides = [1, 1]} : vector<2x3xf32> to vector<2x1xf32>
    %265 = vector.extract_strided_slice %0 {offsets = [1, 0], sizes = [1, 256], strides = [1, 1]} : vector<3x256xf32> to vector<1x256xf32>
    %266 = vector.broadcast %264 : vector<2x1xf32> to vector<2x256xf32>
    %267 = vector.broadcast %265 : vector<1x256xf32> to vector<2x256xf32>
    %268 = arith.mulf %266, %267 : vector<2x256xf32>
    %269 = arith.addf %263, %268 : vector<2x256xf32>
    %270 = vector.extract_strided_slice %256 {offsets = [0, 2], sizes = [2, 1], strides = [1, 1]} : vector<2x3xf32> to vector<2x1xf32>
    %271 = vector.extract_strided_slice %0 {offsets = [2, 0], sizes = [1, 256], strides = [1, 1]} : vector<3x256xf32> to vector<1x256xf32>
    %272 = vector.broadcast %270 : vector<2x1xf32> to vector<2x256xf32>
    %273 = vector.broadcast %271 : vector<1x256xf32> to vector<2x256xf32>
    %274 = arith.mulf %272, %273 : vector<2x256xf32>
    %275 = arith.addf %269, %274 : vector<2x256xf32>
    %cst_42 = arith.constant dense<0.000000e+00> : vector<2x256xf32>
    %276 = tpu.matmul %232, %1, %cst_42 {dimension_numbers = #tpu.dot_dimension_numbers<[1], [0], [0], [1], [0, 0, 1, 1], [], []>} : vector<2x64xf32>, vector<64x256xf32>, vector<2x256xf32> -> vector<2x256xf32>
    %277 = arith.addf %275, %276 : vector<2x256xf32>
    %278 = vector.extract_strided_slice %277 {offsets = [0, 0], sizes = [2, 192], strides = [1, 1]} : vector<2x256xf32> to vector<2x192xf32>
    %279 = arith.negf %278 : vector<2x192xf32>
    %280 = math.exp %279 : vector<2x192xf32>
    %cst_43 = arith.constant 1.000000e+00 : f32
    %281 = vector.broadcast %cst_43 : f32 to vector<2x192xf32>
    %282 = arith.addf %281, %280 : vector<2x192xf32>
    %283 = arith.divf %281, %282 : vector<2x192xf32>
    %284 = vector.extract_strided_slice %277 {offsets = [0, 192], sizes = [2, 64], strides = [1, 1]} : vector<2x256xf32> to vector<2x64xf32>
    %285 = math.tanh %284 : vector<2x64xf32>
    %286 = vector.extract_strided_slice %283 {offsets = [0, 0], sizes = [2, 64], strides = [1, 1]} : vector<2x192xf32> to vector<2x64xf32>
    %287 = vector.extract_strided_slice %283 {offsets = [0, 64], sizes = [2, 64], strides = [1, 1]} : vector<2x192xf32> to vector<2x64xf32>
    %288 = vector.extract_strided_slice %283 {offsets = [0, 128], sizes = [2, 64], strides = [1, 1]} : vector<2x192xf32> to vector<2x64xf32>
    %289 = arith.mulf %286, %230 : vector<2x64xf32>
    %290 = arith.mulf %287, %285 : vector<2x64xf32>
    %291 = arith.addf %289, %290 : vector<2x64xf32>
    %292 = math.tanh %291 : vector<2x64xf32>
    %293 = arith.mulf %288, %292 : vector<2x64xf32>
    %cst_44 = arith.constant dense<0.000000e+00> : vector<2x256xf32>
    %294 = tpu.matmul %293, %2, %cst_44 {dimension_numbers = #tpu.dot_dimension_numbers<[1], [0], [0], [1], [0, 0, 1, 1], [], []>} : vector<2x64xf32>, vector<64x256xf32>, vector<2x256xf32> -> vector<2x256xf32>
    %295 = arith.addf %294, %253 : vector<2x256xf32>
    %296 = vector.extract_strided_slice %295 {offsets = [0, 0], sizes = [2, 192], strides = [1, 1]} : vector<2x256xf32> to vector<2x192xf32>
    %297 = arith.negf %296 : vector<2x192xf32>
    %298 = math.exp %297 : vector<2x192xf32>
    %cst_45 = arith.constant 1.000000e+00 : f32
    %299 = vector.broadcast %cst_45 : f32 to vector<2x192xf32>
    %300 = arith.addf %299, %298 : vector<2x192xf32>
    %301 = arith.divf %299, %300 : vector<2x192xf32>
    %302 = vector.extract_strided_slice %295 {offsets = [0, 192], sizes = [2, 64], strides = [1, 1]} : vector<2x256xf32> to vector<2x64xf32>
    %303 = math.tanh %302 : vector<2x64xf32>
    %304 = vector.extract_strided_slice %301 {offsets = [0, 0], sizes = [2, 64], strides = [1, 1]} : vector<2x192xf32> to vector<2x64xf32>
    %305 = vector.extract_strided_slice %301 {offsets = [0, 64], sizes = [2, 64], strides = [1, 1]} : vector<2x192xf32> to vector<2x64xf32>
    %306 = vector.extract_strided_slice %301 {offsets = [0, 128], sizes = [2, 64], strides = [1, 1]} : vector<2x192xf32> to vector<2x64xf32>
    %307 = arith.mulf %304, %248 : vector<2x64xf32>
    %308 = arith.mulf %305, %303 : vector<2x64xf32>
    %309 = arith.addf %307, %308 : vector<2x64xf32>
    %310 = math.tanh %309 : vector<2x64xf32>
    %311 = arith.mulf %306, %310 : vector<2x64xf32>
    %c5_i32 = arith.constant 5 : i32
    %cst_46 = arith.constant dense<0.000000e+00> : vector<2x256xf32>
    %312 = tpu.matmul %311, %3, %cst_46 {dimension_numbers = #tpu.dot_dimension_numbers<[1], [0], [0], [1], [0, 0, 1, 1], [], []>} : vector<2x64xf32>, vector<64x256xf32>, vector<2x256xf32> -> vector<2x256xf32>
    %313 = vector.broadcast %5 : vector<1x256xf32> to vector<2x256xf32>
    %314 = arith.addf %312, %313 : vector<2x256xf32>
    %315 = arith.index_cast %c5_i32 : i32 to index
    %c0_47 = arith.constant 0 : index
    %c0_48 = arith.constant 0 : index
    %316 = vector.load %arg0[%315, %c0_47, %c0_48] : memref<8x2x3xf32, #tpu.memory_space<vmem>>, vector<1x2x3xf32>
    %317 = vector.shape_cast %316 : vector<1x2x3xf32> to vector<2x3xf32>
    %318 = vector.extract_strided_slice %317 {offsets = [0, 0], sizes = [2, 1], strides = [1, 1]} : vector<2x3xf32> to vector<2x1xf32>
    %319 = vector.extract_strided_slice %0 {offsets = [0, 0], sizes = [1, 256], strides = [1, 1]} : vector<3x256xf32> to vector<1x256xf32>
    %320 = vector.broadcast %318 : vector<2x1xf32> to vector<2x256xf32>
    %321 = vector.broadcast %319 : vector<1x256xf32> to vector<2x256xf32>
    %322 = arith.mulf %320, %321 : vector<2x256xf32>
    %323 = vector.broadcast %4 : vector<1x256xf32> to vector<2x256xf32>
    %324 = arith.addf %323, %322 : vector<2x256xf32>
    %325 = vector.extract_strided_slice %317 {offsets = [0, 1], sizes = [2, 1], strides = [1, 1]} : vector<2x3xf32> to vector<2x1xf32>
    %326 = vector.extract_strided_slice %0 {offsets = [1, 0], sizes = [1, 256], strides = [1, 1]} : vector<3x256xf32> to vector<1x256xf32>
    %327 = vector.broadcast %325 : vector<2x1xf32> to vector<2x256xf32>
    %328 = vector.broadcast %326 : vector<1x256xf32> to vector<2x256xf32>
    %329 = arith.mulf %327, %328 : vector<2x256xf32>
    %330 = arith.addf %324, %329 : vector<2x256xf32>
    %331 = vector.extract_strided_slice %317 {offsets = [0, 2], sizes = [2, 1], strides = [1, 1]} : vector<2x3xf32> to vector<2x1xf32>
    %332 = vector.extract_strided_slice %0 {offsets = [2, 0], sizes = [1, 256], strides = [1, 1]} : vector<3x256xf32> to vector<1x256xf32>
    %333 = vector.broadcast %331 : vector<2x1xf32> to vector<2x256xf32>
    %334 = vector.broadcast %332 : vector<1x256xf32> to vector<2x256xf32>
    %335 = arith.mulf %333, %334 : vector<2x256xf32>
    %336 = arith.addf %330, %335 : vector<2x256xf32>
    %cst_49 = arith.constant dense<0.000000e+00> : vector<2x256xf32>
    %337 = tpu.matmul %293, %1, %cst_49 {dimension_numbers = #tpu.dot_dimension_numbers<[1], [0], [0], [1], [0, 0, 1, 1], [], []>} : vector<2x64xf32>, vector<64x256xf32>, vector<2x256xf32> -> vector<2x256xf32>
    %338 = arith.addf %336, %337 : vector<2x256xf32>
    %339 = vector.extract_strided_slice %338 {offsets = [0, 0], sizes = [2, 192], strides = [1, 1]} : vector<2x256xf32> to vector<2x192xf32>
    %340 = arith.negf %339 : vector<2x192xf32>
    %341 = math.exp %340 : vector<2x192xf32>
    %cst_50 = arith.constant 1.000000e+00 : f32
    %342 = vector.broadcast %cst_50 : f32 to vector<2x192xf32>
    %343 = arith.addf %342, %341 : vector<2x192xf32>
    %344 = arith.divf %342, %343 : vector<2x192xf32>
    %345 = vector.extract_strided_slice %338 {offsets = [0, 192], sizes = [2, 64], strides = [1, 1]} : vector<2x256xf32> to vector<2x64xf32>
    %346 = math.tanh %345 : vector<2x64xf32>
    %347 = vector.extract_strided_slice %344 {offsets = [0, 0], sizes = [2, 64], strides = [1, 1]} : vector<2x192xf32> to vector<2x64xf32>
    %348 = vector.extract_strided_slice %344 {offsets = [0, 64], sizes = [2, 64], strides = [1, 1]} : vector<2x192xf32> to vector<2x64xf32>
    %349 = vector.extract_strided_slice %344 {offsets = [0, 128], sizes = [2, 64], strides = [1, 1]} : vector<2x192xf32> to vector<2x64xf32>
    %350 = arith.mulf %347, %291 : vector<2x64xf32>
    %351 = arith.mulf %348, %346 : vector<2x64xf32>
    %352 = arith.addf %350, %351 : vector<2x64xf32>
    %353 = math.tanh %352 : vector<2x64xf32>
    %354 = arith.mulf %349, %353 : vector<2x64xf32>
    %cst_51 = arith.constant dense<0.000000e+00> : vector<2x256xf32>
    %355 = tpu.matmul %354, %2, %cst_51 {dimension_numbers = #tpu.dot_dimension_numbers<[1], [0], [0], [1], [0, 0, 1, 1], [], []>} : vector<2x64xf32>, vector<64x256xf32>, vector<2x256xf32> -> vector<2x256xf32>
    %356 = arith.addf %355, %314 : vector<2x256xf32>
    %357 = vector.extract_strided_slice %356 {offsets = [0, 0], sizes = [2, 192], strides = [1, 1]} : vector<2x256xf32> to vector<2x192xf32>
    %358 = arith.negf %357 : vector<2x192xf32>
    %359 = math.exp %358 : vector<2x192xf32>
    %cst_52 = arith.constant 1.000000e+00 : f32
    %360 = vector.broadcast %cst_52 : f32 to vector<2x192xf32>
    %361 = arith.addf %360, %359 : vector<2x192xf32>
    %362 = arith.divf %360, %361 : vector<2x192xf32>
    %363 = vector.extract_strided_slice %356 {offsets = [0, 192], sizes = [2, 64], strides = [1, 1]} : vector<2x256xf32> to vector<2x64xf32>
    %364 = math.tanh %363 : vector<2x64xf32>
    %365 = vector.extract_strided_slice %362 {offsets = [0, 0], sizes = [2, 64], strides = [1, 1]} : vector<2x192xf32> to vector<2x64xf32>
    %366 = vector.extract_strided_slice %362 {offsets = [0, 64], sizes = [2, 64], strides = [1, 1]} : vector<2x192xf32> to vector<2x64xf32>
    %367 = vector.extract_strided_slice %362 {offsets = [0, 128], sizes = [2, 64], strides = [1, 1]} : vector<2x192xf32> to vector<2x64xf32>
    %368 = arith.mulf %365, %309 : vector<2x64xf32>
    %369 = arith.mulf %366, %364 : vector<2x64xf32>
    %370 = arith.addf %368, %369 : vector<2x64xf32>
    %371 = math.tanh %370 : vector<2x64xf32>
    %372 = arith.mulf %367, %371 : vector<2x64xf32>
    %c6_i32 = arith.constant 6 : i32
    %cst_53 = arith.constant dense<0.000000e+00> : vector<2x256xf32>
    %373 = tpu.matmul %372, %3, %cst_53 {dimension_numbers = #tpu.dot_dimension_numbers<[1], [0], [0], [1], [0, 0, 1, 1], [], []>} : vector<2x64xf32>, vector<64x256xf32>, vector<2x256xf32> -> vector<2x256xf32>
    %374 = vector.broadcast %5 : vector<1x256xf32> to vector<2x256xf32>
    %375 = arith.addf %373, %374 : vector<2x256xf32>
    %376 = arith.index_cast %c6_i32 : i32 to index
    %c0_54 = arith.constant 0 : index
    %c0_55 = arith.constant 0 : index
    %377 = vector.load %arg0[%376, %c0_54, %c0_55] : memref<8x2x3xf32, #tpu.memory_space<vmem>>, vector<1x2x3xf32>
    %378 = vector.shape_cast %377 : vector<1x2x3xf32> to vector<2x3xf32>
    %379 = vector.extract_strided_slice %378 {offsets = [0, 0], sizes = [2, 1], strides = [1, 1]} : vector<2x3xf32> to vector<2x1xf32>
    %380 = vector.extract_strided_slice %0 {offsets = [0, 0], sizes = [1, 256], strides = [1, 1]} : vector<3x256xf32> to vector<1x256xf32>
    %381 = vector.broadcast %379 : vector<2x1xf32> to vector<2x256xf32>
    %382 = vector.broadcast %380 : vector<1x256xf32> to vector<2x256xf32>
    %383 = arith.mulf %381, %382 : vector<2x256xf32>
    %384 = vector.broadcast %4 : vector<1x256xf32> to vector<2x256xf32>
    %385 = arith.addf %384, %383 : vector<2x256xf32>
    %386 = vector.extract_strided_slice %378 {offsets = [0, 1], sizes = [2, 1], strides = [1, 1]} : vector<2x3xf32> to vector<2x1xf32>
    %387 = vector.extract_strided_slice %0 {offsets = [1, 0], sizes = [1, 256], strides = [1, 1]} : vector<3x256xf32> to vector<1x256xf32>
    %388 = vector.broadcast %386 : vector<2x1xf32> to vector<2x256xf32>
    %389 = vector.broadcast %387 : vector<1x256xf32> to vector<2x256xf32>
    %390 = arith.mulf %388, %389 : vector<2x256xf32>
    %391 = arith.addf %385, %390 : vector<2x256xf32>
    %392 = vector.extract_strided_slice %378 {offsets = [0, 2], sizes = [2, 1], strides = [1, 1]} : vector<2x3xf32> to vector<2x1xf32>
    %393 = vector.extract_strided_slice %0 {offsets = [2, 0], sizes = [1, 256], strides = [1, 1]} : vector<3x256xf32> to vector<1x256xf32>
    %394 = vector.broadcast %392 : vector<2x1xf32> to vector<2x256xf32>
    %395 = vector.broadcast %393 : vector<1x256xf32> to vector<2x256xf32>
    %396 = arith.mulf %394, %395 : vector<2x256xf32>
    %397 = arith.addf %391, %396 : vector<2x256xf32>
    %cst_56 = arith.constant dense<0.000000e+00> : vector<2x256xf32>
    %398 = tpu.matmul %354, %1, %cst_56 {dimension_numbers = #tpu.dot_dimension_numbers<[1], [0], [0], [1], [0, 0, 1, 1], [], []>} : vector<2x64xf32>, vector<64x256xf32>, vector<2x256xf32> -> vector<2x256xf32>
    %399 = arith.addf %397, %398 : vector<2x256xf32>
    %400 = vector.extract_strided_slice %399 {offsets = [0, 0], sizes = [2, 192], strides = [1, 1]} : vector<2x256xf32> to vector<2x192xf32>
    %401 = arith.negf %400 : vector<2x192xf32>
    %402 = math.exp %401 : vector<2x192xf32>
    %cst_57 = arith.constant 1.000000e+00 : f32
    %403 = vector.broadcast %cst_57 : f32 to vector<2x192xf32>
    %404 = arith.addf %403, %402 : vector<2x192xf32>
    %405 = arith.divf %403, %404 : vector<2x192xf32>
    %406 = vector.extract_strided_slice %399 {offsets = [0, 192], sizes = [2, 64], strides = [1, 1]} : vector<2x256xf32> to vector<2x64xf32>
    %407 = math.tanh %406 : vector<2x64xf32>
    %408 = vector.extract_strided_slice %405 {offsets = [0, 0], sizes = [2, 64], strides = [1, 1]} : vector<2x192xf32> to vector<2x64xf32>
    %409 = vector.extract_strided_slice %405 {offsets = [0, 64], sizes = [2, 64], strides = [1, 1]} : vector<2x192xf32> to vector<2x64xf32>
    %410 = vector.extract_strided_slice %405 {offsets = [0, 128], sizes = [2, 64], strides = [1, 1]} : vector<2x192xf32> to vector<2x64xf32>
    %411 = arith.mulf %408, %352 : vector<2x64xf32>
    %412 = arith.mulf %409, %407 : vector<2x64xf32>
    %413 = arith.addf %411, %412 : vector<2x64xf32>
    %414 = math.tanh %413 : vector<2x64xf32>
    %415 = arith.mulf %410, %414 : vector<2x64xf32>
    %cst_58 = arith.constant dense<0.000000e+00> : vector<2x256xf32>
    %416 = tpu.matmul %415, %2, %cst_58 {dimension_numbers = #tpu.dot_dimension_numbers<[1], [0], [0], [1], [0, 0, 1, 1], [], []>} : vector<2x64xf32>, vector<64x256xf32>, vector<2x256xf32> -> vector<2x256xf32>
    %417 = arith.addf %416, %375 : vector<2x256xf32>
    %418 = vector.extract_strided_slice %417 {offsets = [0, 0], sizes = [2, 192], strides = [1, 1]} : vector<2x256xf32> to vector<2x192xf32>
    %419 = arith.negf %418 : vector<2x192xf32>
    %420 = math.exp %419 : vector<2x192xf32>
    %cst_59 = arith.constant 1.000000e+00 : f32
    %421 = vector.broadcast %cst_59 : f32 to vector<2x192xf32>
    %422 = arith.addf %421, %420 : vector<2x192xf32>
    %423 = arith.divf %421, %422 : vector<2x192xf32>
    %424 = vector.extract_strided_slice %417 {offsets = [0, 192], sizes = [2, 64], strides = [1, 1]} : vector<2x256xf32> to vector<2x64xf32>
    %425 = math.tanh %424 : vector<2x64xf32>
    %426 = vector.extract_strided_slice %423 {offsets = [0, 0], sizes = [2, 64], strides = [1, 1]} : vector<2x192xf32> to vector<2x64xf32>
    %427 = vector.extract_strided_slice %423 {offsets = [0, 64], sizes = [2, 64], strides = [1, 1]} : vector<2x192xf32> to vector<2x64xf32>
    %428 = vector.extract_strided_slice %423 {offsets = [0, 128], sizes = [2, 64], strides = [1, 1]} : vector<2x192xf32> to vector<2x64xf32>
    %429 = arith.mulf %426, %370 : vector<2x64xf32>
    %430 = arith.mulf %427, %425 : vector<2x64xf32>
    %431 = arith.addf %429, %430 : vector<2x64xf32>
    %432 = math.tanh %431 : vector<2x64xf32>
    %433 = arith.mulf %428, %432 : vector<2x64xf32>
    %c7_i32 = arith.constant 7 : i32
    %cst_60 = arith.constant dense<0.000000e+00> : vector<2x256xf32>
    %434 = tpu.matmul %433, %3, %cst_60 {dimension_numbers = #tpu.dot_dimension_numbers<[1], [0], [0], [1], [0, 0, 1, 1], [], []>} : vector<2x64xf32>, vector<64x256xf32>, vector<2x256xf32> -> vector<2x256xf32>
    %435 = vector.broadcast %5 : vector<1x256xf32> to vector<2x256xf32>
    %436 = arith.addf %434, %435 : vector<2x256xf32>
    %437 = arith.index_cast %c7_i32 : i32 to index
    %c0_61 = arith.constant 0 : index
    %c0_62 = arith.constant 0 : index
    %438 = vector.load %arg0[%437, %c0_61, %c0_62] : memref<8x2x3xf32, #tpu.memory_space<vmem>>, vector<1x2x3xf32>
    %439 = vector.shape_cast %438 : vector<1x2x3xf32> to vector<2x3xf32>
    %440 = vector.extract_strided_slice %439 {offsets = [0, 0], sizes = [2, 1], strides = [1, 1]} : vector<2x3xf32> to vector<2x1xf32>
    %441 = vector.extract_strided_slice %0 {offsets = [0, 0], sizes = [1, 256], strides = [1, 1]} : vector<3x256xf32> to vector<1x256xf32>
    %442 = vector.broadcast %440 : vector<2x1xf32> to vector<2x256xf32>
    %443 = vector.broadcast %441 : vector<1x256xf32> to vector<2x256xf32>
    %444 = arith.mulf %442, %443 : vector<2x256xf32>
    %445 = vector.broadcast %4 : vector<1x256xf32> to vector<2x256xf32>
    %446 = arith.addf %445, %444 : vector<2x256xf32>
    %447 = vector.extract_strided_slice %439 {offsets = [0, 1], sizes = [2, 1], strides = [1, 1]} : vector<2x3xf32> to vector<2x1xf32>
    %448 = vector.extract_strided_slice %0 {offsets = [1, 0], sizes = [1, 256], strides = [1, 1]} : vector<3x256xf32> to vector<1x256xf32>
    %449 = vector.broadcast %447 : vector<2x1xf32> to vector<2x256xf32>
    %450 = vector.broadcast %448 : vector<1x256xf32> to vector<2x256xf32>
    %451 = arith.mulf %449, %450 : vector<2x256xf32>
    %452 = arith.addf %446, %451 : vector<2x256xf32>
    %453 = vector.extract_strided_slice %439 {offsets = [0, 2], sizes = [2, 1], strides = [1, 1]} : vector<2x3xf32> to vector<2x1xf32>
    %454 = vector.extract_strided_slice %0 {offsets = [2, 0], sizes = [1, 256], strides = [1, 1]} : vector<3x256xf32> to vector<1x256xf32>
    %455 = vector.broadcast %453 : vector<2x1xf32> to vector<2x256xf32>
    %456 = vector.broadcast %454 : vector<1x256xf32> to vector<2x256xf32>
    %457 = arith.mulf %455, %456 : vector<2x256xf32>
    %458 = arith.addf %452, %457 : vector<2x256xf32>
    %cst_63 = arith.constant dense<0.000000e+00> : vector<2x256xf32>
    %459 = tpu.matmul %415, %1, %cst_63 {dimension_numbers = #tpu.dot_dimension_numbers<[1], [0], [0], [1], [0, 0, 1, 1], [], []>} : vector<2x64xf32>, vector<64x256xf32>, vector<2x256xf32> -> vector<2x256xf32>
    %460 = arith.addf %458, %459 : vector<2x256xf32>
    %461 = vector.extract_strided_slice %460 {offsets = [0, 0], sizes = [2, 192], strides = [1, 1]} : vector<2x256xf32> to vector<2x192xf32>
    %462 = arith.negf %461 : vector<2x192xf32>
    %463 = math.exp %462 : vector<2x192xf32>
    %cst_64 = arith.constant 1.000000e+00 : f32
    %464 = vector.broadcast %cst_64 : f32 to vector<2x192xf32>
    %465 = arith.addf %464, %463 : vector<2x192xf32>
    %466 = arith.divf %464, %465 : vector<2x192xf32>
    %467 = vector.extract_strided_slice %460 {offsets = [0, 192], sizes = [2, 64], strides = [1, 1]} : vector<2x256xf32> to vector<2x64xf32>
    %468 = math.tanh %467 : vector<2x64xf32>
    %469 = vector.extract_strided_slice %466 {offsets = [0, 0], sizes = [2, 64], strides = [1, 1]} : vector<2x192xf32> to vector<2x64xf32>
    %470 = vector.extract_strided_slice %466 {offsets = [0, 64], sizes = [2, 64], strides = [1, 1]} : vector<2x192xf32> to vector<2x64xf32>
    %471 = vector.extract_strided_slice %466 {offsets = [0, 128], sizes = [2, 64], strides = [1, 1]} : vector<2x192xf32> to vector<2x64xf32>
    %472 = arith.mulf %469, %413 : vector<2x64xf32>
    %473 = arith.mulf %470, %468 : vector<2x64xf32>
    %474 = arith.addf %472, %473 : vector<2x64xf32>
    %475 = math.tanh %474 : vector<2x64xf32>
    %476 = arith.mulf %471, %475 : vector<2x64xf32>
    %cst_65 = arith.constant dense<0.000000e+00> : vector<2x256xf32>
    %477 = tpu.matmul %476, %2, %cst_65 {dimension_numbers = #tpu.dot_dimension_numbers<[1], [0], [0], [1], [0, 0, 1, 1], [], []>} : vector<2x64xf32>, vector<64x256xf32>, vector<2x256xf32> -> vector<2x256xf32>
    %478 = arith.addf %477, %436 : vector<2x256xf32>
    %479 = vector.extract_strided_slice %478 {offsets = [0, 0], sizes = [2, 192], strides = [1, 1]} : vector<2x256xf32> to vector<2x192xf32>
    %480 = arith.negf %479 : vector<2x192xf32>
    %481 = math.exp %480 : vector<2x192xf32>
    %cst_66 = arith.constant 1.000000e+00 : f32
    %482 = vector.broadcast %cst_66 : f32 to vector<2x192xf32>
    %483 = arith.addf %482, %481 : vector<2x192xf32>
    %484 = arith.divf %482, %483 : vector<2x192xf32>
    %485 = vector.extract_strided_slice %478 {offsets = [0, 192], sizes = [2, 64], strides = [1, 1]} : vector<2x256xf32> to vector<2x64xf32>
    %486 = math.tanh %485 : vector<2x64xf32>
    %487 = vector.extract_strided_slice %484 {offsets = [0, 0], sizes = [2, 64], strides = [1, 1]} : vector<2x192xf32> to vector<2x64xf32>
    %488 = vector.extract_strided_slice %484 {offsets = [0, 64], sizes = [2, 64], strides = [1, 1]} : vector<2x192xf32> to vector<2x64xf32>
    %489 = vector.extract_strided_slice %484 {offsets = [0, 128], sizes = [2, 64], strides = [1, 1]} : vector<2x192xf32> to vector<2x64xf32>
    %490 = arith.mulf %487, %431 : vector<2x64xf32>
    %491 = arith.mulf %488, %486 : vector<2x64xf32>
    %492 = arith.addf %490, %491 : vector<2x64xf32>
    %493 = math.tanh %492 : vector<2x64xf32>
    %494 = arith.mulf %489, %493 : vector<2x64xf32>
    %c8_i32 = arith.constant 8 : i32
    %c0_67 = arith.constant 0 : index
    %c0_68 = arith.constant 0 : index
    %495 = vector.load %arg7[%c0_67, %c0_68] : memref<64x3xf32, #tpu.memory_space<vmem>>, vector<64x3xf32>
    %cst_69 = arith.constant dense<0.000000e+00> : vector<2x3xf32>
    %496 = tpu.matmul %494, %495, %cst_69 {dimension_numbers = #tpu.dot_dimension_numbers<[1], [0], [0], [1], [0, 0, 1, 1], [], []>} : vector<2x64xf32>, vector<64x3xf32>, vector<2x3xf32> -> vector<2x3xf32>
    %c0_70 = arith.constant 0 : index
    %c0_71 = arith.constant 0 : index
    %497 = vector.load %arg8[%c0_70, %c0_71] : memref<1x3xf32, #tpu.memory_space<vmem>>, vector<1x3xf32>
    %498 = vector.broadcast %497 : vector<1x3xf32> to vector<2x3xf32>
    %499 = arith.addf %496, %498 : vector<2x3xf32>
    %500 = arith.negf %499 : vector<2x3xf32>
    %501 = math.exp %500 : vector<2x3xf32>
    %cst_72 = arith.constant 1.000000e+00 : f32
    %502 = vector.broadcast %cst_72 : f32 to vector<2x3xf32>
    %503 = arith.addf %502, %501 : vector<2x3xf32>
    %504 = arith.divf %502, %503 : vector<2x3xf32>
    %c0_73 = arith.constant 0 : index
    %c0_74 = arith.constant 0 : index
    %505 = vector.load %arg9[%c0_73, %c0_74] : memref<2x3xf32, #tpu.memory_space<vmem>>, vector<2x3xf32>
    tpu.vector_store %arg9[%c0_73, %c0_74], %504 {strides = array<i32>} : memref<2x3xf32, #tpu.memory_space<vmem>>, vector<2x3xf32>,
    return
  }
}

</mosaic_0001>

<bundles_post_ra>
// kernel: risk_sequence_model.1
= control target key start
LH: loop header
LB: loop body
LE: loop exit
PB: predicated region body
PF: predicated region fallthrough
CT: control target
= control target key end

     0   :  { %14 = vsyncpa [#allocation3], 0  ;;  %s3731_s0 = inlined_call_operand.vmem [shape: f32[8,2,3], index: 0, kind: input, shape index: {}]   ;;  %s3732_s1 = inlined_call_operand.vmem [shape: f32[3,256], index: 1, kind: input, shape index: {}]   ;;  %s3733_s2 = inlined_call_operand.hbm [shape: f32[64,256], index: 2, kind: input, shape index: {}]   ;;  %s3734_s3 = inlined_call_operand.hbm [shape: f32[64,256], index: 3, kind: input, shape index: {}]   ;;  %s3735_s4 = inlined_call_operand.hbm [shape: f32[64,256], index: 4, kind: input, shape index: {}]   ;;  %s3736_s5 = inlined_call_operand.vmem [shape: f32[1,256], index: 5, kind: input, shape index: {}]   ;;  %s3737_s6 = inlined_call_operand.vmem [shape: f32[1,256], index: 6, kind: input, shape index: {}]   ;;  %s3738_s7 = inlined_call_operand.vmem [shape: f32[64,3], index: 7, kind: input, shape index: {}]   ;;  %s3739_s8 = inlined_call_operand.vmem [shape: f32[1,3], index: 8, kind: input, shape index: {}]   ;;  %s3740_s9 = inlined_call_operand.hbm [shape: f32[2,3], index: 9, kind: output, shape index: {}]  }
   0x1   :  { %15 = vsyncpa [#allocation6], 0 }
   0x2   :  { %16 = vsyncpa [#allocation4], 0  ;;  %s38_s11 = sshll.u32 %s3734_s3, 4  ;;  %s2729_s12 = smov [#allocation5]   ;;  %s39_s11 = int_to_ptr.hbm [resolvable:$true] %s38_s11 }
   0x3   :  { %s40_s13 = sshll.u32 %s2729_s12, 4  ;;  %s25_s16 = sshll.u32 %s3733_s2, 4  ;;  %s41_s13 = int_to_ptr.vmem [resolvable:$true] %s40_s13  ;;  %s26_s16 = int_to_ptr.hbm [resolvable:$true] %s25_s16 }
   0x4   :  { %s2730_s17 = smov 256   ;;  %s2731_s18 = smov 16  }
   0x5   :  { %46 = dma.hbm_to_vmem [thread:$0]  %s39_s11, 2048, %s41_s13, [#allocation6], %s2730_s17, %s2730_s17, %s2731_s18  }
   0x6   :  { %s2732_s19 = smov [#allocation2]   ;;  %s51_s23 = sshll.u32 %s3735_s4, 4  ;;  %s52_s23 = int_to_ptr.hbm [resolvable:$true] %s51_s23 }
   0x7   :  { %s27_s20 = sshll.u32 %s2732_s19, 4  ;;  %s2733_s3 = smov [#allocation7]   ;;  %s28_s20 = int_to_ptr.vmem [resolvable:$true] %s27_s20 }
   0x8   :  { %33 = dma.hbm_to_vmem [thread:$0]  %s26_s16, 2048, %s28_s20, [#allocation3], %s2730_s17, %s2730_s17, %s2731_s18  }
   0x9   :  { %s53_s24 = sshll.u32 %s2733_s3, 4  ;;  %s54_s24 = int_to_ptr.vmem [resolvable:$true] %s53_s24 }
   0xa   :  { %59 = dma.hbm_to_vmem [thread:$0]  %s52_s23, 2048, %s54_s24, [#allocation6], %s2730_s17, %s2730_s17, %s2731_s18  }
   0xb   :  { %2723 = dma.done.wait [#allocation3], 2048  }
   0xc   :  { %2724 = vsyncadd [#allocation3], 4294965248 }
   0xd   :  { %2725 = dma.done.wait [#allocation6], 4096  }
   0xe   :  { %2726 = vsyncadd [#allocation6], 4294963200  ;;  %v3745_v0 = vmov 0   ;;  %v3741_v1 = vmov 2   ;;  %v2802_v2 = vld [vmem:[#allocation2 + $0x70] sm:$0xff]  ;;  %v2804_v3 = vld [vmem:[#allocation2 + $0x78] sm:$0xff] }
   0xf   :  { %2338 = vset.pattern.permute.xlu0 %v3745_v0  ;;  %2340 = vset.pattern.permute.xlu1 %v3741_v1  ;;  %v2806_v4 = vld [vmem:[#allocation2 + $0x60] sm:$0xff]  ;;  %v2810_v5 = vld [vmem:[#allocation2 + $0x68] sm:$0xff]  ;;  %v2812_v6 = vld [vmem:[#allocation2 + $0x50] sm:$0xff]  ;;  %v3743_v19 = vmov 1   ;;  %v2737_v20 = vmov 0.0   ;;  %s2738_s29 = smov 64  }
  0x10   :  { %2341 = vset.pattern.permute.xlu2 %v3745_v0  ;;  %238 = vmatpush.msra.mxu2 %v2802_v2  ;;  %v2814_v7 = vld [vmem:[#allocation2 + $0x58] sm:$0xff]  ;;  %v180_v8 = vld [vmem:[%s3731_s0] sm:$0x3]  ;;  %v2823_v10 = vld [vmem:[#allocation2 + $0x48] sm:$0xff]  ;;  %vm136_vm8 = vcmask 523264   ;;  %s2739_s12 = smov [#allocation8]  }
  0x11   :  { %258 = vmatpush.msra.mxu3 %v2804_v3  ;;  %v2821_v9 = vld [vmem:[#allocation2 + $0x40] sm:$0xff]  ;;  %183 = vperm.xlu0 %2338, %v180_v8   ;;  %v2827_v11 = vld [vmem:[#allocation2 + $0x30] sm:$0xff]  ;;  %v2829_v12 = vld [vmem:[#allocation2 + $0x38] sm:$0xff] }
  0x12   :  { %239 = vmatpush.msra.mxu2 %v2806_v4  ;;  %217 = vperm.xlu1 %2340, %v180_v8   ;;  %3816 = vst [vmem:[#allocation12_spill] sm:$0xff] %v2829_v12  ;;  %v2833_v13 = vld [vmem:[#allocation2 + $0x20] sm:$0xff]  ;;  %v2835_v14 = vld [vmem:[#allocation2 + $0x28] sm:$0xff]  ;;  %v2839_v15 = vld [vmem:[#allocation2 + $0x10] sm:$0xff] }
  0x13   :  { %259 = vmatpush.msra.mxu3 %v2810_v5  ;;  %3817 = vst [vmem:[#allocation13_spill] sm:$0xff] %v2833_v13  ;;  %v2841_v16 = vld [vmem:[#allocation2 + $0x18] sm:$0xff]  ;;  %v2845_v17 = vld [vmem:[#allocation2] sm:$0xff]  ;;  %v2847_v18 = vld [vmem:[#allocation2 + $0x8] sm:$0xff] }
  0x14   :  { %240 = vmatpush.msra.mxu2 %v2812_v6  ;;  %3818 = vst [vmem:[#allocation14_spill] sm:$0xff] %v2835_v14  ;;  %v80_v21 = vld [vmem:[%s3732_s1] sm:$0x77]  ;;  %v2888_v50 = vld [vmem:[#allocation7 + $0x70] sm:$0xff]  ;;  %v2890_v51 = vld [vmem:[#allocation7 + $0x78] sm:$0xff] }
  0x15   :  { %260 = vmatpush.msra.mxu3 %v2814_v7  ;;  %3819 = vst [vmem:[#allocation15_spill] sm:$0xff] %v2839_v15  ;;  %v187_v23 = vperm.slane %v80_v21, 0  ;;  %v206_v25 = vperm.slane %v80_v21, 1  ;;  %v129_v26 = vld [vmem:[%s3736_s5] sm:$0x3]  ;;  %v220_v30 = vperm.slane %v80_v21, 2  ;;  %148 = vmatpush.msra.mxu0 %v2888_v50 }
  0x16   :  { %241 = vmatpush.msra.mxu2 %v2821_v9  ;;  %3820 = vst [vmem:[#allocation16_spill] sm:$0xff] %v2841_v16  ;;  %v2866_v28 = vperm.slane %v129_v26, 0  ;;  %v188_v38 = vperm.slane %v80_v21, 4  ;;  %v2878_v42 = vld [vmem:[%s3731_s0 + $0x2] sm:$0x3]  ;;  %v207_v44 = vperm.slane %v80_v21, 5  ;;  %168 = vmatpush.msra.mxu1 %v2890_v51 }
  0x17   :  { %261 = vmatpush.msra.mxu3 %v2823_v10  ;;  %3821 = vst [vmem:[#allocation17_spill] sm:$0xff] %v2845_v17  ;;  %v2860_v24 = vperm.slane %v187_v23, 0  ;;  %v2868_v29 = vperm.slane %v206_v25, 1  ;;  %v2872_v34 = vperm.slane %v220_v30, 2  ;;  %458 = vperm.xlu2 %2341, %v2878_v42   ;;  %v2884_v47 = vperm.slane %v129_v26, 1  ;;  %v2892_v52 = vld [vmem:[#allocation7 + $0x60] sm:$0xff] }
  0x18   :  { %242 = vmatpush.msra.mxu2 %v2827_v11  ;;  %3822 = vst [vmem:[#allocation18_spill] sm:$0xff] %v2847_v18  ;;  %v2880_v43 = vperm.slane %v188_v38, 0  ;;  %v2886_v48 = vperm.slane %v207_v44, 1  ;;  %v221_v49 = vperm.slane %v80_v21, 6  ;;  %v2900_v56 = vld [vmem:[#allocation7 + $0x68] sm:$0xff]  ;;  %v2904_v58 = vld [vmem:[#allocation7 + $0x50] sm:$0xff]  ;;  %149 = vmatpush.msra.mxu0 %v2892_v52 }
  0x19   :  { %262 = vmatpush.msra.mxu3 %v2829_v12  ;;  %2339 = vset.pattern.permute.xlu0 %v3743_v19  ;;  %3823 = vst [vmem:[#allocation19_spill] sm:$0xff] %v2860_v24  ;;  %v2909_v60 = vld [vmem:[#allocation7 + $0x58] sm:$0xff]  ;;  %v2913_v61 = vld [vmem:[#allocation7 + $0x40] sm:$0xff]  ;;  %v2923_v21 = vld [vmem:[#allocation7 + $0x30] sm:$0xff] }
  0x1a   :  { %243 = vmatpush.msra.mxu2 %v2833_v13  ;;  %203 = vperm.xlu0 %2339, %v180_v8   ;;  %3824 = vst [vmem:[#allocation20_spill] sm:$0xff] %v2866_v28  ;;  %v2896_v55 = vperm.slane %v221_v49, 2  ;;  %v2919_v8 = vld [vmem:[#allocation7 + $0x48] sm:$0xff]  ;;  %v2931_v25 = vld [vmem:[#allocation7 + $0x20] sm:$0xff]  ;;  %v2939_v30 = vld [vmem:[#allocation7 + $0x10] sm:$0xff] }
  0x1b   :  { %263 = vmatpush.msra.mxu3 %v2835_v14  ;;  %3825 = vst [vmem:[#allocation21_spill] sm:$0xff] %v2868_v29  ;;  %169 = vmatpush.msra.mxu1 %v2900_v56  ;;  %v2956_v38 = vld [vmem:[#allocation5 + $0x70] sm:$0xff]  ;;  %v2966_v44 = vld [vmem:[#allocation5 + $0x60] sm:$0xff]  ;;  %v2972_v49 = vld [vmem:[#allocation5 + $0x68] sm:$0xff] }
  0x1c   :  { %244 = vmatpush.msra.mxu2 %v2839_v15  ;;  %3826 = vst [vmem:[#allocation22_spill] sm:$0xff] %v2880_v43  ;;  %150 = vmatpush.msra.mxu0 %v2904_v58 }
  0x1d   :  { %264 = vmatpush.msra.mxu3 %v2841_v16  ;;  %3827 = vst [vmem:[#allocation23_spill] sm:$0xff] %v2884_v47  ;;  %170 = vmatpush.msra.mxu1 %v2909_v60 }
  0x1e   :  { %245 = vmatpush.msra.mxu2 %v2845_v17  ;;  %3828 = vst [vmem:[#allocation24_spill] sm:$0xff] %v2886_v48  ;;  %151 = vmatpush.msra.mxu0 %v2913_v61 }
  0x1f   :  { %265 = vmatpush.msra.mxu3 %v2847_v18  ;;  %246 = vmatmul.f32.vlgmr.msra.gmra.mxu2 %v2737_v20  ;;  %3829 = vst [vmem:[#allocation25_spill] sm:$0xff] %v2896_v55 }
  0x20   :  { %266 = vmatmul.f32.vlgmr.msra.gmra.mxu3 %v2737_v20  ;;  %2342 = vset.pattern.permute.xlu2 %v3743_v19 }
  0x21   :  { %466 = vperm.xlu2 %2342, %v2878_v42   ;;  %422 = vmatpush.msrb.mxu2 %v2888_v50 }
  0x22   :  { %2344 = vset.pattern.permute.xlu0 %v3741_v1  ;;  %442 = vmatpush.msrb.mxu3 %v2890_v51 }
  0x23   :  { %423 = vmatpush.msrb.mxu2 %v2892_v52  ;;  %171 = vmatpush.msra.mxu1 %v2919_v8 }
  0x24   :  { %443 = vmatpush.msrb.mxu3 %v2900_v56  ;;  %152 = vmatpush.msra.mxu0 %v2923_v21 }
  0x25   :  { %424 = vmatpush.msrb.mxu2 %v2904_v58 }
  0x26   :  { %444 = vmatpush.msrb.mxu3 %v2909_v60  ;;  %153 = vmatpush.msra.mxu0 %v2931_v25 }
  0x27   :  { %425 = vmatpush.msrb.mxu2 %v2913_v61 }
  0x28   :  { %445 = vmatpush.msrb.mxu3 %v2919_v8  ;;  %154 = vmatpush.msra.mxu0 %v2939_v30 }
  0x29   :  { %426 = vmatpush.msrb.mxu2 %v2923_v21 }
  0x2b   :  { %427 = vmatpush.msrb.mxu2 %v2931_v25 }
  0x2d   :  { %428 = vmatpush.msrb.mxu2 %v2939_v30 }
  0x83   :  { %v184_v22 = vpop.permute.xlu0 %183 }
  0x84   :  { %v193_v27 = vmul.f32 %v2860_v24, %v184_v22  ;;  %v218_v35 = vpop.permute.xlu1 %217  ;;  %v194_v46 = vmul.f32 %v2880_v43, %v184_v22  ;;  %v2927_v22 = vld [vmem:[#allocation7 + $0x38] sm:$0xff] }
  0x85   :  { %v226_v37 = vmul.f32 %v2872_v34, %v218_v35  ;;  %v227_v63 = vmul.f32 %v2896_v55, %v218_v35  ;;  %172 = vmatpush.msra.mxu1 %v2927_v22  ;;  %446 = vmatpush.msrb.mxu3 %v2927_v22 }
  0x86   :  { %v200_v32 = vadd.f32 %v2866_v28, %v193_v27  ;;  %v201_v53 = vadd.f32 %v2884_v47, %v194_v46  ;;  %v2935_v27 = vld [vmem:[#allocation7 + $0x28] sm:$0xff] }
  0x87   :  { %173 = vmatpush.msra.mxu1 %v2935_v27  ;;  %447 = vmatpush.msrb.mxu3 %v2935_v27 }
  0x8c   :  { %v204_v31 = vpop.permute.xlu0 %203 }
  0x8d   :  { %v212_v33 = vmul.f32 %v2868_v29, %v204_v31  ;;  %v213_v54 = vmul.f32 %v2886_v48, %v204_v31 }
  0x8f   :  { %v214_v36 = vadd.f32 %v212_v33, %v200_v32  ;;  %v215_v62 = vadd.f32 %v213_v54, %v201_v53  ;;  %v2945_v33 = vld [vmem:[#allocation7 + $0x18] sm:$0xff]  ;;  %v2975_v53 = vld [vmem:[#allocation5 + $0x50] sm:$0xff] }
  0x90   :  { %174 = vmatpush.msra.mxu1 %v2945_v33  ;;  %448 = vmatpush.msrb.mxu3 %v2945_v33 }
  0x91   :  { %v228_v39 = vadd.f32 %v226_v37, %v214_v36  ;;  %v229_v26 = vadd.f32 %v227_v63, %v215_v62  ;;  %v2950_v36 = vld [vmem:[#allocation7] sm:$0xff]  ;;  %v2954_v37 = vld [vmem:[#allocation7 + $0x8] sm:$0xff] }
  0x92   :  { %155 = vmatpush.msra.mxu0 %v2950_v36  ;;  %175 = vmatpush.msra.mxu1 %v2954_v37  ;;  %v2984_v63 = vld [vmem:[#allocation5 + $0x40] sm:$0xff] }
  0x93   :  { %156 = vmatmul.f32.vlgmr.msra.gmra.mxu0 %v2737_v20  ;;  %176 = vmatmul.f32.vlgmr.msra.gmra.mxu1 %v2737_v20 }
  0x94   :  { %331 = vmatpush.msrb.mxu0 %v2956_v38  ;;  %429 = vmatpush.msrb.mxu2 %v2950_v36 }
  0x95   :  { %449 = vmatpush.msrb.mxu3 %v2954_v37 }
  0x96   :  { %332 = vmatpush.msrb.mxu0 %v2966_v44  ;;  %582 = vmatpush.msra.mxu2 %v2956_v38 }
  0x98   :  { %333 = vmatpush.msrb.mxu0 %v2975_v53  ;;  %583 = vmatpush.msra.mxu2 %v2966_v44 }
  0x9a   :  { %334 = vmatpush.msrb.mxu0 %v2984_v63  ;;  %584 = vmatpush.msra.mxu2 %v2975_v53 }
  0x9c   :  { %585 = vmatpush.msra.mxu2 %v2984_v63 }
  0xa2   :  { %v247_v40 = vpop.f32.mrf.mxu2 }
  0xa3   :  { %v270_v41 = vadd.f32 %v247_v40, %v228_v39  ;;  %v267_v23 = vpop.f32.mrf.mxu3  ;;  %v2960_v40 = vld [vmem:[#allocation5 + $0x78] sm:$0xff] }
  0xa4   :  { %v2942_v32 = vadd.f32 %v267_v23, %v229_v26  ;;  %351 = vmatpush.msrb.mxu1 %v2960_v40  ;;  %v2988_v26 = vld [vmem:[#allocation5 + $0x48] sm:$0xff]  ;;  %602 = vmatpush.msra.mxu3 %v2960_v40 }
  0xa5   :  { %v2242_v45 = vmul.f32 -1.442695, %v270_v41 }
  0xa6   :  { %352 = vmatpush.msrb.mxu1 %v2972_v49  ;;  %603 = vmatpush.msra.mxu3 %v2972_v49 }
  0xa7   :  { %2353 = vpow2.f32 %v2242_v45 }
  0xad   :  { %v2354_v57 = vpop.eup %2353 }
  0xae   :  { %v2906_v59 = vadd.f32 1.0, %v2354_v57  ;;  %v2980_v57 = vld [vmem:[#allocation5 + $0x58] sm:$0xff] }
  0xaf   :  { %353 = vmatpush.msrb.mxu1 %v2980_v57  ;;  %604 = vmatpush.msra.mxu3 %v2980_v57 }
  0xb0   :  { %2355 = vrcp.f32 %v2906_v59  ;;  %v291_v41 = vand.u32 2147483648, %v2906_v59  ;;  %v289_v46 = vand.u32 2147483647, %v2906_v59  ;;  %vm285_vm1 = vweird.f32 %v2906_v59 }
  0xb1   :  { %2357 = vtanh.f32 %v2942_v32  ;;  %354 = vmatpush.msrb.mxu1 %v2988_v26  ;;  %605 = vmatpush.msra.mxu3 %v2988_v26 }
  0xb2   :  { %v292_v62 = vor.u32 1.1754944e-38, %v291_v41  ;;  %vm290_vm3 = vcmp.eq.f32.partialorder %v289_v46, 8.507059e+37  ;;  %v3013_v41 = vld [vmem:[#allocation5 + $0x20] sm:$0xff]  ;;  %v3026_v46 = vld [vmem:[#allocation5 + $0x10] sm:$0xff] }
  0xb3   :  { %3832 = vst [vmem:[#allocation28_spill] sm:$0xff] %v3013_v41 }
  0xb4   :  { %3834 = vst [vmem:[#allocation30_spill] sm:$0xff] %v3026_v46 }
  0xb6   :  { %v2356_v31 = vpop.eup %2355 }
  0xb7   :  { %v281_v35 = vmul.f32 %v2356_v31, %v2906_v59  ;;  %vm286_vm0 = vweird.f32 %v2356_v31  ;;  %v2358_v59 = vpop.eup %2357 }
  0xb8   :  { %vm287_vm2 = vmor %vm285_vm1, %vm286_vm0 }
  0xb9   :  { %v282_v39 = vsub.f32 1.0, %v281_v35 }
  0xbb   :  { %v283_v45 = vmul.f32 %v2356_v31, %v282_v39  ;;  %v3011_v39 = vld [vmem:[#allocation5 + $0x38] sm:$0xff] }
  0xbc   :  { %3831 = vst [vmem:[#allocation27_spill] sm:$0xff] %v3011_v39  ;;  %355 = vmatpush.msrb.mxu1 %v3011_v39  ;;  %606 = vmatpush.msra.mxu3 %v3011_v39 }
  0xbd   :  { %v284_v54 = vadd.f32 %v2356_v31, %v283_v45  ;;  %v3017_v45 = vld [vmem:[#allocation5 + $0x28] sm:$0xff] }
  0xbe   :  { %3833 = vst [vmem:[#allocation29_spill] sm:$0xff] %v3017_v45  ;;  %356 = vmatpush.msrb.mxu1 %v3017_v45  ;;  %607 = vmatpush.msra.mxu3 %v3017_v45 }
  0xbf   :  { %v288_v23 = vsel %vm287_vm2, %v2356_v31, %v284_v54  ;;  %v3009_v31 = vld [vmem:[#allocation5 + $0x30] sm:$0xff]  ;;  %v3028_v54 = vld [vmem:[#allocation5 + $0x18] sm:$0xff] }
  0xc0   :  { %v2991_v35 = vsel %vm290_vm3, %v292_v62, %v288_v23  ;;  %3830 = vst [vmem:[#allocation26_spill] sm:$0xff] %v3009_v31  ;;  %335 = vmatpush.msrb.mxu0 %v3009_v31  ;;  %586 = vmatpush.msra.mxu2 %v3009_v31  ;;  %v3032_v62 = vld [vmem:[#allocation5] sm:$0xff]  ;;  %v3034_v23 = vld [vmem:[#allocation5 + $0x8] sm:$0xff] }
  0xc1   :  { %v312_v20 = vmul.f32 %v2358_v59, %v2991_v35  ;;  %3835 = vst [vmem:[#allocation31_spill] sm:$0xff] %v3028_v54  ;;  %357 = vmatpush.msrb.mxu1 %v3028_v54  ;;  %608 = vmatpush.msra.mxu3 %v3028_v54  ;;  %v311_v19 = vmul.f32 0.0, %v2991_v35 }
  0xc2   :  { %336 = vmatpush.msrb.mxu0 %v3013_v41  ;;  %587 = vmatpush.msra.mxu2 %v3013_v41  ;;  %3836 = vst [vmem:[#allocation32_spill] sm:$0xff] %v3032_v62 }
  0xc3   :  { %314 = vrot.lane.b32.xlu1 %v312_v20, %s2738_s29  ;;  %3837 = vst [vmem:[#allocation33_spill] sm:$0xff] %v3034_v23  ;;  %358 = vmatpush.msrb.mxu1 %v3034_v23 }
  0xc4   :  { %337 = vmatpush.msrb.mxu0 %v3026_v46  ;;  %588 = vmatpush.msra.mxu2 %v3026_v46 }
  0xc5   :  { %509 = vmatpush.msra.mxu1 %v2804_v3  ;;  %609 = vmatpush.msra.mxu3 %v3034_v23 }
  0xc6   :  { %338 = vmatpush.msrb.mxu0 %v3032_v62  ;;  %589 = vmatpush.msra.mxu2 %v3032_v62 }
  0xc7   :  { %510 = vmatpush.msra.mxu1 %v2810_v5 }
  0xc8   :  { %489 = vmatpush.msra.mxu0 %v2802_v2 }
  0xc9   :  { %511 = vmatpush.msra.mxu1 %v2814_v7 }
  0xca   :  { %490 = vmatpush.msra.mxu0 %v2806_v4 }
  0xcb   :  { %474 = vperm.xlu1 %2340, %v2878_v42   ;;  %v2243_v42 = vmul.f32 -1.442695, %v2942_v32  ;;  %512 = vmatpush.msra.mxu1 %v2823_v10 }
  0xcc   :  { %491 = vmatpush.msra.mxu0 %v2812_v6 }
  0xcd   :  { %2359 = vpow2.f32 %v2243_v42  ;;  %513 = vmatpush.msra.mxu1 %v2829_v12 }
  0xce   :  { %492 = vmatpush.msra.mxu0 %v2821_v9 }
  0xcf   :  { %514 = vmatpush.msra.mxu1 %v2835_v14 }
  0xd0   :  { %493 = vmatpush.msra.mxu0 %v2827_v11 }
  0xd1   :  { %515 = vmatpush.msra.mxu1 %v2841_v16 }
  0xd2   :  { %494 = vmatpush.msra.mxu0 %v2833_v13 }
  0xd3   :  { %2343 = vset.pattern.permute.xlu1 %v3745_v0  ;;  %v2360_v32 = vpop.eup %2359  ;;  %516 = vmatpush.msra.mxu1 %v2847_v18 }
  0xd4   :  { %v279_v59 = vadd.f32 1.0, %v2360_v32  ;;  %495 = vmatpush.msra.mxu0 %v2839_v15 }
  0xd6   :  { %2361 = vrcp.f32 %v279_v59  ;;  %496 = vmatpush.msra.mxu0 %v2845_v17  ;;  %v306_v15 = vand.u32 2147483648, %v279_v59  ;;  %vm300_vm5 = vweird.f32 %v279_v59  ;;  %v304_v16 = vand.u32 2147483647, %v279_v59 }
  0xd8   :  { %v307_v17 = vor.u32 1.1754944e-38, %v306_v15  ;;  %vm305_vm7 = vcmp.eq.f32.partialorder %v304_v16, 8.507059e+37 }
  0xdc   :  { %v2362_v20 = vpop.eup %2361 }
  0xdd   :  { %v296_v42 = vmul.f32 %v2362_v20, %v279_v59  ;;  %vm301_vm4 = vweird.f32 %v2362_v20 }
  0xde   :  { %vm302_vm6 = vmor %vm300_vm5, %vm301_vm4 }
  0xdf   :  { %v297_v32 = vsub.f32 1.0, %v296_v42 }
  0xe1   :  { %v298_v1 = vmul.f32 %v2362_v20, %v297_v32 }
  0xe3   :  { %v299_v13 = vadd.f32 %v2362_v20, %v298_v1  ;;  %v459_v1 = vpop.permute.xlu2 %458 }
  0xe4   :  { %v461_v15 = vmul.f32 %v459_v1, %v2860_v24 }
  0xe5   :  { %v303_v14 = vsel %vm302_vm6, %v2362_v20, %v299_v13 }
  0xe6   :  { %v308_v42 = vsel %vm305_vm7, %v307_v17, %v303_v14  ;;  %v130_v14 = vld [vmem:[%s3737_s6] sm:$0x3]  ;;  %s2229_s6 = sshll.u32 %s2739_s12, 4  ;;  %s2230_s6 = int_to_ptr.vmem [resolvable:$true] %s2229_s6 }
  0xe7   :  { %v3108_v16 = vperm.slane %v130_v14, 0 }
  0xe9   :  { %3838 = vst [vmem:[#allocation34_spill] sm:$0xff] %v3108_v16 }
  0xeb   :  { %v467_v17 = vpop.permute.xlu2 %466 }
 0x110   :  { %v157_v13 = vpop.f32.mrf.mxu0 }
 0x111   :  { %v158_v35 = vadd.f32 %v157_v13, %v3108_v16  ;;  %v462_v13 = vmul.f32 %v459_v1, %v2880_v43 }
 0x135   :  { %v315_v0 = vpop.permute.xlu1 %314 }
 0x136   :  { %v3059_v12 = vadd.f32 %v315_v0, %v311_v19  ;;  %v3101_v0 = vld [vmem:[%s3731_s0 + $0x4] sm:$0x3]  ;;  %v469_v19 = vmul.f32 %v467_v17, %v2868_v29 }
 0x137   :  { %709 = vperm.xlu1 %2343, %v3101_v0  }
 0x138   :  { %2363 = vtanh.f32 %v3059_v12 }
 0x13d   :  { %v475_v59 = vpop.permute.xlu1 %474 }
 0x13e   :  { %v2364_v18 = vpop.eup %2363 }
 0x13f   :  { %v319_v32 = vmul.f32 %v2364_v18, %v308_v42  ;;  %v463_v18 = vadd.f32 %v461_v15, %v2866_v28 }
 0x141   :  { %2244 = vmatmul.msk.f32.vlgmr.msrb.gmra.mxu0 %vm136_vm8, %v319_v32  ;;  %2245 = vmatmul.msk.f32.vlgmr.msrb.gmra.mxu1 %vm136_vm8, %v319_v32 }
 0x142   :  { %673 = vmatpush.msrb.mxu0 %v2888_v50  ;;  %693 = vmatpush.msrb.mxu1 %v2890_v51 }
 0x144   :  { %674 = vmatpush.msrb.mxu0 %v2892_v52  ;;  %694 = vmatpush.msrb.mxu1 %v2900_v56 }
 0x146   :  { %675 = vmatpush.msrb.mxu0 %v2904_v58  ;;  %695 = vmatpush.msrb.mxu1 %v2909_v60 }
 0x148   :  { %676 = vmatpush.msrb.mxu0 %v2913_v61  ;;  %696 = vmatpush.msrb.mxu1 %v2919_v8 }
 0x149   :  { %2251 = vmatmul.msk.f32.vlgmr.msra.gmra.mxu0 %vm136_vm8, %v319_v32  ;;  %2252 = vmatmul.msk.f32.vlgmr.msra.gmra.mxu1 %vm136_vm8, %v319_v32  ;;  %v471_v32 = vadd.f32 %v469_v19, %v463_v18  ;;  %v464_v19 = vadd.f32 %v462_v13, %v2884_v47 }
 0x14a   :  { %677 = vmatpush.msrb.mxu0 %v2923_v21  ;;  %697 = vmatpush.msrb.mxu1 %v2927_v22 }
 0x14c   :  { %678 = vmatpush.msrb.mxu0 %v2931_v25  ;;  %698 = vmatpush.msrb.mxu1 %v2935_v27 }
 0x14e   :  { %679 = vmatpush.msrb.mxu0 %v2939_v30  ;;  %699 = vmatpush.msrb.mxu1 %v2945_v33 }
 0x150   :  { %680 = vmatpush.msrb.mxu0 %v2950_v36  ;;  %700 = vmatpush.msrb.mxu1 %v2954_v37 }
 0x152   :  { %833 = vmatpush.msra.mxu0 %v2956_v38  ;;  %853 = vmatpush.msra.mxu1 %v2960_v40 }
 0x154   :  { %834 = vmatpush.msra.mxu0 %v2966_v44  ;;  %854 = vmatpush.msra.mxu1 %v2972_v49 }
 0x156   :  { %835 = vmatpush.msra.mxu0 %v2975_v53  ;;  %855 = vmatpush.msra.mxu1 %v2980_v57 }
 0x158   :  { %836 = vmatpush.msra.mxu0 %v2984_v63  ;;  %856 = vmatpush.msra.mxu1 %v2988_v26 }
 0x15a   :  { %837 = vmatpush.msra.mxu0 %v3009_v31  ;;  %857 = vmatpush.msra.mxu1 %v3011_v39  ;;  %v3114_v31 = vperm.slane %v130_v14, 1  ;;  %v478_v14 = vmul.f32 %v475_v59, %v2896_v55 }
 0x15c   :  { %838 = vmatpush.msra.mxu0 %v3013_v41  ;;  %858 = vmatpush.msra.mxu1 %v3017_v45  ;;  %3839 = vst [vmem:[#allocation35_spill] sm:$0xff] %v3114_v31 }
 0x15e   :  { %839 = vmatpush.msra.mxu0 %v3026_v46  ;;  %859 = vmatpush.msra.mxu1 %v3028_v54  ;;  %v177_v54 = vpop.f32.mrf.mxu1 }
 0x15f   :  { %v178_v18 = vadd.f32 %v177_v54, %v3114_v31 }
 0x160   :  { %840 = vmatpush.msra.mxu0 %v3032_v62  ;;  %860 = vmatpush.msra.mxu1 %v3034_v23  ;;  %v477_v23 = vmul.f32 %v475_v59, %v2872_v34 }
 0x162   :  { %v479_v46 = vadd.f32 %v477_v23, %v471_v32 }
 0x1be   :  { %v340_v20 = vpop.f32.mrf.mxu0  ;;  %v360_v29 = vpop.f32.mrf.mxu1 }
 0x1bf   :  { %v341_v42 = vadd.f32 %v340_v20, %v158_v35  ;;  %v470_v35 = vmul.f32 %v467_v17, %v2886_v48  ;;  %v361_v20 = vadd.f32 %v360_v29, %v178_v18 }
 0x1c1   :  { %v2246_v62 = vmul.f32 -1.442695, %v341_v42 }
 0x1c3   :  { %2365 = vpow2.f32 %v2246_v62 }
 0x1c6   :  { %v498_v24 = vpop.f32.mrf.mxu0  ;;  %v518_v1 = vpop.f32.mrf.mxu1 }
 0x1c7   :  { %v521_v45 = vadd.f32 %v498_v24, %v479_v46 }
 0x1c9   :  { %v2366_v41 = vpop.eup %2365  ;;  %v2253_v39 = vmul.f32 -1.442695, %v521_v45  ;;  %v472_v45 = vadd.f32 %v470_v35, %v464_v19 }
 0x1ca   :  { %v369_v15 = vadd.f32 1.0, %v2366_v41 }
 0x1cb   :  { %2367 = vpow2.f32 %v2253_v39  ;;  %v480_v32 = vadd.f32 %v478_v14, %v472_v45 }
 0x1cc   :  { %2369 = vrcp.f32 %v369_v15  ;;  %v382_v41 = vand.u32 2147483648, %v369_v15  ;;  %v380_v54 = vand.u32 2147483647, %v369_v15  ;;  %vm376_vm10 = vweird.f32 %v369_v15 }
 0x1cd   :  { %v522_v48 = vadd.f32 %v518_v1, %v480_v32 }
 0x1ce   :  { %v383_v29 = vor.u32 1.1754944e-38, %v382_v41  ;;  %vm381_vm12 = vcmp.eq.f32.partialorder %v380_v54, 8.507059e+37  ;;  %v2247_v54 = vmul.f32 -1.442695, %v361_v20 }
 0x1d1   :  { %v2368_v62 = vpop.eup %2367 }
 0x1d2   :  { %v2370_v23 = vpop.eup %2369  ;;  %v529_v24 = vadd.f32 1.0, %v2368_v62 }
 0x1d3   :  { %v372_v46 = vmul.f32 %v2370_v23, %v369_v15  ;;  %vm377_vm9 = vweird.f32 %v2370_v23 }
 0x1d4   :  { %2371 = vrcp.f32 %v529_v24  ;;  %vm378_vm11 = vmor %vm376_vm10, %vm377_vm9  ;;  %v542_v55 = vand.u32 2147483648, %v529_v24  ;;  %v540_v45 = vand.u32 2147483647, %v529_v24  ;;  %vm536_vm14 = vweird.f32 %v529_v24 }
 0x1d5   :  { %v373_v39 = vsub.f32 1.0, %v372_v46  ;;  %2373 = vtanh.f32 %v361_v20 }
 0x1d6   :  { %2375 = vtanh.f32 %v522_v48  ;;  %v543_v15 = vor.u32 1.1754944e-38, %v542_v55  ;;  %vm541_vm0 = vcmp.eq.f32.partialorder %v540_v45, 8.507059e+37  ;;  %v2254_v55 = vmul.f32 -1.442695, %v522_v48 }
 0x1d7   :  { %v374_v42 = vmul.f32 %v2370_v23, %v373_v39  ;;  %2377 = vpow2.f32 %v2247_v54  ;;  %v3846_v54 = vld [vmem:[#allocation18_spill] sm:$0xff] }
 0x1d9   :  { %v375_v13 = vadd.f32 %v2370_v23, %v374_v42 }
 0x1da   :  { %v2372_v17 = vpop.eup %2371 }
 0x1db   :  { %v532_v18 = vmul.f32 %v2372_v17, %v529_v24  ;;  %v379_v62 = vsel %vm378_vm11, %v2370_v23, %v375_v13  ;;  %v2374_v19 = vpop.eup %2373  ;;  %vm537_vm13 = vweird.f32 %v2372_v17 }
 0x1dc   :  { %v384_v59 = vsel %vm381_vm12, %v383_v29, %v379_v62  ;;  %vm538_vm15 = vmor %vm536_vm14, %vm537_vm13  ;;  %v2376_v41 = vpop.eup %2375 }
 0x1dd   :  { %v403_v35 = vmul.f32 %v2374_v19, %v384_v59  ;;  %v533_v46 = vsub.f32 1.0, %v532_v18  ;;  %v2378_v32 = vpop.eup %2377  ;;  %v402_v62 = vmul.f32 0.0, %v384_v59 }
 0x1de   :  { %v370_v13 = vadd.f32 1.0, %v2378_v32 }
 0x1df   :  { %405 = vrot.lane.b32.xlu2 %v403_v35, %s2738_s29  ;;  %v534_v39 = vmul.f32 %v2372_v17, %v533_v46 }
 0x1e0   :  { %2379 = vrcp.f32 %v370_v13  ;;  %vm391_vm2 = vweird.f32 %v370_v13  ;;  %v395_v20 = vand.u32 2147483647, %v370_v13 }
 0x1e1   :  { %v535_v14 = vadd.f32 %v2372_v17, %v534_v39  ;;  %2381 = vpow2.f32 %v2254_v55 }
 0x1e2   :  { %vm396_vm4 = vcmp.eq.f32.partialorder %v395_v20, 8.507059e+37 }
 0x1e3   :  { %v539_v1 = vsel %vm538_vm15, %v2372_v17, %v535_v14 }
 0x1e4   :  { %v544_v23 = vsel %vm541_vm0, %v543_v15, %v539_v1 }
 0x1e5   :  { %v563_v42 = vmul.f32 %v2376_v41, %v544_v23 }
 0x1e6   :  { %v2380_v29 = vpop.eup %2379 }
 0x1e7   :  { %565 = vrot.lane.b32.xlu0 %v563_v42, %s2738_s29  ;;  %717 = vperm.xlu2 %2342, %v3101_v0   ;;  %v387_v24 = vmul.f32 %v2380_v29, %v370_v13  ;;  %vm392_vm1 = vweird.f32 %v2380_v29  ;;  %v2382_v39 = vpop.eup %2381  ;;  %v3141_v42 = vld [vmem:[%s3731_s0 + $0x6] sm:$0x3] }
 0x1e8   :  { %vm393_vm3 = vmor %vm391_vm2, %vm392_vm1  ;;  %v530_v48 = vadd.f32 1.0, %v2382_v39 }
 0x1e9   :  { %v388_v18 = vsub.f32 1.0, %v387_v24 }
 0x1ea   :  { %v557_v55 = vand.u32 2147483648, %v530_v48  ;;  %vm551_vm6 = vweird.f32 %v530_v48 }
 0x1eb   :  { %v389_v17 = vmul.f32 %v2380_v29, %v388_v18 }
 0x1ed   :  { %v390_v46 = vadd.f32 %v2380_v29, %v389_v17  ;;  %v555_v17 = vand.u32 2147483647, %v530_v48 }
 0x1ef   :  { %725 = vperm.xlu0 %2344, %v3101_v0   ;;  %v397_v0 = vand.u32 2147483648, %v370_v13  ;;  %v394_v45 = vsel %vm393_vm3, %v2380_v29, %v390_v46  ;;  %v562_v13 = vmul.f32 %v544_v23, %v3059_v12  ;;  %vm556_vm9 = vcmp.eq.f32.partialorder %v555_v17, 8.507059e+37  ;;  %v3848_v12 = vld [vmem:[#allocation26_spill] sm:$0xff] }
 0x1f1   :  { %v398_v14 = vor.u32 1.1754944e-38, %v397_v0 }
 0x1f3   :  { %v399_v1 = vsel %vm396_vm4, %v398_v14, %v394_v45  ;;  %v3857_v45 = vld [vmem:[#allocation21_spill] sm:$0xff] }
 0x1f7   :  { %976 = vperm.xlu0 %2344, %v3141_v42  }
 0x239   :  { %v406_v19 = vpop.permute.xlu2 %405 }
 0x23a   :  { %v3125_v35 = vadd.f32 %v406_v19, %v402_v62  ;;  %v558_v19 = vor.u32 1.1754944e-38, %v557_v55 }
 0x23c   :  { %2383 = vtanh.f32 %v3125_v35 }
 0x23d   :  { %2385 = vrcp.f32 %v530_v48 }
 0x242   :  { %v2384_v15 = vpop.eup %2383 }
 0x243   :  { %v410_v59 = vmul.f32 %v2384_v15, %v399_v1  ;;  %v2386_v41 = vpop.eup %2385 }
 0x244   :  { %vm552_vm5 = vweird.f32 %v2386_v41 }
 0x245   :  { %2248 = vmatmul.msk.f32.vlgmr.msrb.gmra.mxu2 %vm136_vm8, %v410_v59  ;;  %2249 = vmatmul.msk.f32.vlgmr.msrb.gmra.mxu3 %vm136_vm8, %v410_v59  ;;  %vm553_vm7 = vmor %vm551_vm6, %vm552_vm5 }
 0x246   :  { %740 = vmatpush.msrb.mxu2 %v2802_v2  ;;  %760 = vmatpush.msrb.mxu3 %v2804_v3  ;;  %v3840_v2 = vld [vmem:[#allocation12_spill] sm:$0xff]  ;;  %v547_v3 = vmul.f32 %v2386_v41, %v530_v48 }
 0x248   :  { %741 = vmatpush.msrb.mxu2 %v2806_v4  ;;  %761 = vmatpush.msrb.mxu3 %v2810_v5  ;;  %v3841_v4 = vld [vmem:[#allocation13_spill] sm:$0xff]  ;;  %v3842_v5 = vld [vmem:[#allocation14_spill] sm:$0xff] }
 0x24a   :  { %742 = vmatpush.msrb.mxu2 %v2812_v6  ;;  %762 = vmatpush.msrb.mxu3 %v2814_v7  ;;  %v3843_v6 = vld [vmem:[#allocation15_spill] sm:$0xff]  ;;  %v3844_v7 = vld [vmem:[#allocation16_spill] sm:$0xff] }
 0x24c   :  { %743 = vmatpush.msrb.mxu2 %v2821_v9  ;;  %763 = vmatpush.msrb.mxu3 %v2823_v10  ;;  %v548_v9 = vsub.f32 1.0, %v547_v3  ;;  %v3845_v10 = vld [vmem:[#allocation17_spill] sm:$0xff] }
 0x24e   :  { %744 = vmatpush.msrb.mxu2 %v2827_v11  ;;  %764 = vmatpush.msrb.mxu3 %v3840_v2  ;;  %v549_v32 = vmul.f32 %v2386_v41, %v548_v9  ;;  %v3847_v11 = vmov 0  }
 0x24f   :  { %2345 = vset.pattern.permute.xlu0 %v3847_v11 }
 0x250   :  { %745 = vmatpush.msrb.mxu2 %v3841_v4  ;;  %765 = vmatpush.msrb.mxu3 %v3842_v5  ;;  %v550_v18 = vadd.f32 %v2386_v41, %v549_v32 }
 0x252   :  { %746 = vmatpush.msrb.mxu2 %v3843_v6  ;;  %766 = vmatpush.msrb.mxu3 %v3844_v7  ;;  %v554_v62 = vsel %vm553_vm7, %v2386_v41, %v550_v18  ;;  %v3858_v18 = vld [vmem:[#allocation24_spill] sm:$0xff] }
 0x253   :  { %v559_v0 = vsel %vm556_vm9, %v558_v19, %v554_v62 }
 0x254   :  { %747 = vmatpush.msrb.mxu2 %v3845_v10  ;;  %767 = vmatpush.msrb.mxu3 %v3846_v54 }
 0x259   :  { %v566_v29 = vpop.permute.xlu0 %565 }
 0x25a   :  { %v3154_v24 = vadd.f32 %v566_v29, %v562_v13 }
 0x25c   :  { %2387 = vtanh.f32 %v3154_v24 }
 0x262   :  { %v2388_v46 = vpop.eup %2387 }
 0x263   :  { %v570_v20 = vmul.f32 %v2388_v46, %v559_v0  ;;  %v3859_v46 = vld [vmem:[#allocation25_spill] sm:$0xff] }
 0x265   :  { %2255 = vmatmul.msk.f32.vlgmr.msra.gmra.mxu2 %vm136_vm8, %v570_v20  ;;  %2256 = vmatmul.msk.f32.vlgmr.msra.gmra.mxu3 %vm136_vm8, %v570_v20 }
 0x266   :  { %924 = vmatpush.msra.mxu2 %v2888_v50  ;;  %944 = vmatpush.msra.mxu3 %v2890_v51  ;;  %v3849_v50 = vld [vmem:[#allocation27_spill] sm:$0xff]  ;;  %v3850_v51 = vld [vmem:[#allocation28_spill] sm:$0xff] }
 0x268   :  { %925 = vmatpush.msra.mxu2 %v2892_v52  ;;  %945 = vmatpush.msra.mxu3 %v2900_v56  ;;  %v3851_v52 = vld [vmem:[#allocation29_spill] sm:$0xff]  ;;  %v3852_v56 = vld [vmem:[#allocation30_spill] sm:$0xff] }
 0x26a   :  { %926 = vmatpush.msra.mxu2 %v2904_v58  ;;  %946 = vmatpush.msra.mxu3 %v2909_v60  ;;  %v3853_v58 = vld [vmem:[#allocation31_spill] sm:$0xff]  ;;  %v3854_v60 = vld [vmem:[#allocation32_spill] sm:$0xff] }
 0x26c   :  { %927 = vmatpush.msra.mxu2 %v2913_v61  ;;  %947 = vmatpush.msra.mxu3 %v2919_v8  ;;  %v3855_v61 = vld [vmem:[#allocation33_spill] sm:$0xff] }
 0x26d   :  { %2262 = vmatmul.msk.f32.vlgmr.msrb.gmra.mxu2 %vm136_vm8, %v570_v20  ;;  %2263 = vmatmul.msk.f32.vlgmr.msrb.gmra.mxu3 %vm136_vm8, %v570_v20 }
 0x26e   :  { %928 = vmatpush.msra.mxu2 %v2923_v21  ;;  %948 = vmatpush.msra.mxu3 %v2927_v22  ;;  %v710_v21 = vpop.permute.xlu1 %709  ;;  %v3856_v22 = vld [vmem:[#allocation19_spill] sm:$0xff] }
 0x26f   :  { %v713_v10 = vmul.f32 %v710_v21, %v2880_v43 }
 0x270   :  { %929 = vmatpush.msra.mxu2 %v2931_v25  ;;  %949 = vmatpush.msra.mxu3 %v2935_v27  ;;  %v712_v25 = vmul.f32 %v710_v21, %v3856_v22  ;;  %v718_v27 = vpop.permute.xlu2 %717 }
 0x271   :  { %v720_v14 = vmul.f32 %v718_v27, %v3857_v45  ;;  %v715_v29 = vadd.f32 %v713_v10, %v2884_v47  ;;  %v721_v55 = vmul.f32 %v718_v27, %v3858_v18 }
 0x272   :  { %930 = vmatpush.msra.mxu2 %v2939_v30  ;;  %950 = vmatpush.msra.mxu3 %v2945_v33  ;;  %v726_v33 = vpop.permute.xlu0 %725  ;;  %v714_v39 = vadd.f32 %v712_v25, %v2866_v28 }
 0x273   :  { %v728_v48 = vmul.f32 %v726_v33, %v2872_v34  ;;  %v729_v0 = vmul.f32 %v726_v33, %v3859_v46 }
 0x274   :  { %931 = vmatpush.msra.mxu2 %v2950_v36  ;;  %951 = vmatpush.msra.mxu3 %v2954_v37  ;;  %v722_v59 = vadd.f32 %v720_v14, %v714_v39 }
 0x276   :  { %1084 = vmatpush.msrb.mxu2 %v2956_v38  ;;  %1104 = vmatpush.msrb.mxu3 %v2960_v40  ;;  %v730_v2 = vadd.f32 %v728_v48, %v722_v59 }
 0x278   :  { %1085 = vmatpush.msrb.mxu2 %v2966_v44  ;;  %1105 = vmatpush.msrb.mxu3 %v2972_v49 }
 0x27a   :  { %1086 = vmatpush.msrb.mxu2 %v2975_v53  ;;  %1106 = vmatpush.msrb.mxu3 %v2980_v57 }
 0x27c   :  { %1087 = vmatpush.msrb.mxu2 %v2984_v63  ;;  %1107 = vmatpush.msrb.mxu3 %v2988_v26 }
 0x27e   :  { %1088 = vmatpush.msrb.mxu2 %v3848_v12  ;;  %1108 = vmatpush.msrb.mxu3 %v3849_v50 }
 0x280   :  { %1089 = vmatpush.msrb.mxu2 %v3850_v51  ;;  %1109 = vmatpush.msrb.mxu3 %v3851_v52 }
 0x282   :  { %1090 = vmatpush.msrb.mxu2 %v3852_v56  ;;  %1110 = vmatpush.msrb.mxu3 %v3853_v58 }
 0x284   :  { %1091 = vmatpush.msrb.mxu2 %v3854_v60  ;;  %1111 = vmatpush.msrb.mxu3 %v3855_v61 }
 0x2c8   :  { %v431_v8 = vpop.f32.mrf.mxu2  ;;  %v451_v41 = vpop.f32.mrf.mxu3 }
 0x2c9   :  { %v432_v30 = vadd.f32 %v431_v8, %v3108_v16  ;;  %v452_v54 = vadd.f32 %v451_v41, %v3114_v31  ;;  %v723_v8 = vadd.f32 %v721_v55, %v715_v29  ;;  %v3860_v29 = vmov 1  }
 0x2ca   :  { %v3861_v55 = vmov 2  }
 0x2cb   :  { %v731_v39 = vadd.f32 %v729_v0, %v723_v8 }
 0x2e8   :  { %v591_v23 = vpop.f32.mrf.mxu2  ;;  %v611_v9 = vpop.f32.mrf.mxu3 }
 0x2e9   :  { %v592_v15 = vadd.f32 %v591_v23, %v432_v30  ;;  %v612_v17 = vadd.f32 %v611_v9, %v452_v54 }
 0x2eb   :  { %v2257_v1 = vmul.f32 -1.442695, %v592_v15 }
 0x2ed   :  { %2389 = vpow2.f32 %v2257_v1 }
 0x2f0   :  { %v749_v3 = vpop.f32.mrf.mxu2  ;;  %v769_v30 = vpop.f32.mrf.mxu3 }
 0x2f1   :  { %v772_v4 = vadd.f32 %v749_v3, %v730_v2  ;;  %v773_v48 = vadd.f32 %v769_v30, %v731_v39 }
 0x2f3   :  { %v2390_v5 = vpop.eup %2389  ;;  %v2264_v6 = vmul.f32 -1.442695, %v772_v4 }
 0x2f4   :  { %v620_v7 = vadd.f32 1.0, %v2390_v5 }
 0x2f5   :  { %2391 = vpow2.f32 %v2264_v6 }
 0x2f6   :  { %2393 = vrcp.f32 %v620_v7  ;;  %v633_v25 = vand.u32 2147483648, %v620_v7  ;;  %v631_v23 = vand.u32 2147483647, %v620_v7  ;;  %vm627_vm11 = vweird.f32 %v620_v7 }
 0x2f8   :  { %v634_v27 = vor.u32 1.1754944e-38, %v633_v25  ;;  %vm632_vm13 = vcmp.eq.f32.partialorder %v631_v23, 8.507059e+37 }
 0x2fb   :  { %v2392_v32 = vpop.eup %2391 }
 0x2fc   :  { %v2394_v13 = vpop.eup %2393  ;;  %v780_v62 = vadd.f32 1.0, %v2392_v32 }
 0x2fd   :  { %v623_v19 = vmul.f32 %v2394_v13, %v620_v7  ;;  %vm628_vm10 = vweird.f32 %v2394_v13 }
 0x2fe   :  { %2395 = vrcp.f32 %v780_v62  ;;  %vm629_vm12 = vmor %vm627_vm11, %vm628_vm10  ;;  %v793_v4 = vand.u32 2147483648, %v780_v62  ;;  %v791_v6 = vand.u32 2147483647, %v780_v62  ;;  %vm787_vm15 = vweird.f32 %v780_v62 }
 0x2ff   :  { %v624_v20 = vsub.f32 1.0, %v623_v19  ;;  %2397 = vtanh.f32 %v612_v17  ;;  %v2258_v19 = vmul.f32 -1.442695, %v612_v17 }
 0x300   :  { %2399 = vtanh.f32 %v773_v48  ;;  %v794_v7 = vor.u32 1.1754944e-38, %v793_v4  ;;  %vm792_vm1 = vcmp.eq.f32.partialorder %v791_v6, 8.507059e+37 }
 0x301   :  { %v625_v21 = vmul.f32 %v2394_v13, %v624_v20  ;;  %2401 = vpow2.f32 %v2258_v19 }
 0x303   :  { %v626_v14 = vadd.f32 %v2394_v13, %v625_v21 }
 0x304   :  { %v2396_v15 = vpop.eup %2395 }
 0x305   :  { %v783_v1 = vmul.f32 %v2396_v15, %v780_v62  ;;  %v630_v59 = vsel %vm629_vm12, %v2394_v13, %v626_v14  ;;  %v2398_v33 = vpop.eup %2397  ;;  %vm788_vm14 = vweird.f32 %v2396_v15  ;;  %v2265_v62 = vmul.f32 -1.442695, %v773_v48 }
 0x306   :  { %v635_v41 = vsel %vm632_vm13, %v634_v27, %v630_v59  ;;  %vm789_vm0 = vmor %vm787_vm15, %vm788_vm14  ;;  %v2400_v54 = vpop.eup %2399 }
 0x307   :  { %v654_v2 = vmul.f32 %v2398_v33, %v635_v41  ;;  %v784_v3 = vsub.f32 1.0, %v783_v1  ;;  %v2402_v0 = vpop.eup %2401  ;;  %2403 = vpow2.f32 %v2265_v62 }
 0x308   :  { %v621_v20 = vadd.f32 1.0, %v2402_v0 }
 0x309   :  { %656 = vrot.lane.b32.xlu1 %v654_v2, %s2738_s29  ;;  %v785_v5 = vmul.f32 %v2396_v15, %v784_v3 }
 0x30a   :  { %2405 = vrcp.f32 %v621_v20  ;;  %v648_v2 = vand.u32 2147483648, %v621_v20  ;;  %vm642_vm3 = vweird.f32 %v621_v20  ;;  %v646_v3 = vand.u32 2147483647, %v621_v20 }
 0x30b   :  { %v786_v9 = vadd.f32 %v2396_v15, %v785_v5 }
 0x30c   :  { %vm647_vm5 = vcmp.eq.f32.partialorder %v646_v3, 8.507059e+37  ;;  %v3271_v3 = vld [vmem:[#allocation7 + $0x70] sm:$0xff] }
 0x30d   :  { %v790_v10 = vsel %vm789_vm0, %v2396_v15, %v786_v9  ;;  %v2404_v8 = vpop.eup %2403  ;;  %v653_v15 = vmul.f32 %v635_v41, %v3125_v35  ;;  %v649_v35 = vor.u32 1.1754944e-38, %v648_v2  ;;  %v3266_v2 = vld [vmem:[#allocation2 + $0x8] sm:$0xff] }
 0x30e   :  { %v795_v32 = vsel %vm792_vm1, %v794_v7, %v790_v10  ;;  %v781_v25 = vadd.f32 1.0, %v2404_v8  ;;  %v3228_v8 = vld [vmem:[#allocation2 + $0x68] sm:$0xff] }
 0x30f   :  { %v814_v13 = vmul.f32 %v2400_v54, %v795_v32  ;;  %v813_v33 = vmul.f32 %v795_v32, %v3154_v24  ;;  %v3219_v32 = vld [vmem:[#allocation2 + $0x70] sm:$0xff] }
 0x310   :  { %v2406_v30 = vpop.eup %2405  ;;  %2407 = vrcp.f32 %v781_v25  ;;  %v808_v24 = vand.u32 2147483648, %v781_v25  ;;  %vm802_vm7 = vweird.f32 %v781_v25  ;;  %v806_v54 = vand.u32 2147483647, %v781_v25 }
 0x311   :  { %816 = vrot.lane.b32.xlu2 %v814_v13, %s2738_s29  ;;  %960 = vperm.xlu1 %2343, %v3141_v42   ;;  %v638_v21 = vmul.f32 %v2406_v30, %v621_v20  ;;  %vm643_vm2 = vweird.f32 %v2406_v30  ;;  %v3222_v13 = vld [vmem:[#allocation2 + $0x78] sm:$0xff]  ;;  %v3225_v20 = vld [vmem:[#allocation2 + $0x60] sm:$0xff] }
 0x312   :  { %vm644_vm4 = vmor %vm642_vm3, %vm643_vm2  ;;  %v809_v0 = vor.u32 1.1754944e-38, %v808_v24  ;;  %vm807_vm10 = vcmp.eq.f32.partialorder %v806_v54, 8.507059e+37  ;;  %v3295_v24 = vld [vmem:[#allocation7 + $0x30] sm:$0xff]  ;;  %v3298_v54 = vld [vmem:[#allocation7 + $0x38] sm:$0xff] }
 0x313   :  { %v639_v23 = vsub.f32 1.0, %v638_v21  ;;  %v3234_v21 = vld [vmem:[#allocation2 + $0x58] sm:$0xff] }
 0x316   :  { %v2408_v39 = vpop.eup %2407 }
 0x317   :  { %v798_v14 = vmul.f32 %v2408_v39, %v781_v25  ;;  %vm803_vm6 = vweird.f32 %v2408_v39 }
 0x318   :  { %vm804_vm9 = vmor %vm802_vm7, %vm803_vm6 }
 0x319   :  { %968 = vperm.xlu2 %2342, %v3141_v42   ;;  %2346 = vset.pattern.permute.xlu1 %v3860_v29  ;;  %v640_v42 = vmul.f32 %v2406_v30, %v639_v23  ;;  %v799_v17 = vsub.f32 1.0, %v798_v14  ;;  %v3240_v14 = vld [vmem:[#allocation2 + $0x48] sm:$0xff] }
 0x31b   :  { %v641_v59 = vadd.f32 %v2406_v30, %v640_v42  ;;  %v800_v5 = vmul.f32 %v2408_v39, %v799_v17  ;;  %v3245_v42 = vld [vmem:[#allocation2 + $0x30] sm:$0xff]  ;;  %v3254_v17 = vld [vmem:[#allocation2 + $0x28] sm:$0xff] }
 0x31d   :  { %v645_v6 = vsel %vm644_vm4, %v2406_v30, %v641_v59  ;;  %v801_v7 = vadd.f32 %v2408_v39, %v800_v5  ;;  %v3231_v30 = vld [vmem:[#allocation2 + $0x50] sm:$0xff]  ;;  %v3260_v59 = vld [vmem:[#allocation2 + $0x18] sm:$0xff] }
 0x31e   :  { %v650_v9 = vsel %vm647_vm5, %v649_v35, %v645_v6  ;;  %v3274_v5 = vld [vmem:[#allocation7 + $0x78] sm:$0xff]  ;;  %v3277_v6 = vld [vmem:[#allocation7 + $0x60] sm:$0xff]  ;;  %v3280_v35 = vld [vmem:[#allocation7 + $0x68] sm:$0xff] }
 0x31f   :  { %v805_v19 = vsel %vm804_vm9, %v2408_v39, %v801_v7  ;;  %v3237_v39 = vld [vmem:[#allocation2 + $0x40] sm:$0xff] }
 0x320   :  { %v810_v25 = vsel %vm807_vm10, %v809_v0, %v805_v19  ;;  %v3289_v7 = vld [vmem:[#allocation7 + $0x40] sm:$0xff]  ;;  %v3307_v0 = vld [vmem:[#allocation7 + $0x10] sm:$0xff] }
 0x321   :  { %2347 = vset.pattern.permute.xlu2 %v3861_v55  ;;  %v3301_v19 = vld [vmem:[#allocation7 + $0x20] sm:$0xff] }
 0x36b   :  { %v817_v48 = vpop.permute.xlu2 %816 }
 0x36c   :  { %v3214_v4 = vadd.f32 %v817_v48, %v813_v33  ;;  %v3257_v48 = vld [vmem:[#allocation2 + $0x10] sm:$0xff]  ;;  %v3263_v33 = vld [vmem:[#allocation2] sm:$0xff] }
 0x37b   :  { %v657_v27 = vpop.permute.xlu1 %656 }
 0x37c   :  { %v3210_v1 = vadd.f32 %v657_v27, %v653_v15  ;;  %v3248_v15 = vld [vmem:[#allocation2 + $0x38] sm:$0xff]  ;;  %v3251_v27 = vld [vmem:[#allocation2 + $0x20] sm:$0xff] }
 0x37e   :  { %2409 = vtanh.f32 %v3210_v1 }
 0x37f   :  { %2411 = vtanh.f32 %v3214_v4 }
 0x384   :  { %v2410_v41 = vpop.eup %2409 }
 0x385   :  { %v661_v10 = vmul.f32 %v2410_v41, %v650_v9  ;;  %v2412_v62 = vpop.eup %2411  ;;  %v3283_v41 = vld [vmem:[#allocation7 + $0x50] sm:$0xff]  ;;  %v3286_v9 = vld [vmem:[#allocation7 + $0x58] sm:$0xff] }
 0x386   :  { %v821_v23 = vmul.f32 %v2412_v62, %v810_v25  ;;  %v3304_v62 = vld [vmem:[#allocation7 + $0x28] sm:$0xff]  ;;  %v3310_v25 = vld [vmem:[#allocation7 + $0x18] sm:$0xff] }
 0x387   :  { %2259 = vmatmul.msk.f32.vlgmr.msrb.gmra.mxu0 %vm136_vm8, %v661_v10  ;;  %2260 = vmatmul.msk.f32.vlgmr.msrb.gmra.mxu1 %vm136_vm8, %v661_v10  ;;  %v3292_v10 = vld [vmem:[#allocation7 + $0x48] sm:$0xff] }
 0x388   :  { %991 = vmatpush.msrb.mxu0 %v3219_v32  ;;  %1011 = vmatpush.msrb.mxu1 %v3222_v13 }
 0x38a   :  { %992 = vmatpush.msrb.mxu0 %v3225_v20  ;;  %1012 = vmatpush.msrb.mxu1 %v3228_v8 }
 0x38c   :  { %993 = vmatpush.msrb.mxu0 %v3231_v30  ;;  %1013 = vmatpush.msrb.mxu1 %v3234_v21 }
 0x38e   :  { %994 = vmatpush.msrb.mxu0 %v3237_v39  ;;  %1014 = vmatpush.msrb.mxu1 %v3240_v14 }
 0x38f   :  { %2266 = vmatmul.msk.f32.vlgmr.msra.gmra.mxu0 %vm136_vm8, %v821_v23  ;;  %2267 = vmatmul.msk.f32.vlgmr.msra.gmra.mxu1 %vm136_vm8, %v821_v23 }
 0x390   :  { %995 = vmatpush.msrb.mxu0 %v3245_v42  ;;  %1015 = vmatpush.msrb.mxu1 %v3248_v15 }
 0x392   :  { %996 = vmatpush.msrb.mxu0 %v3251_v27  ;;  %1016 = vmatpush.msrb.mxu1 %v3254_v17 }
 0x394   :  { %997 = vmatpush.msrb.mxu0 %v3257_v48  ;;  %1017 = vmatpush.msrb.mxu1 %v3260_v59 }
 0x396   :  { %998 = vmatpush.msrb.mxu0 %v3263_v33  ;;  %1018 = vmatpush.msrb.mxu1 %v3266_v2 }
 0x397   :  { %2273 = vmatmul.msk.f32.vlgmr.msrb.gmra.mxu0 %vm136_vm8, %v821_v23  ;;  %2274 = vmatmul.msk.f32.vlgmr.msrb.gmra.mxu1 %vm136_vm8, %v821_v23 }
 0x398   :  { %1175 = vmatpush.msra.mxu0 %v3271_v3  ;;  %1195 = vmatpush.msra.mxu1 %v3274_v5 }
 0x39a   :  { %1176 = vmatpush.msra.mxu0 %v3277_v6  ;;  %1196 = vmatpush.msra.mxu1 %v3280_v35 }
 0x39c   :  { %1177 = vmatpush.msra.mxu0 %v3283_v41  ;;  %1197 = vmatpush.msra.mxu1 %v3286_v9 }
 0x39e   :  { %1178 = vmatpush.msra.mxu0 %v3289_v7  ;;  %1198 = vmatpush.msra.mxu1 %v3292_v10 }
 0x3a0   :  { %1179 = vmatpush.msra.mxu0 %v3295_v24  ;;  %1199 = vmatpush.msra.mxu1 %v3298_v54 }
 0x3a2   :  { %1180 = vmatpush.msra.mxu0 %v3301_v19  ;;  %1200 = vmatpush.msra.mxu1 %v3304_v62 }
 0x3a4   :  { %1181 = vmatpush.msra.mxu0 %v3307_v0  ;;  %1201 = vmatpush.msra.mxu1 %v3310_v25 }
 0x3a6   :  { %1182 = vmatpush.msra.mxu0 %v2950_v36  ;;  %1202 = vmatpush.msra.mxu1 %v2954_v37  ;;  %v961_v36 = vpop.permute.xlu1 %960 }
 0x3a8   :  { %1335 = vmatpush.msrb.mxu0 %v2956_v38  ;;  %1355 = vmatpush.msrb.mxu1 %v2960_v40  ;;  %v963_v38 = vmul.f32 %v961_v36, %v3856_v22  ;;  %v969_v40 = vpop.permute.xlu2 %968 }
 0x3aa   :  { %1336 = vmatpush.msrb.mxu0 %v2966_v44  ;;  %1356 = vmatpush.msrb.mxu1 %v2972_v49  ;;  %v965_v44 = vadd.f32 %v963_v38, %v2866_v28 }
 0x3ac   :  { %1337 = vmatpush.msrb.mxu0 %v2975_v53  ;;  %1357 = vmatpush.msrb.mxu1 %v2980_v57  ;;  %v971_v57 = vmul.f32 %v969_v40, %v3857_v45 }
 0x3ae   :  { %1338 = vmatpush.msrb.mxu0 %v2984_v63  ;;  %1358 = vmatpush.msrb.mxu1 %v2988_v26  ;;  %v977_v26 = vpop.permute.xlu0 %976 }
 0x3b0   :  { %1339 = vmatpush.msrb.mxu0 %v3848_v12  ;;  %1359 = vmatpush.msrb.mxu1 %v3849_v50  ;;  %v973_v50 = vadd.f32 %v971_v57, %v965_v44 }
 0x3b2   :  { %1340 = vmatpush.msrb.mxu0 %v3850_v51  ;;  %1360 = vmatpush.msrb.mxu1 %v3851_v52  ;;  %v979_v51 = vmul.f32 %v977_v26, %v2872_v34 }
 0x3b4   :  { %1341 = vmatpush.msrb.mxu0 %v3852_v56  ;;  %1361 = vmatpush.msrb.mxu1 %v3853_v58  ;;  %v981_v56 = vadd.f32 %v979_v51, %v973_v50 }
 0x3b6   :  { %1342 = vmatpush.msrb.mxu0 %v3854_v60  ;;  %1362 = vmatpush.msrb.mxu1 %v3855_v61 }
 0x404   :  { %v682_v37 = vpop.f32.mrf.mxu0  ;;  %v702_v52 = vpop.f32.mrf.mxu1 }
 0x405   :  { %v683_v49 = vadd.f32 %v682_v37, %v3108_v16  ;;  %v964_v37 = vmul.f32 %v961_v36, %v2880_v43 }
 0x40c   :  { %v842_v53 = vpop.f32.mrf.mxu0  ;;  %v862_v38 = vpop.f32.mrf.mxu1 }
 0x40d   :  { %v843_v63 = vadd.f32 %v842_v53, %v683_v49  ;;  %v966_v49 = vadd.f32 %v964_v37, %v2884_v47  ;;  %v703_v53 = vadd.f32 %v702_v52, %v3114_v31 }
 0x40f   :  { %v2268_v12 = vmul.f32 -1.442695, %v843_v63  ;;  %v972_v63 = vmul.f32 %v969_v40, %v3858_v18 }
 0x411   :  { %2413 = vpow2.f32 %v2268_v12  ;;  %v863_v12 = vadd.f32 %v862_v38, %v703_v53 }
 0x414   :  { %v1000_v58 = vpop.f32.mrf.mxu0 }
 0x415   :  { %v1023_v60 = vadd.f32 %v1000_v58, %v981_v56  ;;  %v974_v56 = vadd.f32 %v972_v63, %v966_v49 }
 0x417   :  { %v2414_v61 = vpop.eup %2413  ;;  %v2275_v23 = vmul.f32 -1.442695, %v1023_v60  ;;  %v980_v60 = vmul.f32 %v977_v26, %v3859_v46 }
 0x418   :  { %v871_v11 = vadd.f32 1.0, %v2414_v61  ;;  %v1020_v61 = vpop.f32.mrf.mxu1 }
 0x419   :  { %2415 = vpow2.f32 %v2275_v23  ;;  %v982_v55 = vadd.f32 %v980_v60, %v974_v56 }
 0x41a   :  { %2417 = vrcp.f32 %v871_v11  ;;  %v884_v36 = vand.u32 2147483648, %v871_v11  ;;  %v882_v37 = vand.u32 2147483647, %v871_v11  ;;  %vm878_vm12 = vweird.f32 %v871_v11 }
 0x41b   :  { %v1024_v47 = vadd.f32 %v1020_v61, %v982_v55 }
 0x41c   :  { %v885_v40 = vor.u32 1.1754944e-38, %v884_v36  ;;  %vm883_vm14 = vcmp.eq.f32.partialorder %v882_v37, 8.507059e+37 }
 0x41d   :  { %v2276_v37 = vmul.f32 -1.442695, %v1024_v47 }
 0x41f   :  { %v2416_v44 = vpop.eup %2415 }
 0x420   :  { %v2418_v57 = vpop.eup %2417  ;;  %v1031_v50 = vadd.f32 1.0, %v2416_v44 }
 0x421   :  { %v874_v51 = vmul.f32 %v2418_v57, %v871_v11  ;;  %vm879_vm11 = vweird.f32 %v2418_v57 }
 0x422   :  { %2419 = vrcp.f32 %v1031_v50  ;;  %vm880_vm13 = vmor %vm878_vm12, %vm879_vm11  ;;  %v1042_v56 = vand.u32 2147483647, %v1031_v50  ;;  %vm1038_vm0 = vweird.f32 %v1031_v50 }
 0x423   :  { %v875_v58 = vsub.f32 1.0, %v874_v51  ;;  %2421 = vtanh.f32 %v863_v12  ;;  %v1044_v51 = vand.u32 2147483648, %v1031_v50 }
 0x424   :  { %2423 = vtanh.f32 %v1024_v47  ;;  %vm1043_vm2 = vcmp.eq.f32.partialorder %v1042_v56, 8.507059e+37 }
 0x425   :  { %v876_v23 = vmul.f32 %v2418_v57, %v875_v58  ;;  %v1045_v11 = vor.u32 1.1754944e-38, %v1044_v51 }
 0x427   :  { %v877_v52 = vadd.f32 %v2418_v57, %v876_v23  ;;  %v2269_v23 = vmul.f32 -1.442695, %v863_v12 }
 0x428   :  { %v2420_v31 = vpop.eup %2419 }
 0x429   :  { %v1034_v38 = vmul.f32 %v2420_v31, %v1031_v50  ;;  %v881_v53 = vsel %vm880_vm13, %v2418_v57, %v877_v52  ;;  %v2422_v49 = vpop.eup %2421  ;;  %vm1039_vm15 = vweird.f32 %v2420_v31  ;;  %2425 = vpow2.f32 %v2269_v23 }
 0x42a   :  { %v886_v44 = vsel %vm883_vm14, %v885_v40, %v881_v53  ;;  %vm1040_vm1 = vmor %vm1038_vm0, %vm1039_vm15  ;;  %v2424_v36 = vpop.eup %2423  ;;  %2427 = vpow2.f32 %v2276_v37 }
 0x42b   :  { %v905_v63 = vmul.f32 %v2422_v49, %v886_v44  ;;  %v1035_v26 = vsub.f32 1.0, %v1034_v38  ;;  %v904_v47 = vmul.f32 %v886_v44, %v3210_v1 }
 0x42d   :  { %907 = vrot.lane.b32.xlu1 %v905_v63, %s2738_s29  ;;  %v1036_v58 = vmul.f32 %v2420_v31, %v1035_v26  ;;  %v2283_v26 = vld [vmem:[%s3731_s0 + $0x8] sm:$0x3] }
 0x42e   :  { %1211 = vperm.xlu0 %2345, %v2283_v26  }
 0x42f   :  { %v1037_v60 = vadd.f32 %v2420_v31, %v1036_v58  ;;  %v2426_v52 = vpop.eup %2425 }
 0x430   :  { %v872_v40 = vadd.f32 1.0, %v2426_v52  ;;  %v2428_v38 = vpop.eup %2427 }
 0x431   :  { %v1041_v55 = vsel %vm1040_vm1, %v2420_v31, %v1037_v60  ;;  %v1032_v53 = vadd.f32 1.0, %v2428_v38 }
 0x432   :  { %v1046_v57 = vsel %vm1043_vm2, %v1045_v11, %v1041_v55  ;;  %2429 = vrcp.f32 %v872_v40  ;;  %v899_v23 = vand.u32 2147483648, %v872_v40  ;;  %vm893_vm4 = vweird.f32 %v872_v40 }
 0x433   :  { %v1065_v61 = vmul.f32 %v2424_v36, %v1046_v57  ;;  %2431 = vrcp.f32 %v1032_v53  ;;  %v3352_v36 = vld [vmem:[%s3731_s0 + $0xa] sm:$0x3]  ;;  %v897_v37 = vand.u32 2147483647, %v872_v40  ;;  %vm1053_vm9 = vweird.f32 %v1032_v53 }
 0x434   :  { %v900_v38 = vor.u32 1.1754944e-38, %v899_v23  ;;  %v3418_v23 = vld [vmem:[#allocation5 + $0x58] sm:$0xff] }
 0x435   :  { %1067 = vrot.lane.b32.xlu2 %v1065_v61, %s2738_s29  ;;  %1219 = vperm.xlu1 %2346, %v2283_v26   ;;  %v1064_v61 = vmul.f32 %v1046_v57, %v3214_v4  ;;  %vm898_vm6 = vcmp.eq.f32.partialorder %v897_v37, 8.507059e+37  ;;  %v1059_v57 = vand.u32 2147483648, %v1032_v53  ;;  %3864 = vst [vmem:[#allocation14_spill] sm:$0xff] %v3418_v23  ;;  %v3421_v37 = vld [vmem:[#allocation5 + $0x40] sm:$0xff] }
 0x436   :  { %1462 = vperm.xlu0 %2345, %v3352_v36   ;;  %3865 = vst [vmem:[#allocation15_spill] sm:$0xff] %v3421_v37 }
 0x438   :  { %v2430_v49 = vpop.eup %2429 }
 0x439   :  { %v889_v50 = vmul.f32 %v2430_v49, %v872_v40  ;;  %v2432_v31 = vpop.eup %2431  ;;  %vm894_vm3 = vweird.f32 %v2430_v49 }
 0x43a   :  { %v1049_v12 = vmul.f32 %v2432_v31, %v1032_v53  ;;  %vm895_vm5 = vmor %vm893_vm4, %vm894_vm3  ;;  %vm1054_vm7 = vweird.f32 %v2432_v31 }
 0x43b   :  { %v890_v63 = vsub.f32 1.0, %v889_v50  ;;  %vm1055_vm10 = vmor %vm1053_vm9, %vm1054_vm7 }
 0x43c   :  { %v1050_v60 = vsub.f32 1.0, %v1049_v12  ;;  %v1057_v12 = vand.u32 2147483647, %v1032_v53 }
 0x43d   :  { %v891_v51 = vmul.f32 %v2430_v49, %v890_v63  ;;  %1227 = vperm.xlu2 %2347, %v2283_v26  }
 0x43e   :  { %v1051_v44 = vmul.f32 %v2432_v31, %v1050_v60  ;;  %2349 = vset.pattern.permute.xlu0 %v3860_v29  ;;  %vm1058_vm11 = vcmp.eq.f32.partialorder %v1057_v12, 8.507059e+37  ;;  %v3397_v29 = vld [vmem:[#allocation7] sm:$0xff]  ;;  %v3406_v60 = vld [vmem:[#allocation5 + $0x78] sm:$0xff]  ;;  %v3448_v12 = vld [vmem:[#allocation5 + $0x8] sm:$0xff] }
 0x43f   :  { %v892_v55 = vadd.f32 %v2430_v49, %v891_v51  ;;  %v1060_v51 = vor.u32 1.1754944e-38, %v1059_v57  ;;  %v3445_v57 = vld [vmem:[#allocation5] sm:$0xff]  ;;  %3874 = vst [vmem:[#allocation31_spill] sm:$0xff] %v3448_v12 }
 0x440   :  { %v1052_v26 = vadd.f32 %v2432_v31, %v1051_v44  ;;  %v3424_v44 = vld [vmem:[#allocation5 + $0x48] sm:$0xff]  ;;  %3873 = vst [vmem:[#allocation30_spill] sm:$0xff] %v3445_v57 }
 0x441   :  { %v896_v52 = vsel %vm895_vm5, %v2430_v49, %v892_v55  ;;  %v3412_v55 = vld [vmem:[#allocation5 + $0x68] sm:$0xff]  ;;  %3866 = vst [vmem:[#allocation16_spill] sm:$0xff] %v3424_v44 }
 0x442   :  { %v901_v63 = vsel %vm898_vm6, %v900_v38, %v896_v52  ;;  %v1056_v40 = vsel %vm1055_vm10, %v2432_v31, %v1052_v26  ;;  %v3400_v31 = vld [vmem:[#allocation7 + $0x8] sm:$0xff]  ;;  %3862 = vst [vmem:[#allocation12_spill] sm:$0xff] %v3412_v55  ;;  %v3427_v52 = vld [vmem:[#allocation5 + $0x30] sm:$0xff]  ;;  %v3430_v38 = vld [vmem:[#allocation5 + $0x38] sm:$0xff] }
 0x443   :  { %v1061_v53 = vsel %vm1058_vm11, %v1060_v51, %v1056_v40  ;;  %3867 = vst [vmem:[#allocation17_spill] sm:$0xff] %v3427_v52  ;;  %v3439_v26 = vld [vmem:[#allocation5 + $0x10] sm:$0xff] }
 0x444   :  { %3868 = vst [vmem:[#allocation18_spill] sm:$0xff] %v3430_v38 }
 0x445   :  { %3871 = vst [vmem:[#allocation28_spill] sm:$0xff] %v3439_v26 }
 0x48f   :  { %v1068_v11 = vpop.permute.xlu2 %1067 }
 0x490   :  { %v3356_v1 = vadd.f32 %v1068_v11, %v1064_v61  ;;  %v3409_v11 = vld [vmem:[#allocation5 + $0x60] sm:$0xff]  ;;  %v3415_v61 = vld [vmem:[#allocation5 + $0x50] sm:$0xff] }
 0x491   :  { %3863 = vst [vmem:[#allocation13_spill] sm:$0xff] %v3415_v61 }
 0x49f   :  { %v908_v58 = vpop.permute.xlu1 %907 }
 0x4a0   :  { %v3347_v56 = vadd.f32 %v908_v58, %v904_v47  ;;  %v3403_v58 = vld [vmem:[#allocation5 + $0x70] sm:$0xff]  ;;  %v1212_v40 = vpop.permute.xlu0 %1211 }
 0x4a1   :  { %v1214_v51 = vmul.f32 %v1212_v40, %v3856_v22 }
 0x4a2   :  { %2433 = vtanh.f32 %v3347_v56 }
 0x4a3   :  { %2435 = vtanh.f32 %v3356_v1 }
 0x4a8   :  { %v2434_v50 = vpop.eup %2433 }
 0x4a9   :  { %v912_v4 = vmul.f32 %v2434_v50, %v901_v63  ;;  %v2436_v49 = vpop.eup %2435  ;;  %v3433_v50 = vld [vmem:[#allocation5 + $0x20] sm:$0xff]  ;;  %v3436_v63 = vld [vmem:[#allocation5 + $0x28] sm:$0xff] }
 0x4aa   :  { %v1072_v47 = vmul.f32 %v2436_v49, %v1061_v53  ;;  %3869 = vst [vmem:[#allocation26_spill] sm:$0xff] %v3433_v50  ;;  %v1220_v53 = vpop.permute.xlu1 %1219 }
 0x4ab   :  { %2270 = vmatmul.msk.f32.vlgmr.msra.gmra.mxu2 %vm136_vm8, %v912_v4  ;;  %2271 = vmatmul.msk.f32.vlgmr.msra.gmra.mxu3 %vm136_vm8, %v912_v4  ;;  %3870 = vst [vmem:[#allocation27_spill] sm:$0xff] %v3436_v63  ;;  %v3442_v4 = vld [vmem:[#allocation5 + $0x18] sm:$0xff] }
 0x4ac   :  { %1242 = vmatpush.msra.mxu2 %v3219_v32  ;;  %1262 = vmatpush.msra.mxu3 %v3222_v13  ;;  %3872 = vst [vmem:[#allocation29_spill] sm:$0xff] %v3442_v4 }
 0x4ae   :  { %1243 = vmatpush.msra.mxu2 %v3225_v20  ;;  %1263 = vmatpush.msra.mxu3 %v3228_v8 }
 0x4b0   :  { %1244 = vmatpush.msra.mxu2 %v3231_v30  ;;  %1264 = vmatpush.msra.mxu3 %v3234_v21 }
 0x4b2   :  { %1245 = vmatpush.msra.mxu2 %v3237_v39  ;;  %1265 = vmatpush.msra.mxu3 %v3240_v14 }
 0x4b3   :  { %2277 = vmatmul.msk.f32.vlgmr.msrb.gmra.mxu2 %vm136_vm8, %v1072_v47  ;;  %2278 = vmatmul.msk.f32.vlgmr.msrb.gmra.mxu3 %vm136_vm8, %v1072_v47 }
 0x4b4   :  { %1246 = vmatpush.msra.mxu2 %v3245_v42  ;;  %1266 = vmatpush.msra.mxu3 %v3248_v15 }
 0x4b6   :  { %1247 = vmatpush.msra.mxu2 %v3251_v27  ;;  %1267 = vmatpush.msra.mxu3 %v3254_v17 }
 0x4b8   :  { %1248 = vmatpush.msra.mxu2 %v3257_v48  ;;  %1268 = vmatpush.msra.mxu3 %v3260_v59 }
 0x4ba   :  { %1249 = vmatpush.msra.mxu2 %v3263_v33  ;;  %1269 = vmatpush.msra.mxu3 %v3266_v2 }
 0x4bb   :  { %2284 = vmatmul.msk.f32.vlgmr.msra.gmra.mxu2 %vm136_vm8, %v1072_v47  ;;  %2285 = vmatmul.msk.f32.vlgmr.msra.gmra.mxu3 %vm136_vm8, %v1072_v47  ;;  %v1216_v47 = vadd.f32 %v1214_v51, %v2866_v28  ;;  %v1215_v51 = vmul.f32 %v1212_v40, %v2880_v43 }
 0x4bc   :  { %1426 = vmatpush.msrb.mxu2 %v3271_v3  ;;  %1446 = vmatpush.msrb.mxu3 %v3274_v5 }
 0x4be   :  { %1427 = vmatpush.msrb.mxu2 %v3277_v6  ;;  %1447 = vmatpush.msrb.mxu3 %v3280_v35 }
 0x4c0   :  { %1428 = vmatpush.msrb.mxu2 %v3283_v41  ;;  %1448 = vmatpush.msrb.mxu3 %v3286_v9 }
 0x4c2   :  { %1429 = vmatpush.msrb.mxu2 %v3289_v7  ;;  %1449 = vmatpush.msrb.mxu3 %v3292_v10 }
 0x4c4   :  { %1430 = vmatpush.msrb.mxu2 %v3295_v24  ;;  %1450 = vmatpush.msrb.mxu3 %v3298_v54 }
 0x4c6   :  { %1431 = vmatpush.msrb.mxu2 %v3301_v19  ;;  %1451 = vmatpush.msrb.mxu3 %v3304_v62 }
 0x4c8   :  { %1432 = vmatpush.msrb.mxu2 %v3307_v0  ;;  %1452 = vmatpush.msrb.mxu3 %v3310_v25 }
 0x4ca   :  { %1433 = vmatpush.msrb.mxu2 %v3397_v29  ;;  %1453 = vmatpush.msrb.mxu3 %v3400_v31 }
 0x4cc   :  { %1586 = vmatpush.msra.mxu2 %v3403_v58  ;;  %1606 = vmatpush.msra.mxu3 %v3406_v60 }
 0x4ce   :  { %1587 = vmatpush.msra.mxu2 %v3409_v11  ;;  %1607 = vmatpush.msra.mxu3 %v3412_v55 }
 0x4d0   :  { %1588 = vmatpush.msra.mxu2 %v3415_v61  ;;  %1608 = vmatpush.msra.mxu3 %v3418_v23 }
 0x4d2   :  { %1589 = vmatpush.msra.mxu2 %v3421_v37  ;;  %1609 = vmatpush.msra.mxu3 %v3424_v44 }
 0x4d4   :  { %1590 = vmatpush.msra.mxu2 %v3427_v52  ;;  %1610 = vmatpush.msra.mxu3 %v3430_v38 }
 0x4d6   :  { %1591 = vmatpush.msra.mxu2 %v3433_v50  ;;  %1611 = vmatpush.msra.mxu3 %v3436_v63  ;;  %v1228_v63 = vpop.permute.xlu2 %1227 }
 0x4d8   :  { %1592 = vmatpush.msra.mxu2 %v3439_v26  ;;  %1612 = vmatpush.msra.mxu3 %v3442_v4  ;;  %v1222_v26 = vmul.f32 %v1220_v53, %v3857_v45 }
 0x4da   :  { %1593 = vmatpush.msra.mxu2 %v3445_v57  ;;  %1613 = vmatpush.msra.mxu3 %v3448_v12  ;;  %v1224_v52 = vadd.f32 %v1222_v26, %v1216_v47  ;;  %v1230_v57 = vmul.f32 %v1228_v63, %v2872_v34  ;;  %v3876_v26 = vld [vmem:[#allocation35_spill] sm:$0xff] }
 0x4dc   :  { %v1232_v12 = vadd.f32 %v1230_v57, %v1224_v52 }
 0x52e   :  { %v933_v49 = vpop.f32.mrf.mxu2  ;;  %v953_v37 = vpop.f32.mrf.mxu3 }
 0x52f   :  { %v934_v4 = vadd.f32 %v933_v49, %v3108_v16  ;;  %v3875_v49 = vld [vmem:[#allocation23_spill] sm:$0xff] }
 0x530   :  { %v1217_v16 = vadd.f32 %v1215_v51, %v3875_v49 }
 0x536   :  { %v1093_v50 = vpop.f32.mrf.mxu2  ;;  %v1113_v45 = vpop.f32.mrf.mxu3 }
 0x537   :  { %v1094_v38 = vadd.f32 %v1093_v50, %v934_v4  ;;  %v1223_v50 = vmul.f32 %v1220_v53, %v3858_v18  ;;  %v954_v4 = vadd.f32 %v953_v37, %v3876_v26 }
 0x539   :  { %v2279_v44 = vmul.f32 -1.442695, %v1094_v38  ;;  %v1225_v52 = vadd.f32 %v1223_v50, %v1217_v16 }
 0x53b   :  { %2437 = vpow2.f32 %v2279_v44  ;;  %v1114_v44 = vadd.f32 %v1113_v45, %v954_v4 }
 0x53e   :  { %v1251_v23 = vpop.f32.mrf.mxu2  ;;  %v1271_v40 = vpop.f32.mrf.mxu3 }
 0x53f   :  { %v1274_v61 = vadd.f32 %v1251_v23, %v1232_v12  ;;  %v1231_v23 = vmul.f32 %v1228_v63, %v3859_v46 }
 0x541   :  { %v2438_v22 = vpop.eup %2437  ;;  %v2286_v55 = vmul.f32 -1.442695, %v1274_v61 }
 0x542   :  { %v1122_v28 = vadd.f32 1.0, %v2438_v22  ;;  %v1233_v22 = vadd.f32 %v1231_v23, %v1225_v52 }
 0x543   :  { %2439 = vpow2.f32 %v2286_v55 }
 0x544   :  { %2441 = vrcp.f32 %v1122_v28  ;;  %v1135_v55 = vand.u32 2147483648, %v1122_v28  ;;  %v1133_v51 = vand.u32 2147483647, %v1122_v28  ;;  %vm1129_vm13 = vweird.f32 %v1122_v28 }
 0x545   :  { %v1275_v49 = vadd.f32 %v1271_v40, %v1233_v22 }
 0x546   :  { %v1136_v45 = vor.u32 1.1754944e-38, %v1135_v55  ;;  %vm1134_vm15 = vcmp.eq.f32.partialorder %v1133_v51, 8.507059e+37  ;;  %v3877_v51 = vmov 2  }
 0x549   :  { %v2440_v38 = vpop.eup %2439 }
 0x54a   :  { %v2442_v47 = vpop.eup %2441  ;;  %v1282_v57 = vadd.f32 1.0, %v2440_v38 }
 0x54b   :  { %v1125_v61 = vmul.f32 %v2442_v47, %v1122_v28  ;;  %vm1130_vm12 = vweird.f32 %v2442_v47 }
 0x54c   :  { %2443 = vrcp.f32 %v1282_v57  ;;  %vm1131_vm14 = vmor %vm1129_vm13, %vm1130_vm12  ;;  %v1295_v52 = vand.u32 2147483648, %v1282_v57  ;;  %vm1289_vm1 = vweird.f32 %v1282_v57 }
 0x54d   :  { %v1126_v12 = vsub.f32 1.0, %v1125_v61  ;;  %2445 = vtanh.f32 %v1114_v44 }
 0x54e   :  { %2447 = vtanh.f32 %v1275_v49  ;;  %v1296_v28 = vor.u32 1.1754944e-38, %v1295_v52 }
 0x54f   :  { %v1127_v43 = vmul.f32 %v2442_v47, %v1126_v12  ;;  %v1293_v12 = vand.u32 2147483647, %v1282_v57 }
 0x551   :  { %v1128_v53 = vadd.f32 %v2442_v47, %v1127_v43  ;;  %vm1294_vm3 = vcmp.eq.f32.partialorder %v1293_v12, 8.507059e+37 }
 0x552   :  { %v2444_v37 = vpop.eup %2443 }
 0x553   :  { %v1285_v16 = vmul.f32 %v2444_v37, %v1282_v57  ;;  %v1132_v50 = vsel %vm1131_vm14, %v2442_v47, %v1128_v53  ;;  %v2446_v63 = vpop.eup %2445  ;;  %vm1290_vm0 = vweird.f32 %v2444_v37  ;;  %v3878_v53 = vmov 0  }
 0x554   :  { %v1137_v4 = vsel %vm1134_vm15, %v1136_v45, %v1132_v50  ;;  %vm1291_vm2 = vmor %vm1289_vm1, %vm1290_vm0  ;;  %v2448_v55 = vpop.eup %2447  ;;  %v2280_v45 = vmul.f32 -1.442695, %v1114_v44  ;;  %v2287_v57 = vmul.f32 -1.442695, %v1275_v49 }
 0x555   :  { %v1156_v38 = vmul.f32 %v2446_v63, %v1137_v4  ;;  %v1286_v61 = vsub.f32 1.0, %v1285_v16 }
 0x556   :  { %2449 = vpow2.f32 %v2280_v45 }
 0x557   :  { %1158 = vrot.lane.b32.xlu1 %v1156_v38, %s2738_s29  ;;  %v1287_v23 = vmul.f32 %v2444_v37, %v1286_v61  ;;  %2451 = vpow2.f32 %v2287_v57 }
 0x559   :  { %v1288_v43 = vadd.f32 %v2444_v37, %v1287_v23 }
 0x55b   :  { %v1292_v22 = vsel %vm1291_vm2, %v2444_v37, %v1288_v43  ;;  %v1155_v43 = vmul.f32 %v1137_v4, %v3347_v56 }
 0x55c   :  { %v1297_v47 = vsel %vm1294_vm3, %v1296_v28, %v1292_v22  ;;  %v2450_v16 = vpop.eup %2449 }
 0x55d   :  { %v1316_v40 = vmul.f32 %v2448_v55, %v1297_v47  ;;  %v1123_v37 = vadd.f32 1.0, %v2450_v16  ;;  %v2452_v50 = vpop.eup %2451 }
 0x55e   :  { %v1283_v63 = vadd.f32 1.0, %v2452_v50 }
 0x55f   :  { %1318 = vrot.lane.b32.xlu2 %v1316_v40, %s2738_s29  ;;  %1470 = vperm.xlu1 %2346, %v3352_v36   ;;  %2453 = vrcp.f32 %v1123_v37  ;;  %v1315_v40 = vmul.f32 %v1297_v47, %v3356_v1  ;;  %vm1144_vm5 = vweird.f32 %v1123_v37  ;;  %v1148_v45 = vand.u32 2147483647, %v1123_v37 }
 0x560   :  { %2455 = vrcp.f32 %v1283_v63  ;;  %v1310_v1 = vand.u32 2147483648, %v1283_v63  ;;  %vm1304_vm10 = vweird.f32 %v1283_v63  ;;  %v1308_v47 = vand.u32 2147483647, %v1283_v63 }
 0x561   :  { %vm1149_vm7 = vcmp.eq.f32.partialorder %v1148_v45, 8.507059e+37 }
 0x562   :  { %vm1309_vm12 = vcmp.eq.f32.partialorder %v1308_v47, 8.507059e+37 }
 0x565   :  { %v2454_v38 = vpop.eup %2453 }
 0x566   :  { %v1140_v61 = vmul.f32 %v2454_v38, %v1123_v37  ;;  %v2456_v23 = vpop.eup %2455  ;;  %vm1145_vm4 = vweird.f32 %v2454_v38 }
 0x567   :  { %1478 = vperm.xlu2 %2347, %v3352_v36   ;;  %2350 = vset.pattern.permute.xlu1 %v3877_v51  ;;  %v1300_v12 = vmul.f32 %v2456_v23, %v1283_v63  ;;  %vm1146_vm6 = vmor %vm1144_vm5, %vm1145_vm4  ;;  %vm1305_vm9 = vweird.f32 %v2456_v23 }
 0x568   :  { %v1141_v52 = vsub.f32 1.0, %v1140_v61  ;;  %vm1306_vm11 = vmor %vm1304_vm10, %vm1305_vm9 }
 0x569   :  { %v1301_v44 = vsub.f32 1.0, %v1300_v12 }
 0x56a   :  { %v1142_v36 = vmul.f32 %v2454_v38, %v1141_v52 }
 0x56b   :  { %v1302_v16 = vmul.f32 %v2456_v23, %v1301_v44 }
 0x56c   :  { %v1143_v55 = vadd.f32 %v2454_v38, %v1142_v36  ;;  %v1311_v36 = vor.u32 1.1754944e-38, %v1310_v1 }
 0x56d   :  { %v1303_v52 = vadd.f32 %v2456_v23, %v1302_v16  ;;  %v3896_v16 = vld [vmem:[#allocation22_spill] sm:$0xff] }
 0x56e   :  { %v1147_v50 = vsel %vm1146_vm6, %v2454_v38, %v1143_v55 }
 0x56f   :  { %2348 = vset.pattern.permute.xlu2 %v3878_v53  ;;  %v1150_v53 = vand.u32 2147483648, %v1123_v37  ;;  %v1307_v37 = vsel %vm1306_vm11, %v2456_v23, %v1303_v52 }
 0x571   :  { %v1151_v56 = vor.u32 1.1754944e-38, %v1150_v53 }
 0x573   :  { %v1152_v61 = vsel %vm1149_vm7, %v1151_v56, %v1147_v50 }
 0x5b9   :  { %v1319_v49 = vpop.permute.xlu2 %1318 }
 0x5ba   :  { %v3472_v57 = vadd.f32 %v1319_v49, %v1315_v40 }
 0x5c9   :  { %v1159_v28 = vpop.permute.xlu1 %1158 }
 0x5ca   :  { %v3468_v22 = vadd.f32 %v1159_v28, %v1155_v43  ;;  %v1312_v43 = vsel %vm1309_vm12, %v1311_v36, %v1307_v37 }
 0x5cc   :  { %2457 = vtanh.f32 %v3468_v22 }
 0x5cd   :  { %2459 = vtanh.f32 %v3472_v57 }
 0x5d2   :  { %v2458_v4 = vpop.eup %2457 }
 0x5d3   :  { %v1163_v12 = vmul.f32 %v2458_v4, %v1152_v61  ;;  %v2460_v38 = vpop.eup %2459 }
 0x5d4   :  { %v1323_v63 = vmul.f32 %v2460_v38, %v1312_v43 }
 0x5d5   :  { %2281 = vmatmul.msk.f32.vlgmr.msra.gmra.mxu0 %vm136_vm8, %v1163_v12  ;;  %2282 = vmatmul.msk.f32.vlgmr.msra.gmra.mxu1 %vm136_vm8, %v1163_v12  ;;  %v3897_v12 = vld [vmem:[#allocation23_spill] sm:$0xff] }
 0x5d6   :  { %1493 = vmatpush.msra.mxu0 %v3219_v32  ;;  %1513 = vmatpush.msra.mxu1 %v3222_v13  ;;  %v3879_v32 = vld [vmem:[#allocation12_spill] sm:$0xff]  ;;  %v3880_v13 = vld [vmem:[#allocation13_spill] sm:$0xff] }
 0x5d8   :  { %1494 = vmatpush.msra.mxu0 %v3225_v20  ;;  %1514 = vmatpush.msra.mxu1 %v3228_v8  ;;  %v3881_v20 = vld [vmem:[#allocation14_spill] sm:$0xff]  ;;  %v3882_v8 = vld [vmem:[#allocation15_spill] sm:$0xff] }
 0x5da   :  { %1495 = vmatpush.msra.mxu0 %v3231_v30  ;;  %1515 = vmatpush.msra.mxu1 %v3234_v21  ;;  %v3883_v30 = vld [vmem:[#allocation16_spill] sm:$0xff]  ;;  %v3884_v21 = vld [vmem:[#allocation17_spill] sm:$0xff] }
 0x5dc   :  { %1496 = vmatpush.msra.mxu0 %v3237_v39  ;;  %1516 = vmatpush.msra.mxu1 %v3240_v14  ;;  %v3885_v39 = vld [vmem:[#allocation18_spill] sm:$0xff] }
 0x5dd   :  { %2288 = vmatmul.msk.f32.vlgmr.msrb.gmra.mxu0 %vm136_vm8, %v1323_v63  ;;  %2289 = vmatmul.msk.f32.vlgmr.msrb.gmra.mxu1 %vm136_vm8, %v1323_v63  ;;  %v3886_v14 = vld [vmem:[#allocation26_spill] sm:$0xff] }
 0x5de   :  { %1497 = vmatpush.msra.mxu0 %v3245_v42  ;;  %1517 = vmatpush.msra.mxu1 %v3248_v15  ;;  %v3887_v42 = vld [vmem:[#allocation27_spill] sm:$0xff]  ;;  %v3888_v15 = vld [vmem:[#allocation28_spill] sm:$0xff] }
 0x5e0   :  { %1498 = vmatpush.msra.mxu0 %v3251_v27  ;;  %1518 = vmatpush.msra.mxu1 %v3254_v17  ;;  %v3889_v27 = vld [vmem:[#allocation29_spill] sm:$0xff]  ;;  %v3890_v17 = vld [vmem:[#allocation30_spill] sm:$0xff] }
 0x5e2   :  { %1499 = vmatpush.msra.mxu0 %v3257_v48  ;;  %1519 = vmatpush.msra.mxu1 %v3260_v59  ;;  %v3891_v48 = vld [vmem:[#allocation31_spill] sm:$0xff] }
 0x5e4   :  { %1500 = vmatpush.msra.mxu0 %v3263_v33  ;;  %1520 = vmatpush.msra.mxu1 %v3266_v2  ;;  %v1463_v33 = vpop.permute.xlu0 %1462  ;;  %v1471_v2 = vpop.permute.xlu1 %1470 }
 0x5e5   :  { %2295 = vmatmul.msk.f32.vlgmr.msra.gmra.mxu0 %vm136_vm8, %v1323_v63  ;;  %2296 = vmatmul.msk.f32.vlgmr.msra.gmra.mxu1 %vm136_vm8, %v1323_v63  ;;  %v1466_v50 = vmul.f32 %v1463_v33, %v3896_v16  ;;  %v1474_v56 = vmul.f32 %v1471_v2, %v3858_v18 }
 0x5e6   :  { %1677 = vmatpush.msrb.mxu0 %v3271_v3  ;;  %1697 = vmatpush.msrb.mxu1 %v3274_v5  ;;  %v3892_v3 = vld [vmem:[#allocation19_spill] sm:$0xff] }
 0x5e7   :  { %v1465_v5 = vmul.f32 %v1463_v33, %v3892_v3  ;;  %v1468_v1 = vadd.f32 %v1466_v50, %v3897_v12 }
 0x5e8   :  { %1678 = vmatpush.msrb.mxu0 %v3277_v6  ;;  %1698 = vmatpush.msrb.mxu1 %v3280_v35  ;;  %v3893_v6 = vld [vmem:[#allocation21_spill] sm:$0xff] }
 0x5e9   :  { %v1473_v35 = vmul.f32 %v1471_v2, %v3893_v6  ;;  %v1476_v36 = vadd.f32 %v1474_v56, %v1468_v1 }
 0x5ea   :  { %1679 = vmatpush.msrb.mxu0 %v3283_v41  ;;  %1699 = vmatpush.msrb.mxu1 %v3286_v9  ;;  %v3894_v41 = vld [vmem:[#allocation34_spill] sm:$0xff] }
 0x5ec   :  { %1680 = vmatpush.msrb.mxu0 %v3289_v7  ;;  %1700 = vmatpush.msrb.mxu1 %v3292_v10  ;;  %v3895_v10 = vld [vmem:[#allocation20_spill] sm:$0xff] }
 0x5ee   :  { %1681 = vmatpush.msrb.mxu0 %v3295_v24  ;;  %1701 = vmatpush.msrb.mxu1 %v3298_v54  ;;  %v1467_v24 = vadd.f32 %v1465_v5, %v3895_v10 }
 0x5f0   :  { %1682 = vmatpush.msrb.mxu0 %v3301_v19  ;;  %1702 = vmatpush.msrb.mxu1 %v3304_v62  ;;  %v1479_v19 = vpop.permute.xlu2 %1478  ;;  %v1475_v62 = vadd.f32 %v1473_v35, %v1467_v24 }
 0x5f1   :  { %v1482_v63 = vmul.f32 %v1479_v19, %v3859_v46 }
 0x5f2   :  { %1683 = vmatpush.msrb.mxu0 %v3307_v0  ;;  %1703 = vmatpush.msrb.mxu1 %v3310_v25  ;;  %v1481_v25 = vmul.f32 %v1479_v19, %v2872_v34 }
 0x5f3   :  { %v1484_v35 = vadd.f32 %v1482_v63, %v1476_v36 }
 0x5f4   :  { %1684 = vmatpush.msrb.mxu0 %v3397_v29  ;;  %1704 = vmatpush.msrb.mxu1 %v3400_v31  ;;  %v1483_v28 = vadd.f32 %v1481_v25, %v1475_v62 }
 0x5f6   :  { %1837 = vmatpush.msra.mxu0 %v3403_v58  ;;  %1857 = vmatpush.msra.mxu1 %v3406_v60 }
 0x5f8   :  { %1838 = vmatpush.msra.mxu0 %v3409_v11  ;;  %1858 = vmatpush.msra.mxu1 %v3879_v32 }
 0x5fa   :  { %1839 = vmatpush.msra.mxu0 %v3880_v13  ;;  %1859 = vmatpush.msra.mxu1 %v3881_v20 }
 0x5fc   :  { %1840 = vmatpush.msra.mxu0 %v3882_v8  ;;  %1860 = vmatpush.msra.mxu1 %v3883_v30 }
 0x5fe   :  { %1841 = vmatpush.msra.mxu0 %v3884_v21  ;;  %1861 = vmatpush.msra.mxu1 %v3885_v39 }
 0x600   :  { %1842 = vmatpush.msra.mxu0 %v3886_v14  ;;  %1862 = vmatpush.msra.mxu1 %v3887_v42 }
 0x602   :  { %1843 = vmatpush.msra.mxu0 %v3888_v15  ;;  %1863 = vmatpush.msra.mxu1 %v3889_v27 }
 0x604   :  { %1844 = vmatpush.msra.mxu0 %v3890_v17  ;;  %1864 = vmatpush.msra.mxu1 %v3891_v48 }
 0x652   :  { %v1184_v59 = vpop.f32.mrf.mxu0  ;;  %v1204_v23 = vpop.f32.mrf.mxu1 }
 0x653   :  { %v1185_v9 = vadd.f32 %v1184_v59, %v3894_v41  ;;  %v1205_v4 = vadd.f32 %v1204_v23, %v3876_v26 }
 0x65a   :  { %v1344_v7 = vpop.f32.mrf.mxu0  ;;  %v1364_v45 = vpop.f32.mrf.mxu1 }
 0x65b   :  { %v1345_v54 = vadd.f32 %v1344_v7, %v1185_v9  ;;  %v1365_v47 = vadd.f32 %v1364_v45, %v1205_v4 }
 0x65d   :  { %v2290_v0 = vmul.f32 -1.442695, %v1345_v54 }
 0x65f   :  { %2461 = vpow2.f32 %v2290_v0 }
 0x662   :  { %v1502_v44 = vpop.f32.mrf.mxu0  ;;  %v1522_v5 = vpop.f32.mrf.mxu1 }
 0x663   :  { %v1525_v49 = vadd.f32 %v1502_v44, %v1483_v28  ;;  %v1526_v24 = vadd.f32 %v1522_v5, %v1484_v35 }
 0x665   :  { %v2462_v55 = vpop.eup %2461  ;;  %v2297_v40 = vmul.f32 -1.442695, %v1525_v49 }
 0x666   :  { %v1373_v53 = vadd.f32 1.0, %v2462_v55 }
 0x667   :  { %2463 = vpow2.f32 %v2297_v40 }
 0x668   :  { %2465 = vrcp.f32 %v1373_v53  ;;  %v1386_v59 = vand.u32 2147483648, %v1373_v53  ;;  %v1384_v2 = vand.u32 2147483647, %v1373_v53  ;;  %vm1380_vm14 = vweird.f32 %v1373_v53 }
 0x66a   :  { %v1387_v54 = vor.u32 1.1754944e-38, %v1386_v59  ;;  %vm1385_vm0 = vcmp.eq.f32.partialorder %v1384_v2, 8.507059e+37 }
 0x66d   :  { %v2464_v61 = vpop.eup %2463 }
 0x66e   :  { %v2466_v52 = vpop.eup %2465  ;;  %v1533_v37 = vadd.f32 1.0, %v2464_v61  ;;  %v2291_v61 = vmul.f32 -1.442695, %v1365_v47 }
 0x66f   :  { %v1376_v38 = vmul.f32 %v2466_v52, %v1373_v53  ;;  %vm1381_vm13 = vweird.f32 %v2466_v52 }
 0x670   :  { %2467 = vrcp.f32 %v1533_v37  ;;  %vm1382_vm15 = vmor %vm1380_vm14, %vm1381_vm13  ;;  %v1546_v44 = vand.u32 2147483648, %v1533_v37  ;;  %v1544_v55 = vand.u32 2147483647, %v1533_v37  ;;  %vm1540_vm2 = vweird.f32 %v1533_v37 }
 0x671   :  { %v1377_v43 = vsub.f32 1.0, %v1376_v38  ;;  %2469 = vtanh.f32 %v1365_v47 }
 0x672   :  { %2471 = vtanh.f32 %v1526_v24  ;;  %v1547_v53 = vor.u32 1.1754944e-38, %v1546_v44  ;;  %vm1545_vm4 = vcmp.eq.f32.partialorder %v1544_v55, 8.507059e+37 }
 0x673   :  { %v1378_v33 = vmul.f32 %v2466_v52, %v1377_v43  ;;  %2473 = vpow2.f32 %v2291_v61 }
 0x675   :  { %v1379_v9 = vadd.f32 %v2466_v52, %v1378_v33  ;;  %v2305_v33 = vld [vmem:[%s3731_s0 + $0xc] sm:$0x3] }
 0x676   :  { %v2468_v7 = vpop.eup %2467  ;;  %1713 = vperm.xlu2 %2348, %v2305_v33  }
 0x677   :  { %v1536_v62 = vmul.f32 %v2468_v7, %v1533_v37  ;;  %v1383_v0 = vsel %vm1382_vm15, %v2466_v52, %v1379_v9  ;;  %v2470_v25 = vpop.eup %2469  ;;  %vm1541_vm1 = vweird.f32 %v2468_v7  ;;  %v2298_v52 = vmul.f32 -1.442695, %v1526_v24 }
 0x678   :  { %v1388_v23 = vsel %vm1385_vm0, %v1387_v54, %v1383_v0  ;;  %vm1542_vm3 = vmor %vm1540_vm2, %vm1541_vm1  ;;  %v2472_v50 = vpop.eup %2471 }
 0x679   :  { %v1407_v28 = vmul.f32 %v2470_v25, %v1388_v23  ;;  %v1537_v19 = vsub.f32 1.0, %v1536_v62  ;;  %v2474_v1 = vpop.eup %2473  ;;  %2475 = vpow2.f32 %v2298_v52  ;;  %v1406_v35 = vmul.f32 %v1388_v23, %v3468_v22  ;;  %v3550_v62 = vld [vmem:[%s3731_s0 + $0xe] sm:$0x3] }
 0x67a   :  { %v1374_v38 = vadd.f32 1.0, %v2474_v1  ;;  %v3567_v1 = vld [vmem:[#allocation2 + $0x60] sm:$0xff] }
 0x67b   :  { %1409 = vrot.lane.b32.xlu0 %v1407_v28, %s2738_s29  ;;  %v1538_v49 = vmul.f32 %v2468_v7, %v1537_v19 }
 0x67c   :  { %2477 = vrcp.f32 %v1374_v38  ;;  %v1401_v0 = vand.u32 2147483648, %v1374_v38  ;;  %vm1395_vm6 = vweird.f32 %v1374_v38  ;;  %v1399_v25 = vand.u32 2147483647, %v1374_v38 }
 0x67d   :  { %v1539_v40 = vadd.f32 %v2468_v7, %v1538_v49 }
 0x67e   :  { %v1402_v28 = vor.u32 1.1754944e-38, %v1401_v0  ;;  %vm1400_vm9 = vcmp.eq.f32.partialorder %v1399_v25, 8.507059e+37  ;;  %v3608_v0 = vld [vmem:[#allocation2 + $0x8] sm:$0xff]  ;;  %v2613_v25 = vld [vmem:[#allocation7 + $0x70] sm:$0xff] }
 0x67f   :  { %v1543_v45 = vsel %vm1542_vm3, %v2468_v7, %v1539_v40  ;;  %v2476_v36 = vpop.eup %2475 }
 0x680   :  { %v1548_v56 = vsel %vm1545_vm4, %v1547_v53, %v1543_v45  ;;  %v1534_v43 = vadd.f32 1.0, %v2476_v36 }
 0x681   :  { %v1567_v4 = vmul.f32 %v2472_v50, %v1548_v56  ;;  %v1566_v19 = vmul.f32 %v1548_v56, %v3472_v57  ;;  %v3560_v57 = vld [vmem:[#allocation2 + $0x70] sm:$0xff]  ;;  %v3563_v56 = vld [vmem:[#allocation2 + $0x78] sm:$0xff] }
 0x682   :  { %v2478_v63 = vpop.eup %2477  ;;  %2479 = vrcp.f32 %v1534_v43  ;;  %v1561_v50 = vand.u32 2147483648, %v1534_v43  ;;  %vm1555_vm11 = vweird.f32 %v1534_v43 }
 0x683   :  { %1569 = vrot.lane.b32.xlu1 %v1567_v4, %s2738_s29  ;;  %v1391_v37 = vmul.f32 %v2478_v63, %v1374_v38  ;;  %1721 = vperm.xlu0 %2349, %v2305_v33   ;;  %vm1396_vm5 = vweird.f32 %v2478_v63  ;;  %v1559_v4 = vand.u32 2147483647, %v1534_v43  ;;  %v3570_v38 = vld [vmem:[#allocation2 + $0x68] sm:$0xff] }
 0x684   :  { %vm1397_vm7 = vmor %vm1395_vm6, %vm1396_vm5  ;;  %v1562_v52 = vor.u32 1.1754944e-38, %v1561_v50  ;;  %v2623_v50 = vld [vmem:[#allocation7 + $0x20] sm:$0xff] }
 0x685   :  { %v1392_v59 = vsub.f32 1.0, %v1391_v37  ;;  %vm1560_vm13 = vcmp.eq.f32.partialorder %v1559_v4, 8.507059e+37  ;;  %v3576_v37 = vld [vmem:[#allocation2 + $0x58] sm:$0xff]  ;;  %v2624_v4 = vld [vmem:[#allocation7 + $0x28] sm:$0xff] }
 0x687   :  { %v1393_v2 = vmul.f32 %v2478_v63, %v1392_v59  ;;  %v3579_v59 = vld [vmem:[#allocation2 + $0x40] sm:$0xff] }
 0x688   :  { %v2480_v5 = vpop.eup %2479 }
 0x689   :  { %v1551_v47 = vmul.f32 %v2480_v5, %v1534_v43  ;;  %v1394_v54 = vadd.f32 %v2478_v63, %v1393_v2  ;;  %vm1556_vm10 = vweird.f32 %v2480_v5  ;;  %v3593_v2 = vld [vmem:[#allocation2 + $0x20] sm:$0xff] }
 0x68a   :  { %vm1557_vm12 = vmor %vm1555_vm11, %vm1556_vm10 }
 0x68b   :  { %1729 = vperm.xlu1 %2350, %v2305_v33   ;;  %v1552_v24 = vsub.f32 1.0, %v1551_v47  ;;  %1972 = vperm.xlu0 %2349, %v3550_v62   ;;  %v1398_v22 = vsel %vm1397_vm7, %v2478_v63, %v1394_v54  ;;  %v3573_v63 = vld [vmem:[#allocation2 + $0x50] sm:$0xff]  ;;  %v3590_v47 = vld [vmem:[#allocation2 + $0x38] sm:$0xff]  ;;  %v3605_v54 = vld [vmem:[#allocation2] sm:$0xff] }
 0x68c   :  { %v1403_v55 = vsel %vm1400_vm9, %v1402_v28, %v1398_v22  ;;  %v3587_v33 = vld [vmem:[#allocation2 + $0x30] sm:$0xff]  ;;  %v2614_v22 = vld [vmem:[#allocation7 + $0x78] sm:$0xff]  ;;  %v2616_v28 = vld [vmem:[#allocation7 + $0x68] sm:$0xff] }
 0x68d   :  { %v1553_v23 = vmul.f32 %v2480_v5, %v1552_v24  ;;  %v3602_v24 = vld [vmem:[#allocation2 + $0x18] sm:$0xff] }
 0x68f   :  { %v1554_v45 = vadd.f32 %v2480_v5, %v1553_v23  ;;  %v2615_v23 = vld [vmem:[#allocation7 + $0x60] sm:$0xff] }
 0x691   :  { %v1558_v61 = vsel %vm1557_vm12, %v2480_v5, %v1554_v45  ;;  %v3582_v5 = vld [vmem:[#allocation2 + $0x48] sm:$0xff]  ;;  %v2622_v45 = vld [vmem:[#allocation7 + $0x38] sm:$0xff] }
 0x692   :  { %v1563_v43 = vsel %vm1560_vm13, %v1562_v52, %v1558_v61  ;;  %v2625_v61 = vld [vmem:[#allocation7 + $0x10] sm:$0xff]  ;;  %v2626_v52 = vld [vmem:[#allocation7 + $0x18] sm:$0xff] }
 0x693   :  { %2351 = vset.pattern.permute.xlu0 %v3877_v51 }
 0x6ed   :  { %v1410_v9 = vpop.permute.xlu0 %1409 }
 0x6ee   :  { %v3545_v7 = vadd.f32 %v1410_v9, %v1406_v35  ;;  %v3596_v35 = vld [vmem:[#allocation2 + $0x28] sm:$0xff]  ;;  %v3599_v9 = vld [vmem:[#allocation2 + $0x10] sm:$0xff] }
 0x6f0   :  { %2481 = vtanh.f32 %v3545_v7 }
 0x6f5   :  { %v1570_v44 = vpop.permute.xlu1 %1569 }
 0x6f6   :  { %v2482_v49 = vpop.eup %2481  ;;  %v3555_v40 = vadd.f32 %v1570_v44, %v1566_v19  ;;  %v2617_v19 = vld [vmem:[#allocation7 + $0x50] sm:$0xff]  ;;  %v2618_v44 = vld [vmem:[#allocation7 + $0x58] sm:$0xff] }
 0x6f7   :  { %v1414_v53 = vmul.f32 %v2482_v49, %v1403_v55  ;;  %v2619_v49 = vld [vmem:[#allocation7 + $0x40] sm:$0xff]  ;;  %v2620_v55 = vld [vmem:[#allocation7 + $0x48] sm:$0xff] }
 0x6f8   :  { %2483 = vtanh.f32 %v3555_v40 }
 0x6f9   :  { %2292 = vmatmul.msk.f32.vlgmr.msrb.gmra.mxu2 %vm136_vm8, %v1414_v53  ;;  %2293 = vmatmul.msk.f32.vlgmr.msrb.gmra.mxu3 %vm136_vm8, %v1414_v53  ;;  %v2621_v53 = vld [vmem:[#allocation7 + $0x30] sm:$0xff] }
 0x6fa   :  { %1744 = vmatpush.msrb.mxu2 %v3560_v57  ;;  %1764 = vmatpush.msrb.mxu3 %v3563_v56 }
 0x6fc   :  { %1745 = vmatpush.msrb.mxu2 %v3567_v1  ;;  %1765 = vmatpush.msrb.mxu3 %v3570_v38 }
 0x6fe   :  { %v2484_v36 = vpop.eup %2483  ;;  %1746 = vmatpush.msrb.mxu2 %v3573_v63  ;;  %1766 = vmatpush.msrb.mxu3 %v3576_v37 }
 0x6ff   :  { %v1574_v51 = vmul.f32 %v2484_v36, %v1563_v43 }
 0x700   :  { %1747 = vmatpush.msrb.mxu2 %v3579_v59  ;;  %1767 = vmatpush.msrb.mxu3 %v3582_v5 }
 0x701   :  { %2299 = vmatmul.msk.f32.vlgmr.msra.gmra.mxu2 %vm136_vm8, %v1574_v51  ;;  %2300 = vmatmul.msk.f32.vlgmr.msra.gmra.mxu3 %vm136_vm8, %v1574_v51 }
 0x702   :  { %1748 = vmatpush.msrb.mxu2 %v3587_v33  ;;  %1768 = vmatpush.msrb.mxu3 %v3590_v47 }
 0x704   :  { %1749 = vmatpush.msrb.mxu2 %v3593_v2  ;;  %1769 = vmatpush.msrb.mxu3 %v3596_v35 }
 0x706   :  { %1750 = vmatpush.msrb.mxu2 %v3599_v9  ;;  %1770 = vmatpush.msrb.mxu3 %v3602_v24 }
 0x708   :  { %1751 = vmatpush.msrb.mxu2 %v3605_v54  ;;  %1771 = vmatpush.msrb.mxu3 %v3608_v0 }
 0x709   :  { %2306 = vmatmul.msk.f32.vlgmr.msrb.gmra.mxu2 %vm136_vm8, %v1574_v51  ;;  %2307 = vmatmul.msk.f32.vlgmr.msrb.gmra.mxu3 %vm136_vm8, %v1574_v51 }
 0x70a   :  { %1928 = vmatpush.msra.mxu2 %v2613_v25  ;;  %1948 = vmatpush.msra.mxu3 %v2614_v22 }
 0x70c   :  { %1929 = vmatpush.msra.mxu2 %v2615_v23  ;;  %1949 = vmatpush.msra.mxu3 %v2616_v28 }
 0x70e   :  { %1930 = vmatpush.msra.mxu2 %v2617_v19  ;;  %1950 = vmatpush.msra.mxu3 %v2618_v44 }
 0x710   :  { %1931 = vmatpush.msra.mxu2 %v2619_v49  ;;  %1951 = vmatpush.msra.mxu3 %v2620_v55 }
 0x712   :  { %1932 = vmatpush.msra.mxu2 %v2621_v53  ;;  %1952 = vmatpush.msra.mxu3 %v2622_v45 }
 0x714   :  { %1933 = vmatpush.msra.mxu2 %v2623_v50  ;;  %1953 = vmatpush.msra.mxu3 %v2624_v4 }
 0x716   :  { %1934 = vmatpush.msra.mxu2 %v2625_v61  ;;  %1954 = vmatpush.msra.mxu3 %v2626_v52 }
 0x718   :  { %1935 = vmatpush.msra.mxu2 %v3397_v29  ;;  %1955 = vmatpush.msra.mxu3 %v3400_v31  ;;  %v1714_v29 = vpop.permute.xlu2 %1713 }
 0x719   :  { %v1717_v43 = vmul.f32 %v1714_v29, %v3896_v16 }
 0x71a   :  { %2088 = vmatpush.msrb.mxu2 %v3403_v58  ;;  %2108 = vmatpush.msrb.mxu3 %v3406_v60  ;;  %v1716_v58 = vmul.f32 %v1714_v29, %v3892_v3  ;;  %v1722_v60 = vpop.permute.xlu0 %1721 }
 0x71b   :  { %v1725_v22 = vmul.f32 %v1722_v60, %v3858_v18  ;;  %v1719_v23 = vadd.f32 %v1717_v43, %v3897_v12 }
 0x71c   :  { %2089 = vmatpush.msrb.mxu2 %v3409_v11  ;;  %2109 = vmatpush.msrb.mxu3 %v3879_v32  ;;  %v1724_v11 = vmul.f32 %v1722_v60, %v3893_v6  ;;  %v1718_v32 = vadd.f32 %v1716_v58, %v3895_v10 }
 0x71d   :  { %v1727_v45 = vadd.f32 %v1725_v22, %v1719_v23 }
 0x71e   :  { %2090 = vmatpush.msrb.mxu2 %v3880_v13  ;;  %2110 = vmatpush.msrb.mxu3 %v3881_v20  ;;  %v1730_v13 = vpop.permute.xlu1 %1729 }
 0x71f   :  { %v1733_v55 = vmul.f32 %v1730_v13, %v3859_v46 }
 0x720   :  { %2091 = vmatpush.msrb.mxu2 %v3882_v8  ;;  %2111 = vmatpush.msrb.mxu3 %v3883_v30 }
 0x721   :  { %v1735_v61 = vadd.f32 %v1733_v55, %v1727_v45 }
 0x722   :  { %2092 = vmatpush.msrb.mxu2 %v3884_v21  ;;  %2112 = vmatpush.msrb.mxu3 %v3885_v39  ;;  %v1732_v21 = vmul.f32 %v1730_v13, %v2872_v34  ;;  %v1726_v39 = vadd.f32 %v1724_v11, %v1718_v32 }
 0x724   :  { %2093 = vmatpush.msrb.mxu2 %v3886_v14  ;;  %2113 = vmatpush.msrb.mxu3 %v3887_v42 }
 0x726   :  { %2094 = vmatpush.msrb.mxu2 %v3888_v15  ;;  %2114 = vmatpush.msrb.mxu3 %v3889_v27  ;;  %v1734_v15 = vadd.f32 %v1732_v21, %v1726_v39 }
 0x728   :  { %2095 = vmatpush.msrb.mxu2 %v3890_v17  ;;  %2115 = vmatpush.msrb.mxu3 %v3891_v48 }
 0x77c   :  { %v1435_v31 = vpop.f32.mrf.mxu2  ;;  %v1455_v42 = vpop.f32.mrf.mxu3 }
 0x77d   :  { %v1436_v20 = vadd.f32 %v1435_v31, %v3894_v41  ;;  %v1456_v28 = vadd.f32 %v1455_v42, %v3876_v26 }
 0x784   :  { %v1595_v8 = vpop.f32.mrf.mxu2  ;;  %v1615_v25 = vpop.f32.mrf.mxu3 }
 0x785   :  { %v1596_v30 = vadd.f32 %v1595_v8, %v1436_v20  ;;  %v1616_v49 = vadd.f32 %v1615_v25, %v1456_v28 }
 0x787   :  { %v2301_v14 = vmul.f32 -1.442695, %v1596_v30  ;;  %v2302_v22 = vmul.f32 -1.442695, %v1616_v49 }
 0x789   :  { %2485 = vpow2.f32 %v2301_v14 }
 0x78c   :  { %v1753_v27 = vpop.f32.mrf.mxu2  ;;  %v1773_v29 = vpop.f32.mrf.mxu3 }
 0x78d   :  { %v1776_v17 = vadd.f32 %v1753_v27, %v1734_v15  ;;  %v1777_v32 = vadd.f32 %v1773_v29, %v1735_v61 }
 0x78f   :  { %v2486_v48 = vpop.eup %2485  ;;  %v2308_v36 = vmul.f32 -1.442695, %v1776_v17 }
 0x790   :  { %v1624_v51 = vadd.f32 1.0, %v2486_v48 }
 0x791   :  { %2487 = vpow2.f32 %v2308_v36 }
 0x792   :  { %2489 = vrcp.f32 %v1624_v51  ;;  %v1637_v52 = vand.u32 2147483648, %v1624_v51  ;;  %v1635_v58 = vand.u32 2147483647, %v1624_v51  ;;  %vm1631_vm15 = vweird.f32 %v1624_v51 }
 0x794   :  { %v1638_v20 = vor.u32 1.1754944e-38, %v1637_v52  ;;  %vm1636_vm1 = vcmp.eq.f32.partialorder %v1635_v58, 8.507059e+37 }
 0x797   :  { %v2488_v19 = vpop.eup %2487 }
 0x798   :  { %v2490_v44 = vpop.eup %2489  ;;  %v1784_v53 = vadd.f32 1.0, %v2488_v19 }
 0x799   :  { %v1627_v50 = vmul.f32 %v2490_v44, %v1624_v51  ;;  %vm1632_vm14 = vweird.f32 %v2490_v44 }
 0x79a   :  { %2491 = vrcp.f32 %v1784_v53  ;;  %vm1633_vm0 = vmor %vm1631_vm15, %vm1632_vm14  ;;  %v1797_v42 = vand.u32 2147483648, %v1784_v53  ;;  %v1795_v27 = vand.u32 2147483647, %v1784_v53  ;;  %vm1791_vm3 = vweird.f32 %v1784_v53 }
 0x79b   :  { %v1628_v4 = vsub.f32 1.0, %v1627_v50  ;;  %2493 = vtanh.f32 %v1616_v49 }
 0x79c   :  { %2495 = vtanh.f32 %v1777_v32  ;;  %v1798_v48 = vor.u32 1.1754944e-38, %v1797_v42  ;;  %vm1796_vm5 = vcmp.eq.f32.partialorder %v1795_v27, 8.507059e+37 }
 0x79d   :  { %v1629_v31 = vmul.f32 %v2490_v44, %v1628_v4  ;;  %2497 = vpow2.f32 %v2302_v22 }
 0x79f   :  { %v1630_v60 = vadd.f32 %v2490_v44, %v1629_v31 }
 0x7a0   :  { %v2492_v11 = vpop.eup %2491 }
 0x7a1   :  { %v1787_v8 = vmul.f32 %v2492_v11, %v1784_v53  ;;  %v1634_v13 = vsel %vm1633_vm0, %v2490_v44, %v1630_v60  ;;  %v2494_v30 = vpop.eup %2493  ;;  %vm1792_vm2 = vweird.f32 %v2492_v11  ;;  %v2309_v53 = vmul.f32 -1.442695, %v1777_v32 }
 0x7a2   :  { %v1639_v21 = vsel %vm1636_vm1, %v1638_v20, %v1634_v13  ;;  %vm1793_vm4 = vmor %vm1791_vm3, %vm1792_vm2  ;;  %v2496_v43 = vpop.eup %2495 }
 0x7a3   :  { %v1658_v39 = vmul.f32 %v2494_v30, %v1639_v21  ;;  %v1788_v14 = vsub.f32 1.0, %v1787_v8  ;;  %v2498_v23 = vpop.eup %2497  ;;  %v1657_v50 = vmul.f32 %v1639_v21, %v3545_v7  ;;  %v1973_v8 = vpop.permute.xlu0 %1972 }
 0x7a4   :  { %v1625_v28 = vadd.f32 1.0, %v2498_v23  ;;  %v1975_v42 = vmul.f32 %v1973_v8, %v3893_v6 }
 0x7a5   :  { %1660 = vrot.lane.b32.xlu2 %v1658_v39, %s2738_s29  ;;  %v1789_v15 = vmul.f32 %v2492_v11, %v1788_v14 }
 0x7a6   :  { %2499 = vrcp.f32 %v1625_v28  ;;  %v1652_v29 = vand.u32 2147483648, %v1625_v28  ;;  %vm1646_vm7 = vweird.f32 %v1625_v28 }
 0x7a7   :  { %v1790_v17 = vadd.f32 %v2492_v11, %v1789_v15  ;;  %2501 = vpow2.f32 %v2309_v53 }
 0x7a8   :  { %v1653_v58 = vor.u32 1.1754944e-38, %v1652_v29 }
 0x7a9   :  { %v1794_v36 = vsel %vm1793_vm4, %v2492_v11, %v1790_v17 }
 0x7aa   :  { %v1799_v51 = vsel %vm1796_vm5, %v1798_v48, %v1794_v36 }
 0x7ab   :  { %v1818_v25 = vmul.f32 %v2496_v43, %v1799_v51 }
 0x7ac   :  { %v2500_v19 = vpop.eup %2499 }
 0x7ad   :  { %1820 = vrot.lane.b32.xlu1 %v1818_v25, %s2738_s29  ;;  %1964 = vperm.xlu2 %2348, %v3550_v62   ;;  %v1642_v44 = vmul.f32 %v2500_v19, %v1625_v28  ;;  %vm1647_vm6 = vweird.f32 %v2500_v19  ;;  %v2502_v49 = vpop.eup %2501 }
 0x7ae   :  { %vm1648_vm9 = vmor %vm1646_vm7, %vm1647_vm6  ;;  %v1785_v11 = vadd.f32 1.0, %v2502_v49 }
 0x7af   :  { %v1643_v55 = vsub.f32 1.0, %v1642_v44 }
 0x7b0   :  { %vm1806_vm12 = vweird.f32 %v1785_v11 }
 0x7b1   :  { %v1644_v45 = vmul.f32 %v2500_v19, %v1643_v55 }
 0x7b3   :  { %v1645_v52 = vadd.f32 %v2500_v19, %v1644_v45  ;;  %v1976_v45 = vmul.f32 %v1973_v8, %v3858_v18 }
 0x7b5   :  { %1980 = vperm.xlu1 %2350, %v3550_v62   ;;  %v1650_v62 = vand.u32 2147483647, %v1625_v28  ;;  %v1649_v31 = vsel %vm1648_vm9, %v2500_v19, %v1645_v52 }
 0x7b7   :  { %vm1651_vm10 = vcmp.eq.f32.partialorder %v1650_v62, 8.507059e+37 }
 0x7b8   :  { %v1654_v32 = vsel %vm1651_vm10, %v1653_v58, %v1649_v31 }
 0x7ff   :  { %v1661_v4 = vpop.permute.xlu2 %1660 }
 0x800   :  { %v3646_v61 = vadd.f32 %v1661_v4, %v1657_v50 }
 0x802   :  { %2503 = vtanh.f32 %v3646_v61 }
 0x803   :  { %2505 = vrcp.f32 %v1785_v11 }
 0x808   :  { %v2504_v60 = vpop.eup %2503 }
 0x809   :  { %v1665_v7 = vmul.f32 %v2504_v60, %v1654_v32  ;;  %v2506_v20 = vpop.eup %2505 }
 0x80a   :  { %vm1807_vm11 = vweird.f32 %v2506_v20 }
 0x80b   :  { %2303 = vmatmul.msk.f32.vlgmr.msrb.gmra.mxu0 %vm136_vm8, %v1665_v7  ;;  %2304 = vmatmul.msk.f32.vlgmr.msrb.gmra.mxu1 %vm136_vm8, %v1665_v7  ;;  %vm1808_vm13 = vmor %vm1806_vm12, %vm1807_vm11 }
 0x80c   :  { %1995 = vmatpush.msrb.mxu0 %v3560_v57  ;;  %2015 = vmatpush.msrb.mxu1 %v3563_v56  ;;  %v1802_v57 = vmul.f32 %v2506_v20, %v1785_v11 }
 0x80e   :  { %1996 = vmatpush.msrb.mxu0 %v3567_v1  ;;  %2016 = vmatpush.msrb.mxu1 %v3570_v38  ;;  %v1803_v56 = vsub.f32 1.0, %v1802_v57  ;;  %v1817_v38 = vmul.f32 %v1799_v51, %v3555_v40 }
 0x810   :  { %1997 = vmatpush.msrb.mxu0 %v3573_v63  ;;  %2017 = vmatpush.msrb.mxu1 %v3576_v37  ;;  %v1804_v1 = vmul.f32 %v2506_v20, %v1803_v56 }
 0x812   :  { %1998 = vmatpush.msrb.mxu0 %v3579_v59  ;;  %2018 = vmatpush.msrb.mxu1 %v3582_v5  ;;  %v1805_v59 = vadd.f32 %v2506_v20, %v1804_v1  ;;  %v1812_v5 = vand.u32 2147483648, %v1785_v11 }
 0x814   :  { %1999 = vmatpush.msrb.mxu0 %v3587_v33  ;;  %2019 = vmatpush.msrb.mxu1 %v3590_v47  ;;  %v1810_v33 = vand.u32 2147483647, %v1785_v11  ;;  %v1809_v47 = vsel %vm1808_vm13, %v2506_v20, %v1805_v59 }
 0x816   :  { %2000 = vmatpush.msrb.mxu0 %v3593_v2  ;;  %2020 = vmatpush.msrb.mxu1 %v3596_v35  ;;  %v1813_v2 = vor.u32 1.1754944e-38, %v1812_v5  ;;  %vm1811_vm14 = vcmp.eq.f32.partialorder %v1810_v33, 8.507059e+37 }
 0x818   :  { %2001 = vmatpush.msrb.mxu0 %v3599_v9  ;;  %2021 = vmatpush.msrb.mxu1 %v3602_v24  ;;  %v1814_v9 = vsel %vm1811_vm14, %v1813_v2, %v1809_v47 }
 0x81a   :  { %2002 = vmatpush.msrb.mxu0 %v3605_v54  ;;  %2022 = vmatpush.msrb.mxu1 %v3608_v0  ;;  %v1965_v54 = vpop.permute.xlu2 %1964 }
 0x81b   :  { %v1967_v0 = vmul.f32 %v1965_v54, %v3892_v3 }
 0x81d   :  { %v1969_v39 = vadd.f32 %v1967_v0, %v3895_v10  ;;  %v1968_v10 = vmul.f32 %v1965_v54, %v3896_v16 }
 0x81f   :  { %v1821_v63 = vpop.permute.xlu1 %1820  ;;  %v1977_v17 = vadd.f32 %v1975_v42, %v1969_v39 }
 0x820   :  { %v3668_v37 = vadd.f32 %v1821_v63, %v1817_v38 }
 0x822   :  { %2507 = vtanh.f32 %v3668_v37 }
 0x827   :  { %v1981_v30 = vpop.permute.xlu1 %1980 }
 0x828   :  { %v2508_v35 = vpop.eup %2507  ;;  %v1983_v15 = vmul.f32 %v1981_v30, %v2872_v34  ;;  %v1970_v34 = vadd.f32 %v1968_v10, %v3897_v12  ;;  %v1984_v50 = vmul.f32 %v1981_v30, %v3859_v46 }
 0x829   :  { %v1825_v24 = vmul.f32 %v2508_v35, %v1814_v9 }
 0x82a   :  { %v1985_v36 = vadd.f32 %v1983_v15, %v1977_v17  ;;  %v1978_v52 = vadd.f32 %v1976_v45, %v1970_v34 }
 0x82b   :  { %2310 = vmatmul.msk.f32.vlgmr.msra.gmra.mxu0 %vm136_vm8, %v1825_v24  ;;  %2311 = vmatmul.msk.f32.vlgmr.msra.gmra.mxu1 %vm136_vm8, %v1825_v24 }
 0x82c   :  { %v1986_v31 = vadd.f32 %v1984_v50, %v1978_v52 }
 0x833   :  { %2317 = vmatmul.msk.f32.vlgmr.msrb.gmra.mxu0 %vm136_vm8, %v1825_v24  ;;  %2318 = vmatmul.msk.f32.vlgmr.msrb.gmra.mxu1 %vm136_vm8, %v1825_v24 }
 0x888   :  { %v1686_v40 = vpop.f32.mrf.mxu0  ;;  %v1706_v48 = vpop.f32.mrf.mxu1 }
 0x889   :  { %v1687_v13 = vadd.f32 %v1686_v40, %v3894_v41  ;;  %v1707_v28 = vadd.f32 %v1706_v48, %v3876_v26 }
 0x8a8   :  { %v1846_v21 = vpop.f32.mrf.mxu0  ;;  %v1866_v23 = vpop.f32.mrf.mxu1 }
 0x8a9   :  { %v1847_v14 = vadd.f32 %v1846_v21, %v1687_v13  ;;  %v1867_v44 = vadd.f32 %v1866_v23, %v1707_v28 }
 0x8ab   :  { %v2312_v27 = vmul.f32 -1.442695, %v1847_v14  ;;  %v2313_v35 = vmul.f32 -1.442695, %v1867_v44 }
 0x8ad   :  { %2509 = vpow2.f32 %v2312_v27 }
 0x8b0   :  { %v2004_v43 = vpop.f32.mrf.mxu0  ;;  %v2024_v62 = vpop.f32.mrf.mxu1 }
 0x8b1   :  { %v2027_v51 = vadd.f32 %v2004_v43, %v1985_v36  ;;  %v2028_v60 = vadd.f32 %v2024_v62, %v1986_v31 }
 0x8b3   :  { %v2510_v3 = vpop.eup %2509  ;;  %v2319_v25 = vmul.f32 -1.442695, %v2027_v51  ;;  %v2320_v8 = vmul.f32 -1.442695, %v2028_v60 }
 0x8b4   :  { %v1875_v22 = vadd.f32 1.0, %v2510_v3 }
 0x8b5   :  { %2511 = vpow2.f32 %v2319_v25 }
 0x8b6   :  { %2513 = vrcp.f32 %v1875_v22  ;;  %v1888_v29 = vand.u32 2147483648, %v1875_v22  ;;  %v1886_v49 = vand.u32 2147483647, %v1875_v22  ;;  %vm1882_vm0 = vweird.f32 %v1875_v22 }
 0x8b8   :  { %v1889_v11 = vor.u32 1.1754944e-38, %v1888_v29  ;;  %vm1887_vm2 = vcmp.eq.f32.partialorder %v1886_v49, 8.507059e+37  ;;  %v2174_v49 = vld [vmem:[%s3738_s7 + $0x30] sm:$0xff] }
 0x8bb   :  { %v2512_v6 = vpop.eup %2511 }
 0x8bc   :  { %v2514_v19 = vpop.eup %2513  ;;  %v2035_v55 = vadd.f32 1.0, %v2512_v6 }
 0x8bd   :  { %v1878_v53 = vmul.f32 %v2514_v19, %v1875_v22  ;;  %vm1883_vm15 = vweird.f32 %v2514_v19 }
 0x8be   :  { %2515 = vrcp.f32 %v2035_v55  ;;  %vm1884_vm1 = vmor %vm1882_vm0, %vm1883_vm15  ;;  %v2048_v56 = vand.u32 2147483648, %v2035_v55  ;;  %v2046_v38 = vand.u32 2147483647, %v2035_v55  ;;  %vm2042_vm4 = vweird.f32 %v2035_v55 }
 0x8bf   :  { %v1879_v4 = vsub.f32 1.0, %v1878_v53  ;;  %2517 = vtanh.f32 %v1867_v44 }
 0x8c0   :  { %2519 = vtanh.f32 %v2028_v60  ;;  %v2049_v59 = vor.u32 1.1754944e-38, %v2048_v56  ;;  %vm2047_vm6 = vcmp.eq.f32.partialorder %v2046_v38, 8.507059e+37 }
 0x8c1   :  { %v1880_v16 = vmul.f32 %v2514_v19, %v1879_v4  ;;  %2521 = vpow2.f32 %v2313_v35  ;;  %v2172_v35 = vld [vmem:[%s3738_s7 + $0x20] sm:$0xff] }
 0x8c3   :  { %v1881_v58 = vadd.f32 %v2514_v19, %v1880_v16  ;;  %v2175_v16 = vld [vmem:[%s3738_s7 + $0x38] sm:$0xff] }
 0x8c4   :  { %v2516_v12 = vpop.eup %2515  ;;  %2191 = vmatpush.msra.mxu0 %v2175_v16 }
 0x8c5   :  { %v2038_v32 = vmul.f32 %v2516_v12, %v2035_v55  ;;  %v1885_v18 = vsel %vm1884_vm1, %v2514_v19, %v1881_v58  ;;  %v2518_v46 = vpop.eup %2517  ;;  %vm2043_vm3 = vweird.f32 %v2516_v12 }
 0x8c6   :  { %v1890_v7 = vsel %vm1887_vm2, %v1889_v11, %v1885_v18  ;;  %vm2044_vm5 = vmor %vm2042_vm4, %vm2043_vm3  ;;  %v2520_v33 = vpop.eup %2519  ;;  %2192 = vmatpush.msra.mxu0 %v2174_v49 }
 0x8c7   :  { %v1909_v20 = vmul.f32 %v2518_v46, %v1890_v7  ;;  %v2039_v57 = vsub.f32 1.0, %v2038_v32  ;;  %v2522_v9 = vpop.eup %2521  ;;  %v1908_v30 = vmul.f32 %v1890_v7, %v3646_v61 }
 0x8c8   :  { %v1876_v24 = vadd.f32 1.0, %v2522_v9  ;;  %v2171_v9 = vld [vmem:[%s3738_s7 + $0x18] sm:$0xff] }
 0x8c9   :  { %1911 = vrot.lane.b32.xlu2 %v1909_v20, %s2738_s29  ;;  %v2040_v1 = vmul.f32 %v2516_v12, %v2039_v57 }
 0x8ca   :  { %2523 = vrcp.f32 %v1876_v24  ;;  %v1903_v42 = vand.u32 2147483648, %v1876_v24  ;;  %vm1897_vm9 = vweird.f32 %v1876_v24  ;;  %v1901_v15 = vand.u32 2147483647, %v1876_v24 }
 0x8cb   :  { %v2041_v63 = vadd.f32 %v2516_v12, %v2040_v1  ;;  %2525 = vpow2.f32 %v2320_v8 }
 0x8cc   :  { %v1904_v48 = vor.u32 1.1754944e-38, %v1903_v42  ;;  %vm1902_vm11 = vcmp.eq.f32.partialorder %v1901_v15, 8.507059e+37 }
 0x8cd   :  { %v2045_v5 = vsel %vm2044_vm5, %v2516_v12, %v2041_v63 }
 0x8ce   :  { %v2050_v47 = vsel %vm2047_vm6, %v2049_v59, %v2045_v5 }
 0x8cf   :  { %v2069_v2 = vmul.f32 %v2520_v33, %v2050_v47  ;;  %v2068_v10 = vmul.f32 %v2050_v47, %v3668_v37  ;;  %v2173_v47 = vld [vmem:[%s3738_s7 + $0x28] sm:$0xff] }
 0x8d0   :  { %v2524_v40 = vpop.eup %2523  ;;  %2193 = vmatpush.msra.mxu0 %v2173_v47 }
 0x8d1   :  { %2071 = vrot.lane.b32.xlu0 %v2069_v2, %s2738_s29  ;;  %v1893_v54 = vmul.f32 %v2524_v40, %v1876_v24  ;;  %vm1898_vm7 = vweird.f32 %v2524_v40  ;;  %v2526_v27 = vpop.eup %2525 }
 0x8d2   :  { %vm1899_vm10 = vmor %vm1897_vm9, %vm1898_vm7  ;;  %v2036_v43 = vadd.f32 1.0, %v2526_v27  ;;  %2194 = vmatpush.msra.mxu0 %v2172_v35 }
 0x8d3   :  { %v1894_v0 = vsub.f32 1.0, %v1893_v54  ;;  %v2169_v54 = vld [vmem:[%s3738_s7 + $0x8] sm:$0xff] }
 0x8d4   :  { %v2063_v34 = vand.u32 2147483648, %v2036_v43  ;;  %vm2057_vm13 = vweird.f32 %v2036_v43  ;;  %v2061_v44 = vand.u32 2147483647, %v2036_v43  ;;  %2195 = vmatpush.msra.mxu0 %v2171_v9 }
 0x8d5   :  { %v1895_v13 = vmul.f32 %v2524_v40, %v1894_v0  ;;  %v2168_v0 = vld [vmem:[%s3738_s7] sm:$0xff] }
 0x8d6   :  { %v2064_v53 = vor.u32 1.1754944e-38, %v2063_v34  ;;  %vm2062_vm15 = vcmp.eq.f32.partialorder %v2061_v44, 8.507059e+37 }
 0x8d7   :  { %v1896_v14 = vadd.f32 %v2524_v40, %v1895_v13 }
 0x8d9   :  { %v1900_v17 = vsel %vm1899_vm10, %v2524_v40, %v1896_v14  ;;  %v2170_v40 = vld [vmem:[%s3738_s7 + $0x10] sm:$0xff] }
 0x8da   :  { %v1905_v51 = vsel %vm1902_vm11, %v1904_v48, %v1900_v17  ;;  %2196 = vmatpush.msra.mxu0 %v2170_v40  ;;  %vm2222_vm11 = vcmask 17408  }
 0x8dc   :  { %2197 = vmatpush.msra.mxu0 %v2169_v54 }
 0x8de   :  { %2198 = vmatpush.msra.mxu0 %v2168_v0 }
 0x923   :  { %v1912_v21 = vpop.permute.xlu2 %1911 }
 0x924   :  { %v3688_v39 = vadd.f32 %v1912_v21, %v1908_v30 }
 0x926   :  { %2527 = vtanh.f32 %v3688_v39 }
 0x927   :  { %2529 = vrcp.f32 %v2036_v43 }
 0x92c   :  { %v2528_v36 = vpop.eup %2527 }
 0x92d   :  { %v1916_v61 = vmul.f32 %v2528_v36, %v1905_v51  ;;  %v2530_v3 = vpop.eup %2529 }
 0x92e   :  { %v2053_v25 = vmul.f32 %v2530_v3, %v2036_v43  ;;  %vm2058_vm12 = vweird.f32 %v2530_v3 }
 0x92f   :  { %2314 = vmatmul.msk.f32.vlgmr.msra.gmra.mxu2 %vm136_vm8, %v1916_v61  ;;  %2315 = vmatmul.msk.f32.vlgmr.msra.gmra.mxu3 %vm136_vm8, %v1916_v61  ;;  %vm2059_vm14 = vmor %vm2057_vm13, %vm2058_vm12 }
 0x930   :  { %v2054_v22 = vsub.f32 1.0, %v2053_v25 }
 0x932   :  { %v2055_v23 = vmul.f32 %v2530_v3, %v2054_v22 }
 0x934   :  { %v2056_v19 = vadd.f32 %v2530_v3, %v2055_v23 }
 0x936   :  { %v2060_v55 = vsel %vm2059_vm14, %v2530_v3, %v2056_v19 }
 0x937   :  { %v2065_v50 = vsel %vm2062_vm15, %v2064_v53, %v2060_v55 }
 0x943   :  { %v2072_v28 = vpop.permute.xlu0 %2071 }
 0x944   :  { %v2074_v6 = vadd.f32 %v2072_v28, %v2068_v10 }
 0x946   :  { %2531 = vtanh.f32 %v2074_v6 }
 0x94c   :  { %v2532_v45 = vpop.eup %2531 }
 0x94d   :  { %v2076_v4 = vmul.f32 %v2532_v45, %v2065_v50 }
 0x94f   :  { %2321 = vmatmul.msk.f32.vlgmr.msrb.gmra.mxu2 %vm136_vm8, %v2076_v4  ;;  %2322 = vmatmul.msk.f32.vlgmr.msrb.gmra.mxu3 %vm136_vm8, %v2076_v4 }
 0x9b2   :  { %v1937_v37 = vpop.f32.mrf.mxu2  ;;  %v1957_v58 = vpop.f32.mrf.mxu3 }
 0x9b3   :  { %v1938_v52 = vadd.f32 %v1937_v37, %v3894_v41  ;;  %v1958_v41 = vadd.f32 %v1957_v58, %v3876_v26 }
 0x9d2   :  { %v2097_v29 = vpop.f32.mrf.mxu2  ;;  %v2117_v11 = vpop.f32.mrf.mxu3 }
 0x9d3   :  { %v2098_v62 = vadd.f32 %v2097_v29, %v1938_v52  ;;  %v2118_v18 = vadd.f32 %v2117_v11, %v1958_v41 }
 0x9d5   :  { %v2323_v31 = vmul.f32 -1.442695, %v2098_v62  ;;  %v2324_v26 = vmul.f32 -1.442695, %v2118_v18 }
 0x9d7   :  { %2533 = vpow2.f32 %v2323_v31 }
 0x9dd   :  { %v2534_v12 = vpop.eup %2533 }
 0x9de   :  { %v2126_v60 = vadd.f32 1.0, %v2534_v12 }
 0x9e0   :  { %2535 = vrcp.f32 %v2126_v60  ;;  %v2139_v20 = vand.u32 2147483648, %v2126_v60  ;;  %v2137_v56 = vand.u32 2147483647, %v2126_v60  ;;  %vm2133_vm1 = vweird.f32 %v2126_v60 }
 0x9e1   :  { %2537 = vtanh.f32 %v2118_v18 }
 0x9e2   :  { %v2140_v38 = vor.u32 1.1754944e-38, %v2139_v20  ;;  %vm2138_vm3 = vcmp.eq.f32.partialorder %v2137_v56, 8.507059e+37  ;;  %2539 = vpow2.f32 %v2324_v26 }
 0x9e6   :  { %v2536_v32 = vpop.eup %2535 }
 0x9e7   :  { %v2129_v46 = vmul.f32 %v2536_v32, %v2126_v60  ;;  %vm2134_vm0 = vweird.f32 %v2536_v32  ;;  %v2538_v59 = vpop.eup %2537 }
 0x9e8   :  { %vm2135_vm2 = vmor %vm2133_vm1, %vm2134_vm0  ;;  %v2540_v2 = vpop.eup %2539 }
 0x9e9   :  { %v2130_v7 = vsub.f32 1.0, %v2129_v46  ;;  %v2127_v24 = vadd.f32 1.0, %v2540_v2 }
 0x9eb   :  { %v2131_v57 = vmul.f32 %v2536_v32, %v2130_v7  ;;  %2541 = vrcp.f32 %v2127_v24  ;;  %v2154_v17 = vand.u32 2147483648, %v2127_v24  ;;  %vm2148_vm5 = vweird.f32 %v2127_v24 }
 0x9ec   :  { %v2152_v48 = vand.u32 2147483647, %v2127_v24 }
 0x9ed   :  { %v2132_v1 = vadd.f32 %v2536_v32, %v2131_v57  ;;  %v2155_v43 = vor.u32 1.1754944e-38, %v2154_v17 }
 0x9ee   :  { %vm2153_vm7 = vcmp.eq.f32.partialorder %v2152_v48, 8.507059e+37 }
 0x9ef   :  { %v2136_v63 = vsel %vm2135_vm2, %v2536_v32, %v2132_v1 }
 0x9f0   :  { %v2141_v5 = vsel %vm2138_vm3, %v2140_v38, %v2136_v63 }
 0x9f1   :  { %v2160_v33 = vmul.f32 %v2538_v59, %v2141_v5  ;;  %v2542_v8 = vpop.eup %2541  ;;  %v2159_v14 = vmul.f32 %v2141_v5, %v3688_v39  ;;  %v2352_v39 = vld [vmem:[%s3739_s8] ss:$0 sm:$0xff]  ;;  %s2231_s8 = sshll.u32 %s3740_s9, 4  ;;  %s2232_s8 = int_to_ptr.hbm [resolvable:$true] %s2231_s8 }
 0x9f2   :  { %v2144_v13 = vmul.f32 %v2542_v8, %v2127_v24  ;;  %vm2149_vm4 = vweird.f32 %v2542_v8 }
 0x9f3   :  { %2162 = vrot.lane.b32.xlu1 %v2160_v33, %s2738_s29  ;;  %vm2150_vm6 = vmor %vm2148_vm5, %vm2149_vm4 }
 0x9f4   :  { %v2145_v30 = vsub.f32 1.0, %v2144_v13 }
 0x9f6   :  { %v2146_v21 = vmul.f32 %v2542_v8, %v2145_v30 }
 0x9f8   :  { %v2147_v27 = vadd.f32 %v2542_v8, %v2146_v21 }
 0x9fa   :  { %v2151_v36 = vsel %vm2150_vm6, %v2542_v8, %v2147_v27 }
 0x9fb   :  { %v2156_v61 = vsel %vm2153_vm7, %v2155_v43, %v2151_v36 }
 0xa65   :  { %v2163_v42 = vpop.permute.xlu1 %2162 }
 0xa66   :  { %v2165_v15 = vadd.f32 %v2163_v42, %v2159_v14 }
 0xa68   :  { %2543 = vtanh.f32 %v2165_v15 }
 0xa6e   :  { %v2544_v51 = vpop.eup %2543 }
 0xa6f   :  { %v2167_v3 = vmul.f32 %v2544_v51, %v2156_v61 }
 0xa71   :  { %2325 = vmatmul.msk.f32.vlgmr.msra.gmra.mxu0 %vm136_vm8, %v2167_v3 }
 0xaee   :  { %v2200_v25 = vpop.f32.mrf.mxu0 }
 0xaef   :  { %v2201_v22 = vadd.f32 %v2352_v39, %v2200_v25 }
 0xaf1   :  { %v2326_v23 = vmul.f32 -1.442695, %v2201_v22 }
 0xaf3   :  { %2545 = vpow2.f32 %v2326_v23 }
 0xaf9   :  { %v2546_v10 = vpop.eup %2545 }
 0xafa   :  { %v2206_v28 = vadd.f32 1.0, %v2546_v10 }
 0xafc   :  { %2547 = vrcp.f32 %v2206_v28  ;;  %v2218_v44 = vand.u32 2147483648, %v2206_v28  ;;  %v2216_v53 = vand.u32 2147483647, %v2206_v28  ;;  %vm2212_vm8 = vweird.f32 %v2206_v28 }
 0xafe   :  { %v2219_v50 = vor.u32 1.1754944e-38, %v2218_v44  ;;  %vm2217_vm12 = vcmp.eq.f32.partialorder %v2216_v53, 8.507059e+37 }
 0xb02   :  { %v2548_v6 = vpop.eup %2547 }
 0xb03   :  { %v2208_v19 = vmul.f32 %v2548_v6, %v2206_v28  ;;  %vm2213_vm9 = vweird.f32 %v2548_v6 }
 0xb04   :  { %vm2214_vm10 = vmor %vm2212_vm8, %vm2213_vm9 }
 0xb05   :  { %v2209_v34 = vsub.f32 1.0, %v2208_v19 }
 0xb07   :  { %v2210_v55 = vmul.f32 %v2548_v6, %v2209_v34 }
 0xb09   :  { %v2211_v45 = vadd.f32 %v2548_v6, %v2210_v55 }
 0xb0b   :  { %v2215_v4 = vsel %vm2214_vm10, %v2548_v6, %v2211_v45 }
 0xb0c   :  { %v2220_v37 = vsel %vm2217_vm12, %v2219_v50, %v2215_v4 }
 0xb0d   :  { %2223 = vst.msk [vmem:[#allocation8] sm:$0x3] %vm2222_vm11, %v2220_v37 }
 0xb0e   :  { %2234 = dma.vmem_to_hbm [thread:$0]  %s2230_s6, 32, %s2232_s8, [#allocation4]  }
 0xb0f   :  { %2727 = dma.done.wait [#allocation4], 32  }
 0xb10   :  { %2728 = vsyncadd [#allocation4], 4294967264 }
 0xb11   :  { %2239 = vsyncpa [#allocation3], 1 }
 0xb12   :  { %2240 = vsyncpa [#allocation6], 1 }
 0xb13   :  { %2241 = vsyncpa [#allocation4], 1 }

</bundles_post_ra>
